<compile_context>
chip_gen: v6e
topology: v6e:2x2x1
jax: 0.10.0
libtpu: 0.0.40
codegen_flags: <defaults>
</compile_context>

<pallas_src>
import jax
import jax.numpy as jnp
from jax.experimental import pallas as pl
from jax.experimental.pallas import tpu as pltpu


# ----------------------------- model dimensions ------------------------------
VOCAB = 40          # input_size / output_size of the PyTorch module
HIDDEN = 128        # hidden_size (lane-dense: exactly one 128-lane tile)
OUT = VOCAB
BATCH = 8           # sublane-dense (one 8-row sublane tile)
SEQ = 8

VOCAB_PAD = 128     # embedding rows padded to a full lane tile (one-hot gather)
OUT_PAD = 128       # FC output padded to 128 lanes (unmasked final store)


def _sigmoid(x):
    # sigmoid(x) = 0.5 * tanh(0.5*x) + 0.5 : one EUP push + cheap VPU mul/add
    # instead of exp + reciprocal.
    return 0.5 * jnp.tanh(0.5 * x) + 0.5


# ------------------------------ Pallas kernel --------------------------------

def char_lstm_kernel(ids_ref, emb_ref, wih_ref, whh_ref, b_ref,
                     wfc_ref, bfc_ref, out_ref, gx_ref):
    """Fused embedding gather + LSTM recurrence + last-step Linear head.

    ids_ref: (T*B, 1)        int32 token ids, time-major rows (row = t*B + b)
    emb_ref: (VOCAB_PAD, H)  bf16 embedding table (zero-padded rows)
    wih_ref: (H, 4H)         bf16 input->hidden weights (transposed, [i|f|g|o])
    whh_ref: (H, 4H)         bf16 hidden->hidden weights (transposed, [i|f|g|o])
    b_ref:   (1, 4H)         f32 folded bias (b_ih + b_hh)
    wfc_ref: (H, OUT_PAD)    bf16 FC weights (transposed, zero-padded cols)
    bfc_ref: (1, OUT_PAD)    f32 FC bias (zero-padded)
    out_ref: (B, OUT_PAD)    f32 logits of the last time step (padded lanes)
    gx_ref:  (T*B, 4H)       f32 VMEM scratch for the hoisted input projection
    """
    TB = ids_ref.shape[0]
    H = emb_ref.shape[1]
    B = out_ref.shape[0]
    T = TB // B

    # ---- In-kernel embedding gather via one-hot MXU matmul (no XLA gather,
    #      no HBM round trip of the (T*B, H) activation). ----
    lane_iota = jax.lax.broadcasted_iota(jnp.int32, (TB, emb_ref.shape[0]), 1)
    onehot = jnp.where(ids_ref[...] == lane_iota, 1.0, 0.0).astype(jnp.bfloat16)
    x = jnp.dot(onehot, emb_ref[...], preferred_element_type=jnp.float32)
    x = x.astype(jnp.bfloat16)                                     # (T*B, H)

    # ---- Hoisted, non-recurrent input projection for all time steps, with the
    #      folded bias, written per 128-lane gate chunk straight into VMEM
    #      scratch so the (T*B, 4H) f32 result is never live across the loop.
    for k in range(4):
        gcol = slice(k * H, (k + 1) * H)
        gx_ref[:, gcol] = (
            jnp.dot(x, wih_ref[:, gcol], preferred_element_type=jnp.float32)
            + b_ref[:, gcol])

    h = jnp.zeros((B, H), jnp.float32)
    c = jnp.zeros((B, H), jnp.float32)

    # ---- LSTM recurrence, static trip count -> fully unrolled at trace time.
    # Recurrent weights are read from whh_ref as per-gate (128,128) bf16 tiles
    # inside the loop (regalloc may keep or reload them; never a forced
    # 64-vreg live value on the serial path).
    # TODO(synk): stage w_hh once with pltpu.matmul_push_rhs/matmul_acc_lhs if
    #             the bundle dump shows Mosaic re-pushing the RHS every step.
    for t in range(T):
        row = slice(t * B, (t + 1) * B)
        h_b = h.astype(jnp.bfloat16)
        pre = []
        for k in range(4):                      # gate order [i | f | g | o]
            gcol = slice(k * H, (k + 1) * H)
            pre.append(gx_ref[row, gcol]
                       + jnp.dot(h_b, whh_ref[:, gcol],
                                 preferred_element_type=jnp.float32))
        i_g = _sigmoid(pre[0])
        f_g = _sigmoid(pre[1])
        g_g = jnp.tanh(pre[2])
        o_g = _sigmoid(pre[3])
        c = f_g * c + i_g * g_g
        h = o_g * jnp.tanh(c)

    # ---- FC head on the final hidden state only; lane-dense padded store. ----
    out_ref[...] = (jnp.dot(h.astype(jnp.bfloat16), wfc_ref[...],
                            preferred_element_type=jnp.float32)
                    + bfc_ref[...])


# -------------------------------- wrapper -------------------------------------

def _full_spec(shape):
    ndim = len(shape)
    return pl.BlockSpec(shape, lambda *_: (0,) * ndim)


def char_rnn_forward(tokens, kparams):
    """tokens: (B, T) int32 -> logits (B, OUT). Single fused pallas_call."""
    B, T = tokens.shape
    H = kparams["w_hh_t"].shape[0]

    # Time-major flattened token ids (row r = t*B + b). This tiny int32
    # reshape is the only XLA glue; the embedding gather happens in-kernel.
    ids = tokens.T.reshape(T * B, 1).astype(jnp.int32)

    out_pad = pl.pallas_call(
        char_lstm_kernel,
        out_shape=jax.ShapeDtypeStruct((B, OUT_PAD), jnp.float32),
        in_specs=[
            _full_spec((T * B, 1)),
            _full_spec(kparams["embedding"].shape),
            _full_spec(kparams["w_ih_t"].shape),
            _full_spec(kparams["w_hh_t"].shape),
            _full_spec(kparams["b"].shape),
            _full_spec(kparams["fc_w_t"].shape),
            _full_spec(kparams["fc_b"].shape),
        ],
        out_specs=_full_spec((B, OUT_PAD)),
        scratch_shapes=[pltpu.VMEM((T * B, 4 * H), jnp.float32)],
        compiler_params=pltpu.CompilerParams(vmem_limit_bytes=32 * 1024 * 1024),
        # TODO(synk): for B >= 16 on v7x, add a batch grid with
        #             dimension_semantics=("parallel",) to use both TensorCores.
    )(ids, kparams["embedding"], kparams["w_ih_t"], kparams["w_hh_t"],
      kparams["b"], kparams["fc_w_t"], kparams["fc_b"])

    return out_pad[:, :OUT]


# --------------------------- parameter creation --------------------------------

def init_params(key, vocab_size, hidden_size, output_size):
    ks = jax.random.split(key, 7)              # independent keys (no key reuse)
    scale = 1.0 / jnp.sqrt(hidden_size)

    def uni(k, shape):
        return jax.random.uniform(k, shape, jnp.float32, minval=-scale, maxval=scale)

    return {
        "embedding": jax.random.normal(ks[0], (vocab_size, hidden_size), jnp.float32),
        # stored transposed as (in_features, out_features); gates [i|f|g|o]
        "w_ih_t": uni(ks[1], (hidden_size, 4 * hidden_size)),
        "w_hh_t": uni(ks[2], (hidden_size, 4 * hidden_size)),
        # b_ih + b_hh folded into one bias row (they are always summed)
        "b": uni(ks[3], (1, 4 * hidden_size)) + uni(ks[4], (1, 4 * hidden_size)),
        "fc_w_t": uni(ks[5], (hidden_size, output_size)),
        "fc_b": uni(ks[6], (1, output_size)),
    }


def pack_params(params):
    """Kernel-side layout: bf16 matmul operands, lane-padded tables."""
    H = params["w_hh_t"].shape[0]
    O = params["fc_w_t"].shape[1]
    V = params["embedding"].shape[0]
    emb = jnp.zeros((VOCAB_PAD, H), jnp.bfloat16).at[:V].set(
        params["embedding"].astype(jnp.bfloat16))
    fc_w = jnp.zeros((H, OUT_PAD), jnp.bfloat16).at[:, :O].set(
        params["fc_w_t"].astype(jnp.bfloat16))
    fc_b = jnp.zeros((1, OUT_PAD), jnp.float32).at[:, :O].set(params["fc_b"])
    return {
        "embedding": emb,
        "w_ih_t": params["w_ih_t"].astype(jnp.bfloat16),
        "w_hh_t": params["w_hh_t"].astype(jnp.bfloat16),
        "b": params["b"],                      # f32, added after the MXU
        "fc_w_t": fc_w,
        "fc_b": fc_b,
    }


# ------------------------- pure-JAX references (checks) ------------------------

def reference_forward_f32(tokens, params):
    """Pure f32 forward matching the PyTorch module semantics exactly."""
    B, T = tokens.shape
    H = params["w_hh_t"].shape[0]
    emb = jnp.take(params["embedding"], tokens, axis=0)            # (B, T, H)
    h = jnp.zeros((B, H), jnp.float32)
    c = jnp.zeros((B, H), jnp.float32)
    for t in range(T):
        g = emb[:, t, :] @ params["w_ih_t"] + h @ params["w_hh_t"] + params["b"]
        i_g = jax.nn.sigmoid(g[:, 0 * H:1 * H])
        f_g = jax.nn.sigmoid(g[:, 1 * H:2 * H])
        g_g = jnp.tanh(g[:, 2 * H:3 * H])
        o_g = jax.nn.sigmoid(g[:, 3 * H:4 * H])
        c = f_g * c + i_g * g_g
        h = o_g * jnp.tanh(c)
    return h @ params["fc_w_t"] + params["fc_b"]


def reference_forward_bf16(tokens, kparams):
    """Mirrors the kernel numerics (bf16 MXU operands, f32 accumulate/state)."""
    B, T = tokens.shape
    H = kparams["w_hh_t"].shape[0]
    ids = tokens.T.reshape(-1)
    x = jnp.take(kparams["embedding"], ids, axis=0)                # (T*B, H) bf16
    gx = (jnp.dot(x, kparams["w_ih_t"], preferred_element_type=jnp.float32)
          + kparams["b"])
    h = jnp.zeros((B, H), jnp.float32)
    c = jnp.zeros((B, H), jnp.float32)
    for t in range(T):
        g = gx[t * B:(t + 1) * B] + jnp.dot(
            h.astype(jnp.bfloat16), kparams["w_hh_t"],
            preferred_element_type=jnp.float32)
        i_g = 0.5 * jnp.tanh(0.5 * g[:, 0 * H:1 * H]) + 0.5
        f_g = 0.5 * jnp.tanh(0.5 * g[:, 1 * H:2 * H]) + 0.5
        g_g = jnp.tanh(g[:, 2 * H:3 * H])
        o_g = 0.5 * jnp.tanh(0.5 * g[:, 3 * H:4 * H]) + 0.5
        c = f_g * c + i_g * g_g
        h = o_g * jnp.tanh(c)
    logits = (jnp.dot(h.astype(jnp.bfloat16), kparams["fc_w_t"],
                      preferred_element_type=jnp.float32) + kparams["fc_b"])
    return logits[:, :OUT]


# ---------------------------------- main ---------------------------------------

if __name__ == "__main__":
    key = jax.random.PRNGKey(0)
    k_params, k_tokens = jax.random.split(key)

    params = init_params(k_params, VOCAB, HIDDEN, OUT)
    kparams = pack_params(params)
    tokens = jax.random.randint(k_tokens, (BATCH, SEQ), 0, VOCAB, dtype=jnp.int32)

    out = jax.block_until_ready(char_rnn_forward(tokens, kparams))   # (B, OUT)
    assert out.shape == (BATCH, OUT)

    # Tight check vs a reference that mirrors the kernel's bf16-operand /
    # f32-accumulate numerics (validates the kernel logic itself).
    ref_bf16 = jax.block_until_ready(reference_forward_bf16(tokens, kparams))
    assert jnp.allclose(out, ref_bf16, atol=2e-3, rtol=2e-3), \
        "mismatch vs bf16-mirror reference"

    # Loose check vs the pure-f32 PyTorch-equivalent forward (bounds the bf16
    # operand rounding error).
    ref_f32 = jax.block_until_ready(reference_forward_f32(tokens, params))
    assert jnp.allclose(out, ref_f32, atol=3e-2, rtol=3e-2), \
        "mismatch vs f32 reference"

    print("KERNEL_OK")
</pallas_src>

<mosaic_0001>
module attributes {stable_mosaic.version = 11 : i64} {
  func.func @char_lstm_kernel(%arg0: memref<64x1xi32, #tpu.memory_space<vmem>>, %arg1: memref<128x128xbf16, #tpu.memory_space<vmem>>, %arg2: memref<128x512xbf16, #tpu.memory_space<vmem>>, %arg3: memref<128x512xbf16, #tpu.memory_space<vmem>>, %arg4: memref<1x512xf32, #tpu.memory_space<vmem>>, %arg5: memref<128x128xbf16, #tpu.memory_space<vmem>>, %arg6: memref<1x128xf32, #tpu.memory_space<vmem>>, %arg7: memref<8x128xf32, #tpu.memory_space<vmem>>, %arg8: memref<64x512xf32, #tpu.memory_space<vmem>>) attributes {dimension_semantics = [], scalar_prefetch = 0 : i64, scratch_operands = 1 : i64, tpu.core_type = #tpu.core_type<tc>} {
    %0 = tpu.iota {dimensions = array<i32: 1>} : vector<64x128xi32>
    %c0 = arith.constant 0 : index
    %c0_0 = arith.constant 0 : index
    %1 = vector.load %arg0[%c0, %c0_0] : memref<64x1xi32, #tpu.memory_space<vmem>>, vector<64x1xi32>
    %2 = vector.broadcast %1 : vector<64x1xi32> to vector<64x128xi32>
    %3 = arith.cmpi eq, %2, %0 : vector<64x128xi32>
    %cst = arith.constant 1.000000e+00 : f32
    %cst_1 = arith.constant 0.000000e+00 : f32
    %4 = vector.broadcast %cst : f32 to vector<64x128xf32>
    %5 = vector.broadcast %cst_1 : f32 to vector<64x128xf32>
    %6 = arith.select %3, %4, %5 : vector<64x128xi1>, vector<64x128xf32>
    %7 = arith.truncf %6 : vector<64x128xf32> to vector<64x128xbf16>
    %c0_2 = arith.constant 0 : index
    %c0_3 = arith.constant 0 : index
    %8 = vector.load %arg1[%c0_2, %c0_3] : memref<128x128xbf16, #tpu.memory_space<vmem>>, vector<128x128xbf16>
    %cst_4 = arith.constant dense<0.000000e+00> : vector<64x128xf32>
    %9 = tpu.matmul %7, %8, %cst_4 {dimension_numbers = #tpu.dot_dimension_numbers<[1], [0], [0], [1], [0, 0, 1, 1], [], []>} : vector<64x128xbf16>, vector<128x128xbf16>, vector<64x128xf32> -> vector<64x128xf32>
    %10 = arith.truncf %9 : vector<64x128xf32> to vector<64x128xbf16>
    %c0_5 = arith.constant 0 : index
    %c0_6 = arith.constant 0 : index
    %11 = vector.load %arg2[%c0_5, %c0_6] : memref<128x512xbf16, #tpu.memory_space<vmem>>, vector<128x128xbf16>
    %cst_7 = arith.constant dense<0.000000e+00> : vector<64x128xf32>
    %12 = tpu.matmul %10, %11, %cst_7 {dimension_numbers = #tpu.dot_dimension_numbers<[1], [0], [0], [1], [0, 0, 1, 1], [], []>} : vector<64x128xbf16>, vector<128x128xbf16>, vector<64x128xf32> -> vector<64x128xf32>
    %c0_8 = arith.constant 0 : index
    %c0_9 = arith.constant 0 : index
    %13 = vector.load %arg4[%c0_8, %c0_9] : memref<1x512xf32, #tpu.memory_space<vmem>>, vector<1x128xf32>
    %14 = vector.broadcast %13 : vector<1x128xf32> to vector<64x128xf32>
    %15 = arith.addf %12, %14 : vector<64x128xf32>
    %c0_10 = arith.constant 0 : index
    %c0_11 = arith.constant 0 : index
    %16 = vector.load %arg8[%c0_10, %c0_11] : memref<64x512xf32, #tpu.memory_space<vmem>>, vector<64x128xf32>
    tpu.vector_store %arg8[%c0_10, %c0_11], %15 {strides = array<i32>} : memref<64x512xf32, #tpu.memory_space<vmem>>, vector<64x128xf32>,
    %c0_12 = arith.constant 0 : index
    %c128 = arith.constant 128 : index
    %17 = vector.load %arg2[%c0_12, %c128] : memref<128x512xbf16, #tpu.memory_space<vmem>>, vector<128x128xbf16>
    %cst_13 = arith.constant dense<0.000000e+00> : vector<64x128xf32>
    %18 = tpu.matmul %10, %17, %cst_13 {dimension_numbers = #tpu.dot_dimension_numbers<[1], [0], [0], [1], [0, 0, 1, 1], [], []>} : vector<64x128xbf16>, vector<128x128xbf16>, vector<64x128xf32> -> vector<64x128xf32>
    %c0_14 = arith.constant 0 : index
    %c128_15 = arith.constant 128 : index
    %19 = vector.load %arg4[%c0_14, %c128_15] : memref<1x512xf32, #tpu.memory_space<vmem>>, vector<1x128xf32>
    %20 = vector.broadcast %19 : vector<1x128xf32> to vector<64x128xf32>
    %21 = arith.addf %18, %20 : vector<64x128xf32>
    %c0_16 = arith.constant 0 : index
    %c128_17 = arith.constant 128 : index
    %22 = vector.load %arg8[%c0_16, %c128_17] : memref<64x512xf32, #tpu.memory_space<vmem>>, vector<64x128xf32>
    tpu.vector_store %arg8[%c0_16, %c128_17], %21 {strides = array<i32>} : memref<64x512xf32, #tpu.memory_space<vmem>>, vector<64x128xf32>,
    %c0_18 = arith.constant 0 : index
    %c256 = arith.constant 256 : index
    %23 = vector.load %arg2[%c0_18, %c256] : memref<128x512xbf16, #tpu.memory_space<vmem>>, vector<128x128xbf16>
    %cst_19 = arith.constant dense<0.000000e+00> : vector<64x128xf32>
    %24 = tpu.matmul %10, %23, %cst_19 {dimension_numbers = #tpu.dot_dimension_numbers<[1], [0], [0], [1], [0, 0, 1, 1], [], []>} : vector<64x128xbf16>, vector<128x128xbf16>, vector<64x128xf32> -> vector<64x128xf32>
    %c0_20 = arith.constant 0 : index
    %c256_21 = arith.constant 256 : index
    %25 = vector.load %arg4[%c0_20, %c256_21] : memref<1x512xf32, #tpu.memory_space<vmem>>, vector<1x128xf32>
    %26 = vector.broadcast %25 : vector<1x128xf32> to vector<64x128xf32>
    %27 = arith.addf %24, %26 : vector<64x128xf32>
    %c0_22 = arith.constant 0 : index
    %c256_23 = arith.constant 256 : index
    %28 = vector.load %arg8[%c0_22, %c256_23] : memref<64x512xf32, #tpu.memory_space<vmem>>, vector<64x128xf32>
    tpu.vector_store %arg8[%c0_22, %c256_23], %27 {strides = array<i32>} : memref<64x512xf32, #tpu.memory_space<vmem>>, vector<64x128xf32>,
    %c0_24 = arith.constant 0 : index
    %c384 = arith.constant 384 : index
    %29 = vector.load %arg2[%c0_24, %c384] : memref<128x512xbf16, #tpu.memory_space<vmem>>, vector<128x128xbf16>
    %cst_25 = arith.constant dense<0.000000e+00> : vector<64x128xf32>
    %30 = tpu.matmul %10, %29, %cst_25 {dimension_numbers = #tpu.dot_dimension_numbers<[1], [0], [0], [1], [0, 0, 1, 1], [], []>} : vector<64x128xbf16>, vector<128x128xbf16>, vector<64x128xf32> -> vector<64x128xf32>
    %c0_26 = arith.constant 0 : index
    %c384_27 = arith.constant 384 : index
    %31 = vector.load %arg4[%c0_26, %c384_27] : memref<1x512xf32, #tpu.memory_space<vmem>>, vector<1x128xf32>
    %32 = vector.broadcast %31 : vector<1x128xf32> to vector<64x128xf32>
    %33 = arith.addf %30, %32 : vector<64x128xf32>
    %c0_28 = arith.constant 0 : index
    %c384_29 = arith.constant 384 : index
    %34 = vector.load %arg8[%c0_28, %c384_29] : memref<64x512xf32, #tpu.memory_space<vmem>>, vector<64x128xf32>
    tpu.vector_store %arg8[%c0_28, %c384_29], %33 {strides = array<i32>} : memref<64x512xf32, #tpu.memory_space<vmem>>, vector<64x128xf32>,
    %cst_30 = arith.constant 0.000000e+00 : f32
    %35 = vector.broadcast %cst_30 : f32 to vector<8x128xf32>
    %cst_31 = arith.constant 0.000000e+00 : f32
    %36 = vector.broadcast %cst_31 : f32 to vector<8x128xf32>
    %37 = arith.truncf %35 : vector<8x128xf32> to vector<8x128xbf16>
    %c0_32 = arith.constant 0 : index
    %c0_33 = arith.constant 0 : index
    %38 = vector.load %arg8[%c0_32, %c0_33] : memref<64x512xf32, #tpu.memory_space<vmem>>, vector<8x128xf32>
    %c0_34 = arith.constant 0 : index
    %c0_35 = arith.constant 0 : index
    %39 = vector.load %arg3[%c0_34, %c0_35] : memref<128x512xbf16, #tpu.memory_space<vmem>>, vector<128x128xbf16>
    %cst_36 = arith.constant dense<0.000000e+00> : vector<8x128xf32>
    %40 = tpu.matmul %37, %39, %cst_36 {dimension_numbers = #tpu.dot_dimension_numbers<[1], [0], [0], [1], [0, 0, 1, 1], [], []>} : vector<8x128xbf16>, vector<128x128xbf16>, vector<8x128xf32> -> vector<8x128xf32>
    %41 = arith.addf %38, %40 : vector<8x128xf32>
    %c0_37 = arith.constant 0 : index
    %c128_38 = arith.constant 128 : index
    %42 = vector.load %arg8[%c0_37, %c128_38] : memref<64x512xf32, #tpu.memory_space<vmem>>, vector<8x128xf32>
    %c0_39 = arith.constant 0 : index
    %c128_40 = arith.constant 128 : index
    %43 = vector.load %arg3[%c0_39, %c128_40] : memref<128x512xbf16, #tpu.memory_space<vmem>>, vector<128x128xbf16>
    %cst_41 = arith.constant dense<0.000000e+00> : vector<8x128xf32>
    %44 = tpu.matmul %37, %43, %cst_41 {dimension_numbers = #tpu.dot_dimension_numbers<[1], [0], [0], [1], [0, 0, 1, 1], [], []>} : vector<8x128xbf16>, vector<128x128xbf16>, vector<8x128xf32> -> vector<8x128xf32>
    %45 = arith.addf %42, %44 : vector<8x128xf32>
    %c0_42 = arith.constant 0 : index
    %c256_43 = arith.constant 256 : index
    %46 = vector.load %arg8[%c0_42, %c256_43] : memref<64x512xf32, #tpu.memory_space<vmem>>, vector<8x128xf32>
    %c0_44 = arith.constant 0 : index
    %c256_45 = arith.constant 256 : index
    %47 = vector.load %arg3[%c0_44, %c256_45] : memref<128x512xbf16, #tpu.memory_space<vmem>>, vector<128x128xbf16>
    %cst_46 = arith.constant dense<0.000000e+00> : vector<8x128xf32>
    %48 = tpu.matmul %37, %47, %cst_46 {dimension_numbers = #tpu.dot_dimension_numbers<[1], [0], [0], [1], [0, 0, 1, 1], [], []>} : vector<8x128xbf16>, vector<128x128xbf16>, vector<8x128xf32> -> vector<8x128xf32>
    %49 = arith.addf %46, %48 : vector<8x128xf32>
    %c0_47 = arith.constant 0 : index
    %c384_48 = arith.constant 384 : index
    %50 = vector.load %arg8[%c0_47, %c384_48] : memref<64x512xf32, #tpu.memory_space<vmem>>, vector<8x128xf32>
    %c0_49 = arith.constant 0 : index
    %c384_50 = arith.constant 384 : index
    %51 = vector.load %arg3[%c0_49, %c384_50] : memref<128x512xbf16, #tpu.memory_space<vmem>>, vector<128x128xbf16>
    %cst_51 = arith.constant dense<0.000000e+00> : vector<8x128xf32>
    %52 = tpu.matmul %37, %51, %cst_51 {dimension_numbers = #tpu.dot_dimension_numbers<[1], [0], [0], [1], [0, 0, 1, 1], [], []>} : vector<8x128xbf16>, vector<128x128xbf16>, vector<8x128xf32> -> vector<8x128xf32>
    %53 = arith.addf %50, %52 : vector<8x128xf32>
    %cst_52 = arith.constant 5.000000e-01 : f32
    %54 = vector.broadcast %cst_52 : f32 to vector<8x128xf32>
    %55 = arith.mulf %54, %41 : vector<8x128xf32>
    %56 = math.tanh %55 : vector<8x128xf32>
    %cst_53 = arith.constant 5.000000e-01 : f32
    %57 = vector.broadcast %cst_53 : f32 to vector<8x128xf32>
    %58 = arith.mulf %57, %56 : vector<8x128xf32>
    %cst_54 = arith.constant 5.000000e-01 : f32
    %59 = vector.broadcast %cst_54 : f32 to vector<8x128xf32>
    %60 = arith.addf %58, %59 : vector<8x128xf32>
    %cst_55 = arith.constant 5.000000e-01 : f32
    %61 = vector.broadcast %cst_55 : f32 to vector<8x128xf32>
    %62 = arith.mulf %61, %45 : vector<8x128xf32>
    %63 = math.tanh %62 : vector<8x128xf32>
    %cst_56 = arith.constant 5.000000e-01 : f32
    %64 = vector.broadcast %cst_56 : f32 to vector<8x128xf32>
    %65 = arith.mulf %64, %63 : vector<8x128xf32>
    %cst_57 = arith.constant 5.000000e-01 : f32
    %66 = vector.broadcast %cst_57 : f32 to vector<8x128xf32>
    %67 = arith.addf %65, %66 : vector<8x128xf32>
    %68 = math.tanh %49 : vector<8x128xf32>
    %cst_58 = arith.constant 5.000000e-01 : f32
    %69 = vector.broadcast %cst_58 : f32 to vector<8x128xf32>
    %70 = arith.mulf %69, %53 : vector<8x128xf32>
    %71 = math.tanh %70 : vector<8x128xf32>
    %cst_59 = arith.constant 5.000000e-01 : f32
    %72 = vector.broadcast %cst_59 : f32 to vector<8x128xf32>
    %73 = arith.mulf %72, %71 : vector<8x128xf32>
    %cst_60 = arith.constant 5.000000e-01 : f32
    %74 = vector.broadcast %cst_60 : f32 to vector<8x128xf32>
    %75 = arith.addf %73, %74 : vector<8x128xf32>
    %76 = arith.mulf %67, %36 : vector<8x128xf32>
    %77 = arith.mulf %60, %68 : vector<8x128xf32>
    %78 = arith.addf %76, %77 : vector<8x128xf32>
    %79 = math.tanh %78 : vector<8x128xf32>
    %80 = arith.mulf %75, %79 : vector<8x128xf32>
    %81 = arith.truncf %80 : vector<8x128xf32> to vector<8x128xbf16>
    %c8 = arith.constant 8 : index
    %c0_61 = arith.constant 0 : index
    %82 = vector.load %arg8[%c8, %c0_61] : memref<64x512xf32, #tpu.memory_space<vmem>>, vector<8x128xf32>
    %c0_62 = arith.constant 0 : index
    %c0_63 = arith.constant 0 : index
    %83 = vector.load %arg3[%c0_62, %c0_63] : memref<128x512xbf16, #tpu.memory_space<vmem>>, vector<128x128xbf16>
    %cst_64 = arith.constant dense<0.000000e+00> : vector<8x128xf32>
    %84 = tpu.matmul %81, %83, %cst_64 {dimension_numbers = #tpu.dot_dimension_numbers<[1], [0], [0], [1], [0, 0, 1, 1], [], []>} : vector<8x128xbf16>, vector<128x128xbf16>, vector<8x128xf32> -> vector<8x128xf32>
    %85 = arith.addf %82, %84 : vector<8x128xf32>
    %c8_65 = arith.constant 8 : index
    %c128_66 = arith.constant 128 : index
    %86 = vector.load %arg8[%c8_65, %c128_66] : memref<64x512xf32, #tpu.memory_space<vmem>>, vector<8x128xf32>
    %c0_67 = arith.constant 0 : index
    %c128_68 = arith.constant 128 : index
    %87 = vector.load %arg3[%c0_67, %c128_68] : memref<128x512xbf16, #tpu.memory_space<vmem>>, vector<128x128xbf16>
    %cst_69 = arith.constant dense<0.000000e+00> : vector<8x128xf32>
    %88 = tpu.matmul %81, %87, %cst_69 {dimension_numbers = #tpu.dot_dimension_numbers<[1], [0], [0], [1], [0, 0, 1, 1], [], []>} : vector<8x128xbf16>, vector<128x128xbf16>, vector<8x128xf32> -> vector<8x128xf32>
    %89 = arith.addf %86, %88 : vector<8x128xf32>
    %c8_70 = arith.constant 8 : index
    %c256_71 = arith.constant 256 : index
    %90 = vector.load %arg8[%c8_70, %c256_71] : memref<64x512xf32, #tpu.memory_space<vmem>>, vector<8x128xf32>
    %c0_72 = arith.constant 0 : index
    %c256_73 = arith.constant 256 : index
    %91 = vector.load %arg3[%c0_72, %c256_73] : memref<128x512xbf16, #tpu.memory_space<vmem>>, vector<128x128xbf16>
    %cst_74 = arith.constant dense<0.000000e+00> : vector<8x128xf32>
    %92 = tpu.matmul %81, %91, %cst_74 {dimension_numbers = #tpu.dot_dimension_numbers<[1], [0], [0], [1], [0, 0, 1, 1], [], []>} : vector<8x128xbf16>, vector<128x128xbf16>, vector<8x128xf32> -> vector<8x128xf32>
    %93 = arith.addf %90, %92 : vector<8x128xf32>
    %c8_75 = arith.constant 8 : index
    %c384_76 = arith.constant 384 : index
    %94 = vector.load %arg8[%c8_75, %c384_76] : memref<64x512xf32, #tpu.memory_space<vmem>>, vector<8x128xf32>
    %c0_77 = arith.constant 0 : index
    %c384_78 = arith.constant 384 : index
    %95 = vector.load %arg3[%c0_77, %c384_78] : memref<128x512xbf16, #tpu.memory_space<vmem>>, vector<128x128xbf16>
    %cst_79 = arith.constant dense<0.000000e+00> : vector<8x128xf32>
    %96 = tpu.matmul %81, %95, %cst_79 {dimension_numbers = #tpu.dot_dimension_numbers<[1], [0], [0], [1], [0, 0, 1, 1], [], []>} : vector<8x128xbf16>, vector<128x128xbf16>, vector<8x128xf32> -> vector<8x128xf32>
    %97 = arith.addf %94, %96 : vector<8x128xf32>
    %cst_80 = arith.constant 5.000000e-01 : f32
    %98 = vector.broadcast %cst_80 : f32 to vector<8x128xf32>
    %99 = arith.mulf %98, %85 : vector<8x128xf32>
    %100 = math.tanh %99 : vector<8x128xf32>
    %cst_81 = arith.constant 5.000000e-01 : f32
    %101 = vector.broadcast %cst_81 : f32 to vector<8x128xf32>
    %102 = arith.mulf %101, %100 : vector<8x128xf32>
    %cst_82 = arith.constant 5.000000e-01 : f32
    %103 = vector.broadcast %cst_82 : f32 to vector<8x128xf32>
    %104 = arith.addf %102, %103 : vector<8x128xf32>
    %cst_83 = arith.constant 5.000000e-01 : f32
    %105 = vector.broadcast %cst_83 : f32 to vector<8x128xf32>
    %106 = arith.mulf %105, %89 : vector<8x128xf32>
    %107 = math.tanh %106 : vector<8x128xf32>
    %cst_84 = arith.constant 5.000000e-01 : f32
    %108 = vector.broadcast %cst_84 : f32 to vector<8x128xf32>
    %109 = arith.mulf %108, %107 : vector<8x128xf32>
    %cst_85 = arith.constant 5.000000e-01 : f32
    %110 = vector.broadcast %cst_85 : f32 to vector<8x128xf32>
    %111 = arith.addf %109, %110 : vector<8x128xf32>
    %112 = math.tanh %93 : vector<8x128xf32>
    %cst_86 = arith.constant 5.000000e-01 : f32
    %113 = vector.broadcast %cst_86 : f32 to vector<8x128xf32>
    %114 = arith.mulf %113, %97 : vector<8x128xf32>
    %115 = math.tanh %114 : vector<8x128xf32>
    %cst_87 = arith.constant 5.000000e-01 : f32
    %116 = vector.broadcast %cst_87 : f32 to vector<8x128xf32>
    %117 = arith.mulf %116, %115 : vector<8x128xf32>
    %cst_88 = arith.constant 5.000000e-01 : f32
    %118 = vector.broadcast %cst_88 : f32 to vector<8x128xf32>
    %119 = arith.addf %117, %118 : vector<8x128xf32>
    %120 = arith.mulf %111, %78 : vector<8x128xf32>
    %121 = arith.mulf %104, %112 : vector<8x128xf32>
    %122 = arith.addf %120, %121 : vector<8x128xf32>
    %123 = math.tanh %122 : vector<8x128xf32>
    %124 = arith.mulf %119, %123 : vector<8x128xf32>
    %125 = arith.truncf %124 : vector<8x128xf32> to vector<8x128xbf16>
    %c16 = arith.constant 16 : index
    %c0_89 = arith.constant 0 : index
    %126 = vector.load %arg8[%c16, %c0_89] : memref<64x512xf32, #tpu.memory_space<vmem>>, vector<8x128xf32>
    %c0_90 = arith.constant 0 : index
    %c0_91 = arith.constant 0 : index
    %127 = vector.load %arg3[%c0_90, %c0_91] : memref<128x512xbf16, #tpu.memory_space<vmem>>, vector<128x128xbf16>
    %cst_92 = arith.constant dense<0.000000e+00> : vector<8x128xf32>
    %128 = tpu.matmul %125, %127, %cst_92 {dimension_numbers = #tpu.dot_dimension_numbers<[1], [0], [0], [1], [0, 0, 1, 1], [], []>} : vector<8x128xbf16>, vector<128x128xbf16>, vector<8x128xf32> -> vector<8x128xf32>
    %129 = arith.addf %126, %128 : vector<8x128xf32>
    %c16_93 = arith.constant 16 : index
    %c128_94 = arith.constant 128 : index
    %130 = vector.load %arg8[%c16_93, %c128_94] : memref<64x512xf32, #tpu.memory_space<vmem>>, vector<8x128xf32>
    %c0_95 = arith.constant 0 : index
    %c128_96 = arith.constant 128 : index
    %131 = vector.load %arg3[%c0_95, %c128_96] : memref<128x512xbf16, #tpu.memory_space<vmem>>, vector<128x128xbf16>
    %cst_97 = arith.constant dense<0.000000e+00> : vector<8x128xf32>
    %132 = tpu.matmul %125, %131, %cst_97 {dimension_numbers = #tpu.dot_dimension_numbers<[1], [0], [0], [1], [0, 0, 1, 1], [], []>} : vector<8x128xbf16>, vector<128x128xbf16>, vector<8x128xf32> -> vector<8x128xf32>
    %133 = arith.addf %130, %132 : vector<8x128xf32>
    %c16_98 = arith.constant 16 : index
    %c256_99 = arith.constant 256 : index
    %134 = vector.load %arg8[%c16_98, %c256_99] : memref<64x512xf32, #tpu.memory_space<vmem>>, vector<8x128xf32>
    %c0_100 = arith.constant 0 : index
    %c256_101 = arith.constant 256 : index
    %135 = vector.load %arg3[%c0_100, %c256_101] : memref<128x512xbf16, #tpu.memory_space<vmem>>, vector<128x128xbf16>
    %cst_102 = arith.constant dense<0.000000e+00> : vector<8x128xf32>
    %136 = tpu.matmul %125, %135, %cst_102 {dimension_numbers = #tpu.dot_dimension_numbers<[1], [0], [0], [1], [0, 0, 1, 1], [], []>} : vector<8x128xbf16>, vector<128x128xbf16>, vector<8x128xf32> -> vector<8x128xf32>
    %137 = arith.addf %134, %136 : vector<8x128xf32>
    %c16_103 = arith.constant 16 : index
    %c384_104 = arith.constant 384 : index
    %138 = vector.load %arg8[%c16_103, %c384_104] : memref<64x512xf32, #tpu.memory_space<vmem>>, vector<8x128xf32>
    %c0_105 = arith.constant 0 : index
    %c384_106 = arith.constant 384 : index
    %139 = vector.load %arg3[%c0_105, %c384_106] : memref<128x512xbf16, #tpu.memory_space<vmem>>, vector<128x128xbf16>
    %cst_107 = arith.constant dense<0.000000e+00> : vector<8x128xf32>
    %140 = tpu.matmul %125, %139, %cst_107 {dimension_numbers = #tpu.dot_dimension_numbers<[1], [0], [0], [1], [0, 0, 1, 1], [], []>} : vector<8x128xbf16>, vector<128x128xbf16>, vector<8x128xf32> -> vector<8x128xf32>
    %141 = arith.addf %138, %140 : vector<8x128xf32>
    %cst_108 = arith.constant 5.000000e-01 : f32
    %142 = vector.broadcast %cst_108 : f32 to vector<8x128xf32>
    %143 = arith.mulf %142, %129 : vector<8x128xf32>
    %144 = math.tanh %143 : vector<8x128xf32>
    %cst_109 = arith.constant 5.000000e-01 : f32
    %145 = vector.broadcast %cst_109 : f32 to vector<8x128xf32>
    %146 = arith.mulf %145, %144 : vector<8x128xf32>
    %cst_110 = arith.constant 5.000000e-01 : f32
    %147 = vector.broadcast %cst_110 : f32 to vector<8x128xf32>
    %148 = arith.addf %146, %147 : vector<8x128xf32>
    %cst_111 = arith.constant 5.000000e-01 : f32
    %149 = vector.broadcast %cst_111 : f32 to vector<8x128xf32>
    %150 = arith.mulf %149, %133 : vector<8x128xf32>
    %151 = math.tanh %150 : vector<8x128xf32>
    %cst_112 = arith.constant 5.000000e-01 : f32
    %152 = vector.broadcast %cst_112 : f32 to vector<8x128xf32>
    %153 = arith.mulf %152, %151 : vector<8x128xf32>
    %cst_113 = arith.constant 5.000000e-01 : f32
    %154 = vector.broadcast %cst_113 : f32 to vector<8x128xf32>
    %155 = arith.addf %153, %154 : vector<8x128xf32>
    %156 = math.tanh %137 : vector<8x128xf32>
    %cst_114 = arith.constant 5.000000e-01 : f32
    %157 = vector.broadcast %cst_114 : f32 to vector<8x128xf32>
    %158 = arith.mulf %157, %141 : vector<8x128xf32>
    %159 = math.tanh %158 : vector<8x128xf32>
    %cst_115 = arith.constant 5.000000e-01 : f32
    %160 = vector.broadcast %cst_115 : f32 to vector<8x128xf32>
    %161 = arith.mulf %160, %159 : vector<8x128xf32>
    %cst_116 = arith.constant 5.000000e-01 : f32
    %162 = vector.broadcast %cst_116 : f32 to vector<8x128xf32>
    %163 = arith.addf %161, %162 : vector<8x128xf32>
    %164 = arith.mulf %155, %122 : vector<8x128xf32>
    %165 = arith.mulf %148, %156 : vector<8x128xf32>
    %166 = arith.addf %164, %165 : vector<8x128xf32>
    %167 = math.tanh %166 : vector<8x128xf32>
    %168 = arith.mulf %163, %167 : vector<8x128xf32>
    %169 = arith.truncf %168 : vector<8x128xf32> to vector<8x128xbf16>
    %c24 = arith.constant 24 : index
    %c0_117 = arith.constant 0 : index
    %170 = vector.load %arg8[%c24, %c0_117] : memref<64x512xf32, #tpu.memory_space<vmem>>, vector<8x128xf32>
    %c0_118 = arith.constant 0 : index
    %c0_119 = arith.constant 0 : index
    %171 = vector.load %arg3[%c0_118, %c0_119] : memref<128x512xbf16, #tpu.memory_space<vmem>>, vector<128x128xbf16>
    %cst_120 = arith.constant dense<0.000000e+00> : vector<8x128xf32>
    %172 = tpu.matmul %169, %171, %cst_120 {dimension_numbers = #tpu.dot_dimension_numbers<[1], [0], [0], [1], [0, 0, 1, 1], [], []>} : vector<8x128xbf16>, vector<128x128xbf16>, vector<8x128xf32> -> vector<8x128xf32>
    %173 = arith.addf %170, %172 : vector<8x128xf32>
    %c24_121 = arith.constant 24 : index
    %c128_122 = arith.constant 128 : index
    %174 = vector.load %arg8[%c24_121, %c128_122] : memref<64x512xf32, #tpu.memory_space<vmem>>, vector<8x128xf32>
    %c0_123 = arith.constant 0 : index
    %c128_124 = arith.constant 128 : index
    %175 = vector.load %arg3[%c0_123, %c128_124] : memref<128x512xbf16, #tpu.memory_space<vmem>>, vector<128x128xbf16>
    %cst_125 = arith.constant dense<0.000000e+00> : vector<8x128xf32>
    %176 = tpu.matmul %169, %175, %cst_125 {dimension_numbers = #tpu.dot_dimension_numbers<[1], [0], [0], [1], [0, 0, 1, 1], [], []>} : vector<8x128xbf16>, vector<128x128xbf16>, vector<8x128xf32> -> vector<8x128xf32>
    %177 = arith.addf %174, %176 : vector<8x128xf32>
    %c24_126 = arith.constant 24 : index
    %c256_127 = arith.constant 256 : index
    %178 = vector.load %arg8[%c24_126, %c256_127] : memref<64x512xf32, #tpu.memory_space<vmem>>, vector<8x128xf32>
    %c0_128 = arith.constant 0 : index
    %c256_129 = arith.constant 256 : index
    %179 = vector.load %arg3[%c0_128, %c256_129] : memref<128x512xbf16, #tpu.memory_space<vmem>>, vector<128x128xbf16>
    %cst_130 = arith.constant dense<0.000000e+00> : vector<8x128xf32>
    %180 = tpu.matmul %169, %179, %cst_130 {dimension_numbers = #tpu.dot_dimension_numbers<[1], [0], [0], [1], [0, 0, 1, 1], [], []>} : vector<8x128xbf16>, vector<128x128xbf16>, vector<8x128xf32> -> vector<8x128xf32>
    %181 = arith.addf %178, %180 : vector<8x128xf32>
    %c24_131 = arith.constant 24 : index
    %c384_132 = arith.constant 384 : index
    %182 = vector.load %arg8[%c24_131, %c384_132] : memref<64x512xf32, #tpu.memory_space<vmem>>, vector<8x128xf32>
    %c0_133 = arith.constant 0 : index
    %c384_134 = arith.constant 384 : index
    %183 = vector.load %arg3[%c0_133, %c384_134] : memref<128x512xbf16, #tpu.memory_space<vmem>>, vector<128x128xbf16>
    %cst_135 = arith.constant dense<0.000000e+00> : vector<8x128xf32>
    %184 = tpu.matmul %169, %183, %cst_135 {dimension_numbers = #tpu.dot_dimension_numbers<[1], [0], [0], [1], [0, 0, 1, 1], [], []>} : vector<8x128xbf16>, vector<128x128xbf16>, vector<8x128xf32> -> vector<8x128xf32>
    %185 = arith.addf %182, %184 : vector<8x128xf32>
    %cst_136 = arith.constant 5.000000e-01 : f32
    %186 = vector.broadcast %cst_136 : f32 to vector<8x128xf32>
    %187 = arith.mulf %186, %173 : vector<8x128xf32>
    %188 = math.tanh %187 : vector<8x128xf32>
    %cst_137 = arith.constant 5.000000e-01 : f32
    %189 = vector.broadcast %cst_137 : f32 to vector<8x128xf32>
    %190 = arith.mulf %189, %188 : vector<8x128xf32>
    %cst_138 = arith.constant 5.000000e-01 : f32
    %191 = vector.broadcast %cst_138 : f32 to vector<8x128xf32>
    %192 = arith.addf %190, %191 : vector<8x128xf32>
    %cst_139 = arith.constant 5.000000e-01 : f32
    %193 = vector.broadcast %cst_139 : f32 to vector<8x128xf32>
    %194 = arith.mulf %193, %177 : vector<8x128xf32>
    %195 = math.tanh %194 : vector<8x128xf32>
    %cst_140 = arith.constant 5.000000e-01 : f32
    %196 = vector.broadcast %cst_140 : f32 to vector<8x128xf32>
    %197 = arith.mulf %196, %195 : vector<8x128xf32>
    %cst_141 = arith.constant 5.000000e-01 : f32
    %198 = vector.broadcast %cst_141 : f32 to vector<8x128xf32>
    %199 = arith.addf %197, %198 : vector<8x128xf32>
    %200 = math.tanh %181 : vector<8x128xf32>
    %cst_142 = arith.constant 5.000000e-01 : f32
    %201 = vector.broadcast %cst_142 : f32 to vector<8x128xf32>
    %202 = arith.mulf %201, %185 : vector<8x128xf32>
    %203 = math.tanh %202 : vector<8x128xf32>
    %cst_143 = arith.constant 5.000000e-01 : f32
    %204 = vector.broadcast %cst_143 : f32 to vector<8x128xf32>
    %205 = arith.mulf %204, %203 : vector<8x128xf32>
    %cst_144 = arith.constant 5.000000e-01 : f32
    %206 = vector.broadcast %cst_144 : f32 to vector<8x128xf32>
    %207 = arith.addf %205, %206 : vector<8x128xf32>
    %208 = arith.mulf %199, %166 : vector<8x128xf32>
    %209 = arith.mulf %192, %200 : vector<8x128xf32>
    %210 = arith.addf %208, %209 : vector<8x128xf32>
    %211 = math.tanh %210 : vector<8x128xf32>
    %212 = arith.mulf %207, %211 : vector<8x128xf32>
    %213 = arith.truncf %212 : vector<8x128xf32> to vector<8x128xbf16>
    %c32 = arith.constant 32 : index
    %c0_145 = arith.constant 0 : index
    %214 = vector.load %arg8[%c32, %c0_145] : memref<64x512xf32, #tpu.memory_space<vmem>>, vector<8x128xf32>
    %c0_146 = arith.constant 0 : index
    %c0_147 = arith.constant 0 : index
    %215 = vector.load %arg3[%c0_146, %c0_147] : memref<128x512xbf16, #tpu.memory_space<vmem>>, vector<128x128xbf16>
    %cst_148 = arith.constant dense<0.000000e+00> : vector<8x128xf32>
    %216 = tpu.matmul %213, %215, %cst_148 {dimension_numbers = #tpu.dot_dimension_numbers<[1], [0], [0], [1], [0, 0, 1, 1], [], []>} : vector<8x128xbf16>, vector<128x128xbf16>, vector<8x128xf32> -> vector<8x128xf32>
    %217 = arith.addf %214, %216 : vector<8x128xf32>
    %c32_149 = arith.constant 32 : index
    %c128_150 = arith.constant 128 : index
    %218 = vector.load %arg8[%c32_149, %c128_150] : memref<64x512xf32, #tpu.memory_space<vmem>>, vector<8x128xf32>
    %c0_151 = arith.constant 0 : index
    %c128_152 = arith.constant 128 : index
    %219 = vector.load %arg3[%c0_151, %c128_152] : memref<128x512xbf16, #tpu.memory_space<vmem>>, vector<128x128xbf16>
    %cst_153 = arith.constant dense<0.000000e+00> : vector<8x128xf32>
    %220 = tpu.matmul %213, %219, %cst_153 {dimension_numbers = #tpu.dot_dimension_numbers<[1], [0], [0], [1], [0, 0, 1, 1], [], []>} : vector<8x128xbf16>, vector<128x128xbf16>, vector<8x128xf32> -> vector<8x128xf32>
    %221 = arith.addf %218, %220 : vector<8x128xf32>
    %c32_154 = arith.constant 32 : index
    %c256_155 = arith.constant 256 : index
    %222 = vector.load %arg8[%c32_154, %c256_155] : memref<64x512xf32, #tpu.memory_space<vmem>>, vector<8x128xf32>
    %c0_156 = arith.constant 0 : index
    %c256_157 = arith.constant 256 : index
    %223 = vector.load %arg3[%c0_156, %c256_157] : memref<128x512xbf16, #tpu.memory_space<vmem>>, vector<128x128xbf16>
    %cst_158 = arith.constant dense<0.000000e+00> : vector<8x128xf32>
    %224 = tpu.matmul %213, %223, %cst_158 {dimension_numbers = #tpu.dot_dimension_numbers<[1], [0], [0], [1], [0, 0, 1, 1], [], []>} : vector<8x128xbf16>, vector<128x128xbf16>, vector<8x128xf32> -> vector<8x128xf32>
    %225 = arith.addf %222, %224 : vector<8x128xf32>
    %c32_159 = arith.constant 32 : index
    %c384_160 = arith.constant 384 : index
    %226 = vector.load %arg8[%c32_159, %c384_160] : memref<64x512xf32, #tpu.memory_space<vmem>>, vector<8x128xf32>
    %c0_161 = arith.constant 0 : index
    %c384_162 = arith.constant 384 : index
    %227 = vector.load %arg3[%c0_161, %c384_162] : memref<128x512xbf16, #tpu.memory_space<vmem>>, vector<128x128xbf16>
    %cst_163 = arith.constant dense<0.000000e+00> : vector<8x128xf32>
    %228 = tpu.matmul %213, %227, %cst_163 {dimension_numbers = #tpu.dot_dimension_numbers<[1], [0], [0], [1], [0, 0, 1, 1], [], []>} : vector<8x128xbf16>, vector<128x128xbf16>, vector<8x128xf32> -> vector<8x128xf32>
    %229 = arith.addf %226, %228 : vector<8x128xf32>
    %cst_164 = arith.constant 5.000000e-01 : f32
    %230 = vector.broadcast %cst_164 : f32 to vector<8x128xf32>
    %231 = arith.mulf %230, %217 : vector<8x128xf32>
    %232 = math.tanh %231 : vector<8x128xf32>
    %cst_165 = arith.constant 5.000000e-01 : f32
    %233 = vector.broadcast %cst_165 : f32 to vector<8x128xf32>
    %234 = arith.mulf %233, %232 : vector<8x128xf32>
    %cst_166 = arith.constant 5.000000e-01 : f32
    %235 = vector.broadcast %cst_166 : f32 to vector<8x128xf32>
    %236 = arith.addf %234, %235 : vector<8x128xf32>
    %cst_167 = arith.constant 5.000000e-01 : f32
    %237 = vector.broadcast %cst_167 : f32 to vector<8x128xf32>
    %238 = arith.mulf %237, %221 : vector<8x128xf32>
    %239 = math.tanh %238 : vector<8x128xf32>
    %cst_168 = arith.constant 5.000000e-01 : f32
    %240 = vector.broadcast %cst_168 : f32 to vector<8x128xf32>
    %241 = arith.mulf %240, %239 : vector<8x128xf32>
    %cst_169 = arith.constant 5.000000e-01 : f32
    %242 = vector.broadcast %cst_169 : f32 to vector<8x128xf32>
    %243 = arith.addf %241, %242 : vector<8x128xf32>
    %244 = math.tanh %225 : vector<8x128xf32>
    %cst_170 = arith.constant 5.000000e-01 : f32
    %245 = vector.broadcast %cst_170 : f32 to vector<8x128xf32>
    %246 = arith.mulf %245, %229 : vector<8x128xf32>
    %247 = math.tanh %246 : vector<8x128xf32>
    %cst_171 = arith.constant 5.000000e-01 : f32
    %248 = vector.broadcast %cst_171 : f32 to vector<8x128xf32>
    %249 = arith.mulf %248, %247 : vector<8x128xf32>
    %cst_172 = arith.constant 5.000000e-01 : f32
    %250 = vector.broadcast %cst_172 : f32 to vector<8x128xf32>
    %251 = arith.addf %249, %250 : vector<8x128xf32>
    %252 = arith.mulf %243, %210 : vector<8x128xf32>
    %253 = arith.mulf %236, %244 : vector<8x128xf32>
    %254 = arith.addf %252, %253 : vector<8x128xf32>
    %255 = math.tanh %254 : vector<8x128xf32>
    %256 = arith.mulf %251, %255 : vector<8x128xf32>
    %257 = arith.truncf %256 : vector<8x128xf32> to vector<8x128xbf16>
    %c40 = arith.constant 40 : index
    %c0_173 = arith.constant 0 : index
    %258 = vector.load %arg8[%c40, %c0_173] : memref<64x512xf32, #tpu.memory_space<vmem>>, vector<8x128xf32>
    %c0_174 = arith.constant 0 : index
    %c0_175 = arith.constant 0 : index
    %259 = vector.load %arg3[%c0_174, %c0_175] : memref<128x512xbf16, #tpu.memory_space<vmem>>, vector<128x128xbf16>
    %cst_176 = arith.constant dense<0.000000e+00> : vector<8x128xf32>
    %260 = tpu.matmul %257, %259, %cst_176 {dimension_numbers = #tpu.dot_dimension_numbers<[1], [0], [0], [1], [0, 0, 1, 1], [], []>} : vector<8x128xbf16>, vector<128x128xbf16>, vector<8x128xf32> -> vector<8x128xf32>
    %261 = arith.addf %258, %260 : vector<8x128xf32>
    %c40_177 = arith.constant 40 : index
    %c128_178 = arith.constant 128 : index
    %262 = vector.load %arg8[%c40_177, %c128_178] : memref<64x512xf32, #tpu.memory_space<vmem>>, vector<8x128xf32>
    %c0_179 = arith.constant 0 : index
    %c128_180 = arith.constant 128 : index
    %263 = vector.load %arg3[%c0_179, %c128_180] : memref<128x512xbf16, #tpu.memory_space<vmem>>, vector<128x128xbf16>
    %cst_181 = arith.constant dense<0.000000e+00> : vector<8x128xf32>
    %264 = tpu.matmul %257, %263, %cst_181 {dimension_numbers = #tpu.dot_dimension_numbers<[1], [0], [0], [1], [0, 0, 1, 1], [], []>} : vector<8x128xbf16>, vector<128x128xbf16>, vector<8x128xf32> -> vector<8x128xf32>
    %265 = arith.addf %262, %264 : vector<8x128xf32>
    %c40_182 = arith.constant 40 : index
    %c256_183 = arith.constant 256 : index
    %266 = vector.load %arg8[%c40_182, %c256_183] : memref<64x512xf32, #tpu.memory_space<vmem>>, vector<8x128xf32>
    %c0_184 = arith.constant 0 : index
    %c256_185 = arith.constant 256 : index
    %267 = vector.load %arg3[%c0_184, %c256_185] : memref<128x512xbf16, #tpu.memory_space<vmem>>, vector<128x128xbf16>
    %cst_186 = arith.constant dense<0.000000e+00> : vector<8x128xf32>
    %268 = tpu.matmul %257, %267, %cst_186 {dimension_numbers = #tpu.dot_dimension_numbers<[1], [0], [0], [1], [0, 0, 1, 1], [], []>} : vector<8x128xbf16>, vector<128x128xbf16>, vector<8x128xf32> -> vector<8x128xf32>
    %269 = arith.addf %266, %268 : vector<8x128xf32>
    %c40_187 = arith.constant 40 : index
    %c384_188 = arith.constant 384 : index
    %270 = vector.load %arg8[%c40_187, %c384_188] : memref<64x512xf32, #tpu.memory_space<vmem>>, vector<8x128xf32>
    %c0_189 = arith.constant 0 : index
    %c384_190 = arith.constant 384 : index
    %271 = vector.load %arg3[%c0_189, %c384_190] : memref<128x512xbf16, #tpu.memory_space<vmem>>, vector<128x128xbf16>
    %cst_191 = arith.constant dense<0.000000e+00> : vector<8x128xf32>
    %272 = tpu.matmul %257, %271, %cst_191 {dimension_numbers = #tpu.dot_dimension_numbers<[1], [0], [0], [1], [0, 0, 1, 1], [], []>} : vector<8x128xbf16>, vector<128x128xbf16>, vector<8x128xf32> -> vector<8x128xf32>
    %273 = arith.addf %270, %272 : vector<8x128xf32>
    %cst_192 = arith.constant 5.000000e-01 : f32
    %274 = vector.broadcast %cst_192 : f32 to vector<8x128xf32>
    %275 = arith.mulf %274, %261 : vector<8x128xf32>
    %276 = math.tanh %275 : vector<8x128xf32>
    %cst_193 = arith.constant 5.000000e-01 : f32
    %277 = vector.broadcast %cst_193 : f32 to vector<8x128xf32>
    %278 = arith.mulf %277, %276 : vector<8x128xf32>
    %cst_194 = arith.constant 5.000000e-01 : f32
    %279 = vector.broadcast %cst_194 : f32 to vector<8x128xf32>
    %280 = arith.addf %278, %279 : vector<8x128xf32>
    %cst_195 = arith.constant 5.000000e-01 : f32
    %281 = vector.broadcast %cst_195 : f32 to vector<8x128xf32>
    %282 = arith.mulf %281, %265 : vector<8x128xf32>
    %283 = math.tanh %282 : vector<8x128xf32>
    %cst_196 = arith.constant 5.000000e-01 : f32
    %284 = vector.broadcast %cst_196 : f32 to vector<8x128xf32>
    %285 = arith.mulf %284, %283 : vector<8x128xf32>
    %cst_197 = arith.constant 5.000000e-01 : f32
    %286 = vector.broadcast %cst_197 : f32 to vector<8x128xf32>
    %287 = arith.addf %285, %286 : vector<8x128xf32>
    %288 = math.tanh %269 : vector<8x128xf32>
    %cst_198 = arith.constant 5.000000e-01 : f32
    %289 = vector.broadcast %cst_198 : f32 to vector<8x128xf32>
    %290 = arith.mulf %289, %273 : vector<8x128xf32>
    %291 = math.tanh %290 : vector<8x128xf32>
    %cst_199 = arith.constant 5.000000e-01 : f32
    %292 = vector.broadcast %cst_199 : f32 to vector<8x128xf32>
    %293 = arith.mulf %292, %291 : vector<8x128xf32>
    %cst_200 = arith.constant 5.000000e-01 : f32
    %294 = vector.broadcast %cst_200 : f32 to vector<8x128xf32>
    %295 = arith.addf %293, %294 : vector<8x128xf32>
    %296 = arith.mulf %287, %254 : vector<8x128xf32>
    %297 = arith.mulf %280, %288 : vector<8x128xf32>
    %298 = arith.addf %296, %297 : vector<8x128xf32>
    %299 = math.tanh %298 : vector<8x128xf32>
    %300 = arith.mulf %295, %299 : vector<8x128xf32>
    %301 = arith.truncf %300 : vector<8x128xf32> to vector<8x128xbf16>
    %c48 = arith.constant 48 : index
    %c0_201 = arith.constant 0 : index
    %302 = vector.load %arg8[%c48, %c0_201] : memref<64x512xf32, #tpu.memory_space<vmem>>, vector<8x128xf32>
    %c0_202 = arith.constant 0 : index
    %c0_203 = arith.constant 0 : index
    %303 = vector.load %arg3[%c0_202, %c0_203] : memref<128x512xbf16, #tpu.memory_space<vmem>>, vector<128x128xbf16>
    %cst_204 = arith.constant dense<0.000000e+00> : vector<8x128xf32>
    %304 = tpu.matmul %301, %303, %cst_204 {dimension_numbers = #tpu.dot_dimension_numbers<[1], [0], [0], [1], [0, 0, 1, 1], [], []>} : vector<8x128xbf16>, vector<128x128xbf16>, vector<8x128xf32> -> vector<8x128xf32>
    %305 = arith.addf %302, %304 : vector<8x128xf32>
    %c48_205 = arith.constant 48 : index
    %c128_206 = arith.constant 128 : index
    %306 = vector.load %arg8[%c48_205, %c128_206] : memref<64x512xf32, #tpu.memory_space<vmem>>, vector<8x128xf32>
    %c0_207 = arith.constant 0 : index
    %c128_208 = arith.constant 128 : index
    %307 = vector.load %arg3[%c0_207, %c128_208] : memref<128x512xbf16, #tpu.memory_space<vmem>>, vector<128x128xbf16>
    %cst_209 = arith.constant dense<0.000000e+00> : vector<8x128xf32>
    %308 = tpu.matmul %301, %307, %cst_209 {dimension_numbers = #tpu.dot_dimension_numbers<[1], [0], [0], [1], [0, 0, 1, 1], [], []>} : vector<8x128xbf16>, vector<128x128xbf16>, vector<8x128xf32> -> vector<8x128xf32>
    %309 = arith.addf %306, %308 : vector<8x128xf32>
    %c48_210 = arith.constant 48 : index
    %c256_211 = arith.constant 256 : index
    %310 = vector.load %arg8[%c48_210, %c256_211] : memref<64x512xf32, #tpu.memory_space<vmem>>, vector<8x128xf32>
    %c0_212 = arith.constant 0 : index
    %c256_213 = arith.constant 256 : index
    %311 = vector.load %arg3[%c0_212, %c256_213] : memref<128x512xbf16, #tpu.memory_space<vmem>>, vector<128x128xbf16>
    %cst_214 = arith.constant dense<0.000000e+00> : vector<8x128xf32>
    %312 = tpu.matmul %301, %311, %cst_214 {dimension_numbers = #tpu.dot_dimension_numbers<[1], [0], [0], [1], [0, 0, 1, 1], [], []>} : vector<8x128xbf16>, vector<128x128xbf16>, vector<8x128xf32> -> vector<8x128xf32>
    %313 = arith.addf %310, %312 : vector<8x128xf32>
    %c48_215 = arith.constant 48 : index
    %c384_216 = arith.constant 384 : index
    %314 = vector.load %arg8[%c48_215, %c384_216] : memref<64x512xf32, #tpu.memory_space<vmem>>, vector<8x128xf32>
    %c0_217 = arith.constant 0 : index
    %c384_218 = arith.constant 384 : index
    %315 = vector.load %arg3[%c0_217, %c384_218] : memref<128x512xbf16, #tpu.memory_space<vmem>>, vector<128x128xbf16>
    %cst_219 = arith.constant dense<0.000000e+00> : vector<8x128xf32>
    %316 = tpu.matmul %301, %315, %cst_219 {dimension_numbers = #tpu.dot_dimension_numbers<[1], [0], [0], [1], [0, 0, 1, 1], [], []>} : vector<8x128xbf16>, vector<128x128xbf16>, vector<8x128xf32> -> vector<8x128xf32>
    %317 = arith.addf %314, %316 : vector<8x128xf32>
    %cst_220 = arith.constant 5.000000e-01 : f32
    %318 = vector.broadcast %cst_220 : f32 to vector<8x128xf32>
    %319 = arith.mulf %318, %305 : vector<8x128xf32>
    %320 = math.tanh %319 : vector<8x128xf32>
    %cst_221 = arith.constant 5.000000e-01 : f32
    %321 = vector.broadcast %cst_221 : f32 to vector<8x128xf32>
    %322 = arith.mulf %321, %320 : vector<8x128xf32>
    %cst_222 = arith.constant 5.000000e-01 : f32
    %323 = vector.broadcast %cst_222 : f32 to vector<8x128xf32>
    %324 = arith.addf %322, %323 : vector<8x128xf32>
    %cst_223 = arith.constant 5.000000e-01 : f32
    %325 = vector.broadcast %cst_223 : f32 to vector<8x128xf32>
    %326 = arith.mulf %325, %309 : vector<8x128xf32>
    %327 = math.tanh %326 : vector<8x128xf32>
    %cst_224 = arith.constant 5.000000e-01 : f32
    %328 = vector.broadcast %cst_224 : f32 to vector<8x128xf32>
    %329 = arith.mulf %328, %327 : vector<8x128xf32>
    %cst_225 = arith.constant 5.000000e-01 : f32
    %330 = vector.broadcast %cst_225 : f32 to vector<8x128xf32>
    %331 = arith.addf %329, %330 : vector<8x128xf32>
    %332 = math.tanh %313 : vector<8x128xf32>
    %cst_226 = arith.constant 5.000000e-01 : f32
    %333 = vector.broadcast %cst_226 : f32 to vector<8x128xf32>
    %334 = arith.mulf %333, %317 : vector<8x128xf32>
    %335 = math.tanh %334 : vector<8x128xf32>
    %cst_227 = arith.constant 5.000000e-01 : f32
    %336 = vector.broadcast %cst_227 : f32 to vector<8x128xf32>
    %337 = arith.mulf %336, %335 : vector<8x128xf32>
    %cst_228 = arith.constant 5.000000e-01 : f32
    %338 = vector.broadcast %cst_228 : f32 to vector<8x128xf32>
    %339 = arith.addf %337, %338 : vector<8x128xf32>
    %340 = arith.mulf %331, %298 : vector<8x128xf32>
    %341 = arith.mulf %324, %332 : vector<8x128xf32>
    %342 = arith.addf %340, %341 : vector<8x128xf32>
    %343 = math.tanh %342 : vector<8x128xf32>
    %344 = arith.mulf %339, %343 : vector<8x128xf32>
    %345 = arith.truncf %344 : vector<8x128xf32> to vector<8x128xbf16>
    %c56 = arith.constant 56 : index
    %c0_229 = arith.constant 0 : index
    %346 = vector.load %arg8[%c56, %c0_229] : memref<64x512xf32, #tpu.memory_space<vmem>>, vector<8x128xf32>
    %c0_230 = arith.constant 0 : index
    %c0_231 = arith.constant 0 : index
    %347 = vector.load %arg3[%c0_230, %c0_231] : memref<128x512xbf16, #tpu.memory_space<vmem>>, vector<128x128xbf16>
    %cst_232 = arith.constant dense<0.000000e+00> : vector<8x128xf32>
    %348 = tpu.matmul %345, %347, %cst_232 {dimension_numbers = #tpu.dot_dimension_numbers<[1], [0], [0], [1], [0, 0, 1, 1], [], []>} : vector<8x128xbf16>, vector<128x128xbf16>, vector<8x128xf32> -> vector<8x128xf32>
    %349 = arith.addf %346, %348 : vector<8x128xf32>
    %c56_233 = arith.constant 56 : index
    %c128_234 = arith.constant 128 : index
    %350 = vector.load %arg8[%c56_233, %c128_234] : memref<64x512xf32, #tpu.memory_space<vmem>>, vector<8x128xf32>
    %c0_235 = arith.constant 0 : index
    %c128_236 = arith.constant 128 : index
    %351 = vector.load %arg3[%c0_235, %c128_236] : memref<128x512xbf16, #tpu.memory_space<vmem>>, vector<128x128xbf16>
    %cst_237 = arith.constant dense<0.000000e+00> : vector<8x128xf32>
    %352 = tpu.matmul %345, %351, %cst_237 {dimension_numbers = #tpu.dot_dimension_numbers<[1], [0], [0], [1], [0, 0, 1, 1], [], []>} : vector<8x128xbf16>, vector<128x128xbf16>, vector<8x128xf32> -> vector<8x128xf32>
    %353 = arith.addf %350, %352 : vector<8x128xf32>
    %c56_238 = arith.constant 56 : index
    %c256_239 = arith.constant 256 : index
    %354 = vector.load %arg8[%c56_238, %c256_239] : memref<64x512xf32, #tpu.memory_space<vmem>>, vector<8x128xf32>
    %c0_240 = arith.constant 0 : index
    %c256_241 = arith.constant 256 : index
    %355 = vector.load %arg3[%c0_240, %c256_241] : memref<128x512xbf16, #tpu.memory_space<vmem>>, vector<128x128xbf16>
    %cst_242 = arith.constant dense<0.000000e+00> : vector<8x128xf32>
    %356 = tpu.matmul %345, %355, %cst_242 {dimension_numbers = #tpu.dot_dimension_numbers<[1], [0], [0], [1], [0, 0, 1, 1], [], []>} : vector<8x128xbf16>, vector<128x128xbf16>, vector<8x128xf32> -> vector<8x128xf32>
    %357 = arith.addf %354, %356 : vector<8x128xf32>
    %c56_243 = arith.constant 56 : index
    %c384_244 = arith.constant 384 : index
    %358 = vector.load %arg8[%c56_243, %c384_244] : memref<64x512xf32, #tpu.memory_space<vmem>>, vector<8x128xf32>
    %c0_245 = arith.constant 0 : index
    %c384_246 = arith.constant 384 : index
    %359 = vector.load %arg3[%c0_245, %c384_246] : memref<128x512xbf16, #tpu.memory_space<vmem>>, vector<128x128xbf16>
    %cst_247 = arith.constant dense<0.000000e+00> : vector<8x128xf32>
    %360 = tpu.matmul %345, %359, %cst_247 {dimension_numbers = #tpu.dot_dimension_numbers<[1], [0], [0], [1], [0, 0, 1, 1], [], []>} : vector<8x128xbf16>, vector<128x128xbf16>, vector<8x128xf32> -> vector<8x128xf32>
    %361 = arith.addf %358, %360 : vector<8x128xf32>
    %cst_248 = arith.constant 5.000000e-01 : f32
    %362 = vector.broadcast %cst_248 : f32 to vector<8x128xf32>
    %363 = arith.mulf %362, %349 : vector<8x128xf32>
    %364 = math.tanh %363 : vector<8x128xf32>
    %cst_249 = arith.constant 5.000000e-01 : f32
    %365 = vector.broadcast %cst_249 : f32 to vector<8x128xf32>
    %366 = arith.mulf %365, %364 : vector<8x128xf32>
    %cst_250 = arith.constant 5.000000e-01 : f32
    %367 = vector.broadcast %cst_250 : f32 to vector<8x128xf32>
    %368 = arith.addf %366, %367 : vector<8x128xf32>
    %cst_251 = arith.constant 5.000000e-01 : f32
    %369 = vector.broadcast %cst_251 : f32 to vector<8x128xf32>
    %370 = arith.mulf %369, %353 : vector<8x128xf32>
    %371 = math.tanh %370 : vector<8x128xf32>
    %cst_252 = arith.constant 5.000000e-01 : f32
    %372 = vector.broadcast %cst_252 : f32 to vector<8x128xf32>
    %373 = arith.mulf %372, %371 : vector<8x128xf32>
    %cst_253 = arith.constant 5.000000e-01 : f32
    %374 = vector.broadcast %cst_253 : f32 to vector<8x128xf32>
    %375 = arith.addf %373, %374 : vector<8x128xf32>
    %376 = math.tanh %357 : vector<8x128xf32>
    %cst_254 = arith.constant 5.000000e-01 : f32
    %377 = vector.broadcast %cst_254 : f32 to vector<8x128xf32>
    %378 = arith.mulf %377, %361 : vector<8x128xf32>
    %379 = math.tanh %378 : vector<8x128xf32>
    %cst_255 = arith.constant 5.000000e-01 : f32
    %380 = vector.broadcast %cst_255 : f32 to vector<8x128xf32>
    %381 = arith.mulf %380, %379 : vector<8x128xf32>
    %cst_256 = arith.constant 5.000000e-01 : f32
    %382 = vector.broadcast %cst_256 : f32 to vector<8x128xf32>
    %383 = arith.addf %381, %382 : vector<8x128xf32>
    %384 = arith.mulf %375, %342 : vector<8x128xf32>
    %385 = arith.mulf %368, %376 : vector<8x128xf32>
    %386 = arith.addf %384, %385 : vector<8x128xf32>
    %387 = math.tanh %386 : vector<8x128xf32>
    %388 = arith.mulf %383, %387 : vector<8x128xf32>
    %389 = arith.truncf %388 : vector<8x128xf32> to vector<8x128xbf16>
    %c0_257 = arith.constant 0 : index
    %c0_258 = arith.constant 0 : index
    %390 = vector.load %arg5[%c0_257, %c0_258] : memref<128x128xbf16, #tpu.memory_space<vmem>>, vector<128x128xbf16>
    %cst_259 = arith.constant dense<0.000000e+00> : vector<8x128xf32>
    %391 = tpu.matmul %389, %390, %cst_259 {dimension_numbers = #tpu.dot_dimension_numbers<[1], [0], [0], [1], [0, 0, 1, 1], [], []>} : vector<8x128xbf16>, vector<128x128xbf16>, vector<8x128xf32> -> vector<8x128xf32>
    %c0_260 = arith.constant 0 : index
    %c0_261 = arith.constant 0 : index
    %392 = vector.load %arg6[%c0_260, %c0_261] : memref<1x128xf32, #tpu.memory_space<vmem>>, vector<1x128xf32>
    %393 = vector.broadcast %392 : vector<1x128xf32> to vector<8x128xf32>
    %394 = arith.addf %391, %393 : vector<8x128xf32>
    %c0_262 = arith.constant 0 : index
    %c0_263 = arith.constant 0 : index
    %395 = vector.load %arg7[%c0_262, %c0_263] : memref<8x128xf32, #tpu.memory_space<vmem>>, vector<8x128xf32>
    tpu.vector_store %arg7[%c0_262, %c0_263], %394 {strides = array<i32>} : memref<8x128xf32, #tpu.memory_space<vmem>>, vector<8x128xf32>,
    return
  }
}

</mosaic_0001>

<bundles_post_ra>
// kernel: tpu_custom_call.1
= control target key start
LH: loop header
LB: loop body
LE: loop exit
PB: predicated region body
PF: predicated region fallthrough
CT: control target
= control target key end

     0   :  { %12 = vsyncpa [#allocation4], 0  ;;  %s5225_s0 = inlined_call_operand.vmem [shape: s32[64,1], index: 0, kind: input, shape index: {}]   ;;  %s5226_s1 = inlined_call_operand.vmem [shape: bf16[128,128], index: 1, kind: input, shape index: {}]   ;;  %s5227_s2 = inlined_call_operand.hbm [shape: bf16[128,512], index: 2, kind: input, shape index: {}]   ;;  %s5228_s3 = inlined_call_operand.hbm [shape: bf16[128,512], index: 3, kind: input, shape index: {}]   ;;  %s5229_s4 = inlined_call_operand.vmem [shape: f32[1,512], index: 4, kind: input, shape index: {}]   ;;  %s5230_s5 = inlined_call_operand.hbm [shape: bf16[128,128], index: 5, kind: input, shape index: {}]   ;;  %s5231_s6 = inlined_call_operand.vmem [shape: f32[1,128], index: 6, kind: input, shape index: {}]   ;;  %s5232_s7 = inlined_call_operand.hbm [shape: f32[8,128], index: 7, kind: output, shape index: {}]  }
   0x1   :  { %13 = vsyncpa [#allocation7], 0 }
   0x2   :  { %14 = vsyncpa [#allocation5], 0  ;;  %s4234_s24 = smov [#allocation6]   ;;  %s4235_s26 = smov [#allocation3]  }
   0x3   :  { %s36_s25 = sshll.u32 %s4234_s24, 4  ;;  %s24_s27 = sshll.u32 %s4235_s26, 4  ;;  %s37_s25 = int_to_ptr.vmem [resolvable:$true] %s36_s25  ;;  %s25_s27 = int_to_ptr.vmem [resolvable:$true] %s24_s27 }
   0x4   :  { %s4156_s28 = scalar_lea.vmem %s37_s25, 4096  ;;  %p4161_p1 = scmp.lt.s32.totalorder %s37_s25, %s37_s25 }
   0x5   :  { %p4157_p0 = scmp.ne.s32.totalorder %s37_s25, %s4156_s28  ;;  %p4162_p2 = scmp.lt.s32.totalorder %s4156_s28, %s4156_s28 }
   0x7   :  { %p4163_p3 = por %p4162_p2, %p4161_p1 }
   0x9   :  { %p4164_p4 = pnand %p4163_p3, %p4157_p0 }
   0xb   :  { %4167 = shalt.err (!%p4164_p4)
}
   0xc   :  { %s4236_s29 = smov 256   ;;  %s4237_s30 = smov 16  }
   0xd   :  { %42 = dma.hbm_to_vmem [thread:$0]  %s5228_s3, 4096, %s37_s25, [#allocation7], %s4236_s29, %s4236_s29, %s4237_s30  }
   0xe   :  { %s4176_s10 = scalar_lea.vmem %s25_s27, 4096  ;;  %p4181_p6 = scmp.lt.s32.totalorder %s25_s27, %s25_s27 }
   0xf   :  { %p4177_p5 = scmp.ne.s32.totalorder %s25_s27, %s4176_s10  ;;  %p4182_p7 = scmp.lt.s32.totalorder %s4176_s10, %s4176_s10 }
  0x11   :  { %p4183_p8 = por %p4182_p7, %p4181_p6 }
  0x13   :  { %p4184_p9 = pnand %p4183_p8, %p4177_p5 }
  0x15   :  { %4187 = shalt.err (!%p4184_p9)
}
  0x16   :  { %30 = dma.hbm_to_vmem [thread:$0]  %s5227_s2, 4096, %s25_s27, [#allocation4], %s4236_s29, %s4236_s29, %s4237_s30  }
  0x17   :  { %s4238_s13 = smov [#allocation8]  }
  0x18   :  { %s50_s14 = sshll.u32 %s4238_s13, 4  ;;  %s51_s14 = int_to_ptr.vmem [resolvable:$true] %s50_s14 }
  0x19   :  { %s4196_s15 = scalar_lea.vmem %s51_s14, 1024  ;;  %p4201_p11 = scmp.lt.s32.totalorder %s51_s14, %s51_s14 }
  0x1a   :  { %p4197_p10 = scmp.ne.s32.totalorder %s51_s14, %s4196_s15  ;;  %p4202_p12 = scmp.lt.s32.totalorder %s4196_s15, %s4196_s15 }
  0x1c   :  { %p4203_p13 = por %p4202_p12, %p4201_p11 }
  0x1e   :  { %p4204_p0 = pnand %p4203_p13, %p4197_p10 }
  0x20   :  { %4207 = shalt.err (!%p4204_p0)
}
  0x21   :  { %s4239_s3 = smov 64   ;;  %s4240_s16 = smov 4  }
  0x22   :  { %56 = dma.hbm_to_vmem [thread:$0]  %s5230_s5, 1024, %s51_s14, [#allocation7], %s4239_s3, %s4239_s3, %s4240_s16  }
  0x23   :  { %4228 = dma.done.wait [#allocation4], 4096  }
  0x24   :  { %4229 = vsyncadd [#allocation4], 4294963200 }
  0x25   :  { %4230 = dma.done.wait [#allocation7], 5120  }
  0x26   :  { %4231 = vsyncadd [#allocation7], 4294962176  ;;  %v4241_v0 = vmov 0   ;;  %v73_v1 = vld [vmem:[%s5225_s0 + $0x10] sm:$0xff]  ;;  %v71_v2 = vld [vmem:[%s5225_s0] sm:$0xff]  ;;  %v69_v24 = vlaneseq  ;;  %vm4244_vm12 = vmmov 0  }
  0x27   :  { %3955 = vset.pattern.permute.xlu1 %v4241_v0  ;;  %3954 = vset.pattern.permute.xlu0 %v4241_v0  ;;  %v74_v3 = vld [vmem:[%s5225_s0 + $0x18] sm:$0xff]  ;;  %v72_v4 = vld [vmem:[%s5225_s0 + $0x8] sm:$0xff]  ;;  %v3957_v6 = vld [vmem:[%s5226_s1 + $0x30] sm:$0xff]   ;;  %v4242_v31 = vmov 1.0|1.0   ;;  %s4245_s30 = smov [#allocation9]  }
  0x28   :  { %86 = vperm.xlu1 %3955, %v73_v1   ;;  %80 = vperm.xlu0 %3954, %v71_v2   ;;  %v3956_v5 = vld [vmem:[%s5226_s1 + $0x38] sm:$0xff]   ;;  %v76_v7 = vld [vmem:[%s5225_s0 + $0x28] sm:$0xff]  ;;  %v75_v8 = vld [vmem:[%s5225_s0 + $0x20] sm:$0xff]  ;;  %v70_v27 = vand.u32 127, %v69_v24  ;;  %s2702_s8 = sshll.u32 %s4245_s30, 4  ;;  %s2703_s8 = int_to_ptr.vmem [resolvable:$true] %s2702_s8 }
  0x29   :  { %3162 = vmatprep.subr.bf16.mxu0 %v3956_v5  ;;  %v3958_v9 = vld [vmem:[%s5226_s1 + $0x28] sm:$0xff]   ;;  %v78_v10 = vld [vmem:[%s5225_s0 + $0x38] sm:$0xff]  ;;  %v77_v11 = vld [vmem:[%s5225_s0 + $0x30] sm:$0xff]  ;;  %s4208_s9 = scalar_lea.vmem %s2703_s8, 128  ;;  %p4213_p2 = scmp.lt.s32.totalorder %s2703_s8, %s2703_s8 }
  0x2a   :  { %3163 = vmatpush3.bf16.msra.mxu0 %v3956_v5  ;;  %v3959_v12 = vld [vmem:[%s5226_s1 + $0x20] sm:$0xff]   ;;  %v3960_v15 = vld [vmem:[%s5226_s1 + $0x18] sm:$0xff]   ;;  %v3961_v17 = vld [vmem:[%s5226_s1 + $0x10] sm:$0xff]   ;;  %p4209_p1 = scmp.ne.s32.totalorder %s2703_s8, %s4208_s9  ;;  %p4214_p3 = scmp.lt.s32.totalorder %s4208_s9, %s4208_s9 }
  0x2b   :  { %3164 = vmatprep.subr.bf16.mxu0 %v3957_v6  ;;  %v3964_v13 = vld [vmem:[#allocation3 + $0xe0] ss:$16 sps:$4 sm:$0xff]   ;;  %v3962_v19 = vld [vmem:[%s5226_s1 + $0x8] sm:$0xff]   ;;  %v3965_v23 = vld [vmem:[#allocation3 + $0xe4] ss:$16 sps:$4 sm:$0xff]  }
  0x2c   :  { %89 = vperm.xlu1 %3955, %v74_v3   ;;  %83 = vperm.xlu0 %3954, %v72_v4   ;;  %v3966_v14 = vld [vmem:[#allocation3 + $0xc0] ss:$16 sps:$4 sm:$0xff]   ;;  %v3967_v30 = vld [vmem:[#allocation3 + $0xc4] ss:$16 sps:$4 sm:$0xff]   ;;  %v3980_v44 = vld [vmem:[#allocation3 + $0xe8] ss:$16 sps:$4 sm:$0xff]   ;;  %p4215_p4 = por %p4214_p3, %p4213_p2 }
  0x2d   :  { %3186 = vmatprep.subr.bf16.mxu1 %v3964_v13  ;;  %v3968_v16 = vld [vmem:[#allocation3 + $0xa0] ss:$16 sps:$4 sm:$0xff]   ;;  %v3969_v34 = vld [vmem:[#allocation3 + $0xa4] ss:$16 sps:$4 sm:$0xff]   ;;  %v3981_v45 = vld [vmem:[#allocation3 + $0xec] ss:$16 sps:$4 sm:$0xff]  }
  0x2e   :  { %3165 = vmatpush3.bf16.msra.mxu0 %v3957_v6  ;;  %3187 = vmatpush3.bf16.msra.mxu1 %v3964_v13  ;;  %v3970_v18 = vld [vmem:[#allocation3 + $0x80] ss:$16 sps:$4 sm:$0xff]   ;;  %v3971_v37 = vld [vmem:[#allocation3 + $0x84] ss:$16 sps:$4 sm:$0xff]   ;;  %v3982_v53 = vld [vmem:[#allocation3 + $0xc8] ss:$16 sps:$4 sm:$0xff]   ;;  %p4216_p5 = pnand %p4215_p4, %p4209_p1 }
  0x2f   :  { %3166 = vmatprep.subr.bf16.mxu0 %v3958_v9  ;;  %3188 = vmatprep.subr.bf16.mxu1 %v3966_v14  ;;  %v3972_v20 = vld [vmem:[#allocation3 + $0x60] ss:$16 sps:$4 sm:$0xff]   ;;  %v3973_v38 = vld [vmem:[#allocation3 + $0x64] ss:$16 sps:$4 sm:$0xff]   ;;  %v3983_v54 = vld [vmem:[#allocation3 + $0xcc] ss:$16 sps:$4 sm:$0xff]  }
  0x30   :  { %95 = vperm.xlu1 %3955, %v76_v7   ;;  %92 = vperm.xlu0 %3954, %v75_v8   ;;  %v3963_v21 = vld [vmem:[%s5226_s1] sm:$0xff]   ;;  %v3984_v57 = vld [vmem:[#allocation3 + $0xa8] ss:$16 sps:$4 sm:$0xff]   ;;  %v3985_v58 = vld [vmem:[#allocation3 + $0xac] ss:$16 sps:$4 sm:$0xff]  }
  0x31   :  { %v3974_v22 = vld [vmem:[#allocation3 + $0x40] ss:$16 sps:$4 sm:$0xff]   ;;  %v3975_v39 = vld [vmem:[#allocation3 + $0x44] ss:$16 sps:$4 sm:$0xff]   ;;  %v3986_v62 = vld [vmem:[#allocation3 + $0x88] ss:$16 sps:$4 sm:$0xff]  }
  0x32   :  { %3167 = vmatpush3.bf16.msra.mxu0 %v3958_v9  ;;  %3189 = vmatpush3.bf16.msra.mxu1 %v3966_v14  ;;  %v3976_v40 = vld [vmem:[#allocation3 + $0x20] ss:$16 sps:$4 sm:$0xff]   ;;  %v3977_v41 = vld [vmem:[#allocation3 + $0x24] ss:$16 sps:$4 sm:$0xff]   ;;  %v3987_v63 = vld [vmem:[#allocation3 + $0x8c] ss:$16 sps:$4 sm:$0xff]  }
  0x33   :  { %3168 = vmatprep.subr.bf16.mxu0 %v3959_v12  ;;  %3190 = vmatprep.subr.bf16.mxu1 %v3968_v16  ;;  %v3978_v42 = vld [vmem:[#allocation3] ss:$16 sps:$4 sm:$0xff]   ;;  %v3979_v43 = vld [vmem:[#allocation3 + $0x4] ss:$16 sps:$4 sm:$0xff]   ;;  %v3988_v1 = vld [vmem:[#allocation3 + $0x68] ss:$16 sps:$4 sm:$0xff]  }
  0x34   :  { %101 = vperm.xlu1 %3955, %v78_v10   ;;  %98 = vperm.xlu0 %3954, %v77_v11   ;;  %v3989_v2 = vld [vmem:[#allocation3 + $0x6c] ss:$16 sps:$4 sm:$0xff]   ;;  %v3990_v3 = vld [vmem:[#allocation3 + $0x48] ss:$16 sps:$4 sm:$0xff]   ;;  %v5233_v9 = vmov 0.0  }
  0x35   :  { %v3991_v4 = vld [vmem:[#allocation3 + $0x4c] ss:$16 sps:$4 sm:$0xff]   ;;  %v3992_v5 = vld [vmem:[#allocation3 + $0x28] ss:$16 sps:$4 sm:$0xff]   ;;  %v4351_v10 = vld [vmem:[#allocation6 + $0xe0] ss:$16 sps:$4 sm:$0xff]  }
  0x36   :  { %3169 = vmatpush3.bf16.msra.mxu0 %v3959_v12  ;;  %3191 = vmatpush3.bf16.msra.mxu1 %v3968_v16  ;;  %v3993_v6 = vld [vmem:[#allocation3 + $0x2c] ss:$16 sps:$4 sm:$0xff]   ;;  %v3994_v7 = vld [vmem:[#allocation3 + $0x8] ss:$16 sps:$4 sm:$0xff]   ;;  %v4353_v11 = vld [vmem:[#allocation6 + $0xe4] ss:$16 sps:$4 sm:$0xff]  }
  0x37   :  { %3170 = vmatprep.subr.bf16.mxu0 %v3960_v15  ;;  %3192 = vmatprep.subr.bf16.mxu1 %v3970_v18  ;;  %v3995_v8 = vld [vmem:[#allocation3 + $0xc] ss:$16 sps:$4 sm:$0xff]   ;;  %v4359_v12 = vld [vmem:[#allocation6 + $0xc0] ss:$16 sps:$4 sm:$0xff]   ;;  %v4361_v13 = vld [vmem:[#allocation6 + $0xc4] ss:$16 sps:$4 sm:$0xff]  }
  0x38   :  { %v4367_v14 = vld [vmem:[#allocation6 + $0xa0] ss:$16 sps:$4 sm:$0xff]  }
  0x39   :  { %v4379_v16 = vld [vmem:[#allocation6 + $0x80] ss:$16 sps:$4 sm:$0xff]  }
  0x3a   :  { %3171 = vmatpush3.bf16.msra.mxu0 %v3960_v15  ;;  %3193 = vmatpush3.bf16.msra.mxu1 %v3970_v18  ;;  %v4369_v15 = vld [vmem:[#allocation6 + $0xa4] ss:$16 sps:$4 sm:$0xff]   ;;  %v4387_v18 = vld [vmem:[#allocation6 + $0x60] ss:$16 sps:$4 sm:$0xff]  }
  0x3b   :  { %3172 = vmatprep.subr.bf16.mxu0 %v3961_v17  ;;  %3194 = vmatprep.subr.bf16.mxu1 %v3972_v20  ;;  %v4411_v24 = vld [vmem:[#allocation6] ss:$16 sps:$4 sm:$0xff]  }
  0x3e   :  { %3173 = vmatpush3.bf16.msra.mxu0 %v3961_v17  ;;  %3195 = vmatpush3.bf16.msra.mxu1 %v3972_v20  ;;  %v4381_v17 = vld [vmem:[#allocation6 + $0x84] ss:$16 sps:$4 sm:$0xff]   ;;  %v4395_v20 = vld [vmem:[#allocation6 + $0x40] ss:$16 sps:$4 sm:$0xff]  }
  0x3f   :  { %3174 = vmatprep.subr.bf16.mxu0 %v3962_v19  ;;  %3196 = vmatprep.subr.bf16.mxu1 %v3974_v22 }
  0x42   :  { %3175 = vmatpush3.bf16.msra.mxu0 %v3962_v19  ;;  %3197 = vmatpush3.bf16.msra.mxu1 %v3974_v22  ;;  %v4389_v19 = vld [vmem:[#allocation6 + $0x64] ss:$16 sps:$4 sm:$0xff]   ;;  %v4403_v22 = vld [vmem:[#allocation6 + $0x20] ss:$16 sps:$4 sm:$0xff]  }
  0x43   :  { %3176 = vmatprep.subr.bf16.mxu0 %v3963_v21  ;;  %3198 = vmatprep.subr.bf16.mxu1 %v3976_v40 }
  0x46   :  { %3177 = vmatpush3.bf16.msra.mxu0 %v3963_v21  ;;  %3199 = vmatpush3.bf16.msra.mxu1 %v3976_v40  ;;  %v4397_v21 = vld [vmem:[#allocation6 + $0x44] ss:$16 sps:$4 sm:$0xff]   ;;  %v4481_v40 = vld [vmem:[#allocation6 + $0x8] ss:$16 sps:$4 sm:$0xff]  }
  0x47   :  { %3210 = vmatprep.subr.bf16.mxu0 %v3965_v23  ;;  %3200 = vmatprep.subr.bf16.mxu1 %v3978_v42 }
  0x4a   :  { %3201 = vmatpush3.bf16.msra.mxu1 %v3978_v42  ;;  %v4537_v42 = vld [vmem:[%s5229_s4 + $0x1] ss:$0 sm:$0xff] }
  0x4b   :  { %3234 = vmatprep.subr.bf16.mxu1 %v3980_v44 }
  0xa3   :  { %v87_v25 = vpop.permute.xlu1 %86  ;;  %v81_v26 = vpop.permute.xlu0 %80 }
  0xa4   :  { %vm105_vm0 = vcmp.eq.s32.totalorder %v87_v25, %v70_v27  ;;  %vm103_vm3 = vcmp.eq.s32.totalorder %v81_v26, %v70_v27  ;;  %v4413_v25 = vld [vmem:[#allocation6 + $0x4] ss:$16 sps:$4 sm:$0xff]   ;;  %v4419_v26 = vld [vmem:[#allocation6 + $0xe8] ss:$16 sps:$4 sm:$0xff]  }
  0xa7   :  { %v90_v28 = vpop.permute.xlu1 %89  ;;  %v84_v29 = vpop.permute.xlu0 %83 }
  0xa8   :  { %vm106_vm1 = vcmp.eq.s32.totalorder %v90_v28, %v70_v27  ;;  %vm104_vm2 = vcmp.eq.s32.totalorder %v84_v29, %v70_v27  ;;  %v4429_v28 = vld [vmem:[#allocation6 + $0xc8] ss:$16 sps:$4 sm:$0xff]   ;;  %v4431_v29 = vld [vmem:[#allocation6 + $0xcc] ss:$16 sps:$4 sm:$0xff]  }
  0xa9   :  { %vm2722_vm4 = vmpackc.low %vm106_vm1, %vm105_vm0 }
  0xaa   :  { %vm2720_vm5 = vmpackc.low %vm104_vm2, %vm103_vm3 }
  0xab   :  { %3178 = vmatprep.mubr.msk.bf16.mxu0 %vm2720_vm5, %v4242_v31  ;;  %v96_v32 = vpop.permute.xlu1 %95  ;;  %v93_v33 = vpop.permute.xlu0 %92 }
  0xac   :  { %vm108_vm6 = vcmp.eq.s32.totalorder %v96_v32, %v70_v27  ;;  %3179 = vmatmul.mubr.msk.bf16.vlgmr.msra.gmra.mxu0 %vm2722_vm4, %v4242_v31  ;;  %vm107_vm7 = vcmp.eq.s32.totalorder %v93_v33, %v70_v27  ;;  %v4449_v32 = vld [vmem:[#allocation6 + $0x88] ss:$16 sps:$4 sm:$0xff]   ;;  %v4451_v33 = vld [vmem:[#allocation6 + $0x8c] ss:$16 sps:$4 sm:$0xff]  }
  0xad   :  { %vm2724_vm8 = vmpackc.low %vm108_vm6, %vm107_vm7  ;;  %3211 = vmatpush3.bf16.msra.mxu0 %v3965_v23  ;;  %v4405_v23 = vld [vmem:[#allocation6 + $0x24] ss:$16 sps:$4 sm:$0xff]  }
  0xae   :  { %3182 = vmatprep.mubr.msk.bf16.mxu0 %vm2724_vm8, %v4242_v31  ;;  %3212 = vmatprep.subr.bf16.mxu0 %v3967_v30 }
  0xaf   :  { %v102_v35 = vpop.permute.xlu1 %101  ;;  %v99_v36 = vpop.permute.xlu0 %98 }
  0xb0   :  { %vm110_vm9 = vcmp.eq.s32.totalorder %v102_v35, %v70_v27  ;;  %vm109_vm10 = vcmp.eq.s32.totalorder %v99_v36, %v70_v27  ;;  %v4421_v27 = vld [vmem:[#allocation6 + $0xec] ss:$16 sps:$4 sm:$0xff]   ;;  %v4465_v36 = vld [vmem:[#allocation6 + $0x48] ss:$16 sps:$4 sm:$0xff]  }
  0xb1   :  { %vm2726_vm11 = vmpackc.low %vm110_vm9, %vm109_vm10  ;;  %3213 = vmatpush3.bf16.msra.mxu0 %v3967_v30  ;;  %v4441_v30 = vld [vmem:[#allocation6 + $0xa8] ss:$16 sps:$4 sm:$0xff]   ;;  %v4459_v35 = vld [vmem:[#allocation6 + $0x6c] ss:$16 sps:$4 sm:$0xff]  }
  0xb2   :  { %3214 = vmatprep.subr.bf16.mxu0 %v3969_v34 }
  0xb4   :  { %3183 = vmatmul.mubr.msk.bf16.gmra.mxu0 %vm2726_vm11, %v4242_v31  ;;  %v4443_v31 = vld [vmem:[#allocation6 + $0xac] ss:$16 sps:$4 sm:$0xff]  }
  0xb5   :  { %3215 = vmatpush3.bf16.msra.mxu0 %v3969_v34  ;;  %v4457_v34 = vld [vmem:[#allocation6 + $0x68] ss:$16 sps:$4 sm:$0xff]  }
  0xb6   :  { %3216 = vmatprep.subr.bf16.mxu0 %v3971_v37 }
  0xb9   :  { %3217 = vmatpush3.bf16.msra.mxu0 %v3971_v37  ;;  %v4467_v37 = vld [vmem:[#allocation6 + $0x4c] ss:$16 sps:$4 sm:$0xff]  }
  0xba   :  { %3218 = vmatprep.subr.bf16.mxu0 %v3973_v38 }
  0xbd   :  { %3219 = vmatpush3.bf16.msra.mxu0 %v3973_v38  ;;  %v4473_v38 = vld [vmem:[#allocation6 + $0x28] ss:$16 sps:$4 sm:$0xff]  }
  0xbe   :  { %3220 = vmatprep.subr.bf16.mxu0 %v3975_v39 }
  0xc1   :  { %3221 = vmatpush3.bf16.msra.mxu0 %v3975_v39  ;;  %v4475_v39 = vld [vmem:[#allocation6 + $0x2c] ss:$16 sps:$4 sm:$0xff]  }
  0xc2   :  { %3222 = vmatprep.subr.bf16.mxu0 %v3977_v41 }
  0xc5   :  { %3223 = vmatpush3.bf16.msra.mxu0 %v3977_v41  ;;  %v4483_v41 = vld [vmem:[#allocation6 + $0xc] ss:$16 sps:$4 sm:$0xff]  }
  0xc6   :  { %3224 = vmatprep.subr.bf16.mxu0 %v3979_v43 }
  0xc9   :  { %3225 = vmatpush3.bf16.msra.mxu0 %v3979_v43 }
  0xca   :  { %3258 = vmatprep.subr.bf16.mxu0 %v3981_v45 }
 0x16c   :  { %v3180_v46 = vpop.f32.mrf.mxu0 }
 0x16e   :  { %v221_v47 = vpop.f32.mrf.mxu0 }
 0x170   :  { %v3181_v48 = vpop.f32.mrf.mxu0 }
 0x171   :  { %v4345_v51 = vpack.c.bf16 %v3181_v48, %v3180_v46 }
 0x172   :  { %v224_v49 = vpop.f32.mrf.mxu0 }
 0x173   :  { %v252_v50 = vpack.c.bf16 %v224_v49, %v221_v47 }
 0x174   :  { %v3184_v52 = vpop.f32.mrf.mxu0 }
 0x175   :  { %3202 = vmatprep.mubr.bf16.mxu1 %v252_v50  ;;  %3226 = vmatprep.mubr.bf16.mxu0 %v252_v50 }
 0x176   :  { %v237_v55 = vpop.f32.mrf.mxu0  ;;  %3203 = vmatmul.mubr.bf16.vlgmr.msra.gmra.mxu1 %v4345_v51  ;;  %3227 = vmatmul.mubr.bf16.vlgmr.msra.gmra.mxu0 %v4345_v51 }
 0x177   :  { %3235 = vmatpush3.bf16.msra.mxu1 %v3980_v44  ;;  %3259 = vmatpush3.bf16.msra.mxu0 %v3981_v45 }
 0x178   :  { %v3185_v56 = vpop.f32.mrf.mxu0  ;;  %3236 = vmatprep.subr.bf16.mxu1 %v3982_v53  ;;  %3260 = vmatprep.subr.bf16.mxu0 %v3983_v54 }
 0x179   :  { %v255_v61 = vpack.c.bf16 %v3185_v56, %v3184_v52 }
 0x17a   :  { %v240_v59 = vpop.f32.mrf.mxu0 }
 0x17b   :  { %v254_v60 = vpack.c.bf16 %v240_v59, %v237_v55  ;;  %3237 = vmatpush3.bf16.msra.mxu1 %v3982_v53  ;;  %3261 = vmatpush3.bf16.msra.mxu0 %v3983_v54 }
 0x17c   :  { %3238 = vmatprep.subr.bf16.mxu1 %v3984_v57  ;;  %3262 = vmatprep.subr.bf16.mxu0 %v3985_v58 }
 0x17d   :  { %3206 = vmatprep.mubr.bf16.mxu1 %v254_v60  ;;  %3230 = vmatprep.mubr.bf16.mxu0 %v254_v60 }
 0x17e   :  { %3207 = vmatmul.mubr.bf16.gmra.mxu1 %v255_v61  ;;  %3231 = vmatmul.mubr.bf16.gmra.mxu0 %v255_v61 }
 0x17f   :  { %3239 = vmatpush3.bf16.msra.mxu1 %v3984_v57  ;;  %3263 = vmatpush3.bf16.msra.mxu0 %v3985_v58 }
 0x180   :  { %3250 = vmatprep.mubr.bf16.mxu1 %v252_v50  ;;  %3274 = vmatprep.mubr.bf16.mxu0 %v252_v50 }
 0x181   :  { %3240 = vmatprep.subr.bf16.mxu1 %v3986_v62  ;;  %3264 = vmatprep.subr.bf16.mxu0 %v3987_v63 }
 0x183   :  { %3241 = vmatpush3.bf16.msra.mxu1 %v3986_v62  ;;  %3265 = vmatpush3.bf16.msra.mxu0 %v3987_v63 }
 0x184   :  { %3242 = vmatprep.subr.bf16.mxu1 %v3988_v1  ;;  %3266 = vmatprep.subr.bf16.mxu0 %v3989_v2 }
 0x187   :  { %3243 = vmatpush3.bf16.msra.mxu1 %v3988_v1  ;;  %3267 = vmatpush3.bf16.msra.mxu0 %v3989_v2 }
 0x188   :  { %3244 = vmatprep.subr.bf16.mxu1 %v3990_v3  ;;  %3268 = vmatprep.subr.bf16.mxu0 %v3991_v4 }
 0x18b   :  { %3245 = vmatpush3.bf16.msra.mxu1 %v3990_v3  ;;  %3269 = vmatpush3.bf16.msra.mxu0 %v3991_v4 }
 0x18c   :  { %3246 = vmatprep.subr.bf16.mxu1 %v3992_v5  ;;  %3270 = vmatprep.subr.bf16.mxu0 %v3993_v6 }
 0x18f   :  { %3247 = vmatpush3.bf16.msra.mxu1 %v3992_v5  ;;  %3271 = vmatpush3.bf16.msra.mxu0 %v3993_v6 }
 0x190   :  { %3248 = vmatprep.subr.bf16.mxu1 %v3994_v7  ;;  %3272 = vmatprep.subr.bf16.mxu0 %v3995_v8 }
 0x193   :  { %3249 = vmatpush3.bf16.msra.mxu1 %v3994_v7  ;;  %3273 = vmatpush3.bf16.msra.mxu0 %v3995_v8 }
 0x194   :  { %3282 = vmatprep.subr.bf16.mxu1 %v5233_v9  ;;  %3302 = vmatprep.subr.bf16.mxu0 %v5233_v9 }
 0x196   :  { %3251 = vmatmul.mubr.bf16.vlgmr.msra.gmra.mxu1 %v4345_v51  ;;  %3275 = vmatmul.mubr.bf16.vlgmr.msra.gmra.mxu0 %v4345_v51 }
 0x197   :  { %3254 = vmatprep.mubr.bf16.mxu1 %v254_v60  ;;  %3278 = vmatprep.mubr.bf16.mxu0 %v254_v60 }
 0x198   :  { %3283 = vmatpush3.bf16.msra.mxu1 %v4351_v10  ;;  %3303 = vmatpush3.bf16.msra.mxu0 %v4353_v11 }
 0x199   :  { %3284 = vmatprep.subr.bf16.mxu1 %v5233_v9  ;;  %3304 = vmatprep.subr.bf16.mxu0 %v5233_v9 }
 0x19c   :  { %3285 = vmatpush3.bf16.msra.mxu1 %v4359_v12  ;;  %3305 = vmatpush3.bf16.msra.mxu0 %v4361_v13 }
 0x19d   :  { %3286 = vmatprep.subr.bf16.mxu1 %v5233_v9  ;;  %3306 = vmatprep.subr.bf16.mxu0 %v5233_v9 }
 0x19e   :  { %3255 = vmatmul.mubr.bf16.gmra.mxu1 %v255_v61  ;;  %3279 = vmatmul.mubr.bf16.gmra.mxu0 %v255_v61 }
 0x19f   :  { %3298 = vmatprep.mubr.msk.bf16.mxu1 %vm4244_vm12, %v5233_v9  ;;  %3318 = vmatprep.mubr.msk.bf16.mxu0 %vm4244_vm12, %v5233_v9 }
 0x1a0   :  { %3287 = vmatpush3.bf16.msra.mxu1 %v4367_v14  ;;  %3307 = vmatpush3.bf16.msra.mxu0 %v4369_v15 }
 0x1a1   :  { %3288 = vmatprep.subr.bf16.mxu1 %v5233_v9  ;;  %3308 = vmatprep.subr.bf16.mxu0 %v5233_v9 }
 0x1a4   :  { %3289 = vmatpush3.bf16.msra.mxu1 %v4379_v16  ;;  %3309 = vmatpush3.bf16.msra.mxu0 %v4381_v17 }
 0x1a5   :  { %3290 = vmatprep.subr.bf16.mxu1 %v5233_v9  ;;  %3310 = vmatprep.subr.bf16.mxu0 %v5233_v9 }
 0x1a8   :  { %3291 = vmatpush3.bf16.msra.mxu1 %v4387_v18  ;;  %3311 = vmatpush3.bf16.msra.mxu0 %v4389_v19 }
 0x1a9   :  { %3292 = vmatprep.subr.bf16.mxu1 %v5233_v9  ;;  %3312 = vmatprep.subr.bf16.mxu0 %v5233_v9 }
 0x1ac   :  { %3293 = vmatpush3.bf16.msra.mxu1 %v4395_v20  ;;  %3313 = vmatpush3.bf16.msra.mxu0 %v4397_v21 }
 0x1ad   :  { %3294 = vmatprep.subr.bf16.mxu1 %v5233_v9  ;;  %3314 = vmatprep.subr.bf16.mxu0 %v5233_v9 }
 0x1b0   :  { %3295 = vmatpush3.bf16.msra.mxu1 %v4403_v22  ;;  %3315 = vmatpush3.bf16.msra.mxu0 %v4405_v23 }
 0x1b1   :  { %3296 = vmatprep.subr.bf16.mxu1 %v5233_v9  ;;  %3316 = vmatprep.subr.bf16.mxu0 %v5233_v9 }
 0x1b4   :  { %3297 = vmatpush3.bf16.msra.mxu1 %v4411_v24  ;;  %3317 = vmatpush3.bf16.msra.mxu0 %v4413_v25 }
 0x1b5   :  { %3322 = vmatprep.subr.bf16.mxu1 %v5233_v9  ;;  %3342 = vmatprep.subr.bf16.mxu0 %v5233_v9 }
 0x1b7   :  { %3299 = vmatmul.mubr.bf16.vlgmr.msra.gmra.mxu1 %v4241_v0  ;;  %3319 = vmatmul.mubr.bf16.vlgmr.msra.gmra.mxu0 %v4241_v0 }
 0x1b8   :  { %3323 = vmatpush3.bf16.msra.mxu1 %v4419_v26  ;;  %3343 = vmatpush3.bf16.msra.mxu0 %v4421_v27 }
 0x1b9   :  { %3324 = vmatprep.subr.bf16.mxu1 %v5233_v9  ;;  %3344 = vmatprep.subr.bf16.mxu0 %v5233_v9 }
 0x1ba   :  { %3338 = vmatprep.mubr.msk.bf16.mxu1 %vm4244_vm12, %v5233_v9  ;;  %3358 = vmatprep.mubr.msk.bf16.mxu0 %vm4244_vm12, %v5233_v9 }
 0x1bc   :  { %3325 = vmatpush3.bf16.msra.mxu1 %v4429_v28  ;;  %3345 = vmatpush3.bf16.msra.mxu0 %v4431_v29 }
 0x1bd   :  { %3326 = vmatprep.subr.bf16.mxu1 %v5233_v9  ;;  %3346 = vmatprep.subr.bf16.mxu0 %v5233_v9 }
 0x1c0   :  { %3327 = vmatpush3.bf16.msra.mxu1 %v4441_v30  ;;  %3347 = vmatpush3.bf16.msra.mxu0 %v4443_v31 }
 0x1c1   :  { %3328 = vmatprep.subr.bf16.mxu1 %v5233_v9  ;;  %3348 = vmatprep.subr.bf16.mxu0 %v5233_v9 }
 0x1c4   :  { %3329 = vmatpush3.bf16.msra.mxu1 %v4449_v32  ;;  %3349 = vmatpush3.bf16.msra.mxu0 %v4451_v33 }
 0x1c5   :  { %3330 = vmatprep.subr.bf16.mxu1 %v5233_v9  ;;  %3350 = vmatprep.subr.bf16.mxu0 %v5233_v9 }
 0x1c8   :  { %3331 = vmatpush3.bf16.msra.mxu1 %v4457_v34  ;;  %3351 = vmatpush3.bf16.msra.mxu0 %v4459_v35 }
 0x1c9   :  { %3332 = vmatprep.subr.bf16.mxu1 %v5233_v9  ;;  %3352 = vmatprep.subr.bf16.mxu0 %v5233_v9 }
 0x1cc   :  { %3333 = vmatpush3.bf16.msra.mxu1 %v4465_v36  ;;  %3353 = vmatpush3.bf16.msra.mxu0 %v4467_v37 }
 0x1cd   :  { %3334 = vmatprep.subr.bf16.mxu1 %v5233_v9  ;;  %3354 = vmatprep.subr.bf16.mxu0 %v5233_v9 }
 0x1d0   :  { %3335 = vmatpush3.bf16.msra.mxu1 %v4473_v38  ;;  %3355 = vmatpush3.bf16.msra.mxu0 %v4475_v39 }
 0x1d1   :  { %3336 = vmatprep.subr.bf16.mxu1 %v5233_v9  ;;  %3356 = vmatprep.subr.bf16.mxu0 %v5233_v9 }
 0x1d4   :  { %3337 = vmatpush3.bf16.msra.mxu1 %v4481_v40  ;;  %3357 = vmatpush3.bf16.msra.mxu0 %v4483_v41 }
 0x1d5   :  { %3362 = vmatprep.subr.bf16.mxu1 %v5233_v9  ;;  %3382 = vmatprep.subr.bf16.mxu0 %v5233_v9 }
 0x1d7   :  { %3339 = vmatmul.mubr.bf16.vlgmr.msra.gmra.mxu1 %v4241_v0  ;;  %3359 = vmatmul.mubr.bf16.vlgmr.msra.gmra.mxu0 %v4241_v0  ;;  %v4532_v0 = vld [vmem:[%s5229_s4] ss:$0 sm:$0xff] }
 0x1d8   :  { %3363 = vmatpush3.bf16.msra.mxu1 %v4351_v10  ;;  %3383 = vmatpush3.bf16.msra.mxu0 %v4353_v11 }
 0x1d9   :  { %3364 = vmatprep.subr.bf16.mxu1 %v5233_v9  ;;  %3384 = vmatprep.subr.bf16.mxu0 %v5233_v9 }
 0x1da   :  { %3378 = vmatprep.mubr.msk.bf16.mxu1 %vm4244_vm12, %v5233_v9  ;;  %3398 = vmatprep.mubr.msk.bf16.mxu0 %vm4244_vm12, %v5233_v9 }
 0x1dc   :  { %3365 = vmatpush3.bf16.msra.mxu1 %v4359_v12  ;;  %3385 = vmatpush3.bf16.msra.mxu0 %v4361_v13 }
 0x1dd   :  { %3366 = vmatprep.subr.bf16.mxu1 %v5233_v9  ;;  %3386 = vmatprep.subr.bf16.mxu0 %v5233_v9 }
 0x1e0   :  { %3367 = vmatpush3.bf16.msra.mxu1 %v4367_v14  ;;  %3387 = vmatpush3.bf16.msra.mxu0 %v4369_v15 }
 0x1e1   :  { %3368 = vmatprep.subr.bf16.mxu1 %v5233_v9  ;;  %3388 = vmatprep.subr.bf16.mxu0 %v5233_v9 }
 0x1e4   :  { %3369 = vmatpush3.bf16.msra.mxu1 %v4379_v16  ;;  %3389 = vmatpush3.bf16.msra.mxu0 %v4381_v17 }
 0x1e5   :  { %3370 = vmatprep.subr.bf16.mxu1 %v5233_v9  ;;  %3390 = vmatprep.subr.bf16.mxu0 %v5233_v9 }
 0x1e8   :  { %3371 = vmatpush3.bf16.msra.mxu1 %v4387_v18  ;;  %3391 = vmatpush3.bf16.msra.mxu0 %v4389_v19 }
 0x1e9   :  { %3372 = vmatprep.subr.bf16.mxu1 %v5233_v9  ;;  %3392 = vmatprep.subr.bf16.mxu0 %v5233_v9 }
 0x1ec   :  { %3373 = vmatpush3.bf16.msra.mxu1 %v4395_v20  ;;  %3393 = vmatpush3.bf16.msra.mxu0 %v4397_v21 }
 0x1ed   :  { %3374 = vmatprep.subr.bf16.mxu1 %v5233_v9  ;;  %3394 = vmatprep.subr.bf16.mxu0 %v5233_v9 }
 0x1f0   :  { %3375 = vmatpush3.bf16.msra.mxu1 %v4403_v22  ;;  %3395 = vmatpush3.bf16.msra.mxu0 %v4405_v23 }
 0x1f1   :  { %3376 = vmatprep.subr.bf16.mxu1 %v5233_v9  ;;  %3396 = vmatprep.subr.bf16.mxu0 %v5233_v9 }
 0x1f4   :  { %3377 = vmatpush3.bf16.msra.mxu1 %v4411_v24  ;;  %3397 = vmatpush3.bf16.msra.mxu0 %v4413_v25 }
 0x1f5   :  { %3402 = vmatprep.subr.bf16.mxu1 %v5233_v9  ;;  %3422 = vmatprep.subr.bf16.mxu0 %v5233_v9 }
 0x236   :  { %v3204_v43 = vpop.f32.mrf.mxu1  ;;  %v3228_v44 = vpop.f32.mrf.mxu0 }
 0x237   :  { %v4540_v45 = vadd.f32 %v3204_v43, %v4532_v0  ;;  %v4543_v46 = vadd.f32 %v3228_v44, %v4537_v42  ;;  %v2746_v44 = vld [vmem:[%s5229_s4 + $0x2] ss:$0 sm:$0xff] }
 0x238   :  { %v4545_v47 = vpop.f32.mrf.mxu1  ;;  %v4547_v48 = vpop.f32.mrf.mxu0 }
 0x23a   :  { %v3205_v49 = vpop.f32.mrf.mxu1  ;;  %v3229_v50 = vpop.f32.mrf.mxu0 }
 0x23b   :  { %v4550_v51 = vadd.f32 %v3205_v49, %v4532_v0  ;;  %v4553_v52 = vadd.f32 %v3229_v50, %v4537_v42  ;;  %v2755_v49 = vld [vmem:[%s5229_s4 + $0x3] ss:$0 sm:$0xff] }
 0x23c   :  { %v364_v53 = vpop.f32.mrf.mxu1  ;;  %v508_v54 = vpop.f32.mrf.mxu0 }
 0x23d   :  { %5235 = vst [vmem:[#allocation13_spill] sm:$0xff] %v4550_v51  ;;  %5236 = vst [vmem:[#allocation14_spill] sm:$0xff] %v4553_v52  ;;  %v4556_v55 = vadd.f32 %v4532_v0, %v364_v53  ;;  %v4559_v56 = vadd.f32 %v4537_v42, %v508_v54 }
 0x23e   :  { %v3208_v57 = vpop.f32.mrf.mxu1  ;;  %v3232_v58 = vpop.f32.mrf.mxu0 }
 0x23f   :  { %v4562_v59 = vadd.f32 %v3208_v57, %v4532_v0  ;;  %v4565_v60 = vadd.f32 %v3232_v58, %v4537_v42 }
 0x240   :  { %v377_v61 = vpop.f32.mrf.mxu1  ;;  %v521_v62 = vpop.f32.mrf.mxu0 }
 0x241   :  { %5237 = vst [vmem:[#allocation15_spill] sm:$0xff] %v4562_v59  ;;  %5238 = vst [vmem:[#allocation16_spill] sm:$0xff] %v4565_v60  ;;  %v4568_v63 = vadd.f32 %v4532_v0, %v377_v61  ;;  %v4571_v1 = vadd.f32 %v4537_v42, %v521_v62 }
 0x242   :  { %v3209_v2 = vpop.f32.mrf.mxu1  ;;  %v3233_v3 = vpop.f32.mrf.mxu0 }
 0x243   :  { %5239 = vst [vmem:[#allocation17_spill] sm:$0xff] %v4568_v63  ;;  %5240 = vst [vmem:[#allocation18_spill] sm:$0xff] %v4571_v1  ;;  %v4574_v4 = vadd.f32 %v3209_v2, %v4532_v0  ;;  %v4577_v5 = vadd.f32 %v3233_v3, %v4537_v42 }
 0x244   :  { %v380_v6 = vpop.f32.mrf.mxu1  ;;  %v524_v7 = vpop.f32.mrf.mxu0 }
 0x245   :  { %5241 = vst [vmem:[#allocation19_spill] sm:$0xff] %v4574_v4  ;;  %5242 = vst [vmem:[#allocation20_spill] sm:$0xff] %v4577_v5  ;;  %v4580_v8 = vadd.f32 %v4532_v0, %v380_v6  ;;  %v4583_v43 = vadd.f32 %v4537_v42, %v524_v7 }
 0x247   :  { %5243 = vst [vmem:[#allocation21_spill] sm:$0xff] %v4580_v8  ;;  %5244 = vst [vmem:[#allocation22_spill] sm:$0xff] %v4583_v43 }
 0x256   :  { %v3252_v50 = vpop.f32.mrf.mxu1  ;;  %v3276_v53 = vpop.f32.mrf.mxu0 }
 0x257   :  { %v4591_v54 = vadd.f32 %v3252_v50, %v2746_v44  ;;  %v4593_v57 = vadd.f32 %v3276_v53, %v2755_v49 }
 0x258   :  { %v649_v58 = vpop.f32.mrf.mxu1  ;;  %v793_v61 = vpop.f32.mrf.mxu0 }
 0x259   :  { %5245 = vst [vmem:[#allocation23_spill] sm:$0xff] %v4591_v54  ;;  %5246 = vst [vmem:[#allocation24_spill] sm:$0xff] %v4593_v57 }
 0x25a   :  { %v3253_v62 = vpop.f32.mrf.mxu1  ;;  %v3277_v2 = vpop.f32.mrf.mxu0 }
 0x25b   :  { %v4595_v3 = vadd.f32 %v3253_v62, %v2746_v44  ;;  %v4597_v6 = vadd.f32 %v3277_v2, %v2755_v49 }
 0x25c   :  { %v652_v7 = vpop.f32.mrf.mxu1  ;;  %v796_v9 = vpop.f32.mrf.mxu0 }
 0x25d   :  { %5247 = vst [vmem:[#allocation25_spill] sm:$0xff] %v4595_v3  ;;  %5248 = vst [vmem:[#allocation26_spill] sm:$0xff] %v4597_v6  ;;  %v4599_v4 = vadd.f32 %v2746_v44, %v652_v7  ;;  %v4601_v5 = vadd.f32 %v2755_v49, %v796_v9 }
 0x25e   :  { %v3256_v59 = vpop.f32.mrf.mxu1  ;;  %v3280_v60 = vpop.f32.mrf.mxu0 }
 0x25f   :  { %v4603_v50 = vadd.f32 %v3256_v59, %v2746_v44  ;;  %v4605_v53 = vadd.f32 %v3280_v60, %v2755_v49 }
 0x260   :  { %v665_v8 = vpop.f32.mrf.mxu1  ;;  %v809_v43 = vpop.f32.mrf.mxu0 }
 0x261   :  { %5249 = vst [vmem:[#allocation27_spill] sm:$0xff] %v4603_v50  ;;  %5250 = vst [vmem:[#allocation28_spill] sm:$0xff] %v4605_v53  ;;  %v4607_v63 = vadd.f32 %v2746_v44, %v665_v8  ;;  %v4609_v62 = vadd.f32 %v2755_v49, %v809_v43 }
 0x262   :  { %v3257_v2 = vpop.f32.mrf.mxu1  ;;  %v3281_v1 = vpop.f32.mrf.mxu0 }
 0x263   :  { %5251 = vst [vmem:[#allocation29_spill] sm:$0xff] %v4607_v63  ;;  %5252 = vst [vmem:[#allocation30_spill] sm:$0xff] %v4609_v62  ;;  %v4611_v6 = vadd.f32 %v3257_v2, %v2746_v44  ;;  %v4613_v7 = vadd.f32 %v3281_v1, %v2755_v49  ;;  %v506_v2 = vadd.f32 %v4537_v42, %v4547_v48 }
 0x264   :  { %v668_v9 = vpop.f32.mrf.mxu1  ;;  %v812_v3 = vpop.f32.mrf.mxu0  ;;  %v362_v1 = vadd.f32 %v4532_v0, %v4545_v47 }
 0x265   :  { %5253 = vst [vmem:[#allocation31_spill] sm:$0xff] %v4611_v6  ;;  %5254 = vst [vmem:[#allocation32_spill] sm:$0xff] %v4613_v7  ;;  %v4615_v51 = vadd.f32 %v2746_v44, %v668_v9  ;;  %v4617_v59 = vadd.f32 %v2755_v49, %v812_v3  ;;  %v650_v3 = vadd.f32 %v2746_v44, %v649_v58 }
 0x267   :  { %5255 = vst [vmem:[#allocation33_spill] sm:$0xff] %v4615_v51  ;;  %5256 = vst [vmem:[#allocation34_spill] sm:$0xff] %v4617_v59 }
 0x277   :  { %v931_v60 = vpop.f32.mrf.mxu1  ;;  %v1037_v53 = vpop.f32.mrf.mxu0 }
 0x278   :  { %v1043_v7 = vadd.f32 %v1037_v53, %v506_v2  ;;  %v937_v6 = vadd.f32 %v931_v60, %v362_v1 }
 0x279   :  { %v3300_v50 = vpop.f32.mrf.mxu1  ;;  %v3320_v52 = vpop.f32.mrf.mxu0 }
 0x27a   :  { %v1260_v9 = vmul.f32 0.5, %v1043_v7  ;;  %v1256_v51 = vmul.f32 0.5, %v937_v6 }
 0x27b   :  { %v934_v8 = vpop.f32.mrf.mxu1  ;;  %v1040_v63 = vpop.f32.mrf.mxu0 }
 0x27c   :  { %4036 = vtanh.f32 %v1260_v9 }
 0x27d   :  { %v3301_v43 = vpop.f32.mrf.mxu1  ;;  %v3321_v62 = vpop.f32.mrf.mxu0  ;;  %4038 = vtanh.f32 %v1256_v51 }
 0x27e   :  { %v794_v43 = vadd.f32 %v2755_v49, %v793_v61 }
 0x289   :  { %v4037_v48 = vpop.eup %4036 }
 0x28a   :  { %v4039_v47 = vpop.eup %4038  ;;  %v1262_v53 = vmul.f32 0.5, %v4037_v48 }
 0x28b   :  { %v1258_v6 = vmul.f32 0.5, %v4039_v47 }
 0x28c   :  { %v1263_v60 = vadd.f32 0.5, %v1262_v53 }
 0x28d   :  { %v1259_v51 = vadd.f32 0.5, %v1258_v6 }
 0x28e   :  { %v1269_v58 = vmul.f32 0.0, %v1263_v60 }
 0x297   :  { %v1143_v59 = vpop.f32.mrf.mxu1  ;;  %v1249_v50 = vpop.f32.mrf.mxu0 }
 0x298   :  { %v1149_v52 = vadd.f32 %v1143_v59, %v650_v3  ;;  %v1255_v42 = vadd.f32 %v1249_v50, %v794_v43  ;;  %v5257_v3 = vmov 0.0  }
 0x299   :  { %v3340_v8 = vpop.f32.mrf.mxu1  ;;  %v3360_v63 = vpop.f32.mrf.mxu0 }
 0x29a   :  { %4040 = vtanh.f32 %v1149_v52  ;;  %v1265_v7 = vmul.f32 0.5, %v1255_v42 }
 0x29b   :  { %v1146_v62 = vpop.f32.mrf.mxu1  ;;  %v1252_v57 = vpop.f32.mrf.mxu0 }
 0x29c   :  { %4042 = vtanh.f32 %v1265_v7 }
 0x29d   :  { %v3341_v54 = vpop.f32.mrf.mxu1  ;;  %v3361_v0 = vpop.f32.mrf.mxu0 }
 0x2a7   :  { %v4041_v44 = vpop.eup %4040 }
 0x2a8   :  { %v1270_v59 = vmul.f32 %v4041_v44, %v1259_v51 }
 0x2a9   :  { %v4043_v49 = vpop.eup %4042 }
 0x2aa   :  { %v4623_v2 = vadd.f32 %v1270_v59, %v1269_v58  ;;  %v1267_v57 = vmul.f32 0.5, %v4043_v49 }
 0x2ac   :  { %4044 = vtanh.f32 %v4623_v2  ;;  %v1268_v61 = vadd.f32 0.5, %v1267_v57 }
 0x2b9   :  { %v4045_v1 = vpop.eup %4044 }
 0x2ba   :  { %v1273_v54 = vmul.f32 %v4045_v1, %v1268_v61 }
 0x2bc   :  { %v1274_v9 = vpack.c.bf16 %v1273_v54, %v1273_v54 }
 0x2be   :  { %3379 = vmatmul.mubr.bf16.vlgmr.msra.gmra.mxu1 %v1274_v9  ;;  %3399 = vmatmul.mubr.bf16.vlgmr.msra.gmra.mxu0 %v1274_v9 }
 0x2bf   :  { %3403 = vmatpush3.bf16.msra.mxu1 %v4419_v26  ;;  %3423 = vmatpush3.bf16.msra.mxu0 %v4421_v27 }
 0x2c0   :  { %3404 = vmatprep.subr.bf16.mxu1 %v5257_v3  ;;  %3424 = vmatprep.subr.bf16.mxu0 %v5257_v3 }
 0x2c1   :  { %3418 = vmatprep.mubr.msk.bf16.mxu1 %vm4244_vm12, %v5257_v3  ;;  %3438 = vmatprep.mubr.msk.bf16.mxu0 %vm4244_vm12, %v5257_v3 }
 0x2c3   :  { %3405 = vmatpush3.bf16.msra.mxu1 %v4429_v28  ;;  %3425 = vmatpush3.bf16.msra.mxu0 %v4431_v29 }
 0x2c4   :  { %3406 = vmatprep.subr.bf16.mxu1 %v5257_v3  ;;  %3426 = vmatprep.subr.bf16.mxu0 %v5257_v3 }
 0x2c7   :  { %3407 = vmatpush3.bf16.msra.mxu1 %v4441_v30  ;;  %3427 = vmatpush3.bf16.msra.mxu0 %v4443_v31 }
 0x2c8   :  { %3408 = vmatprep.subr.bf16.mxu1 %v5257_v3  ;;  %3428 = vmatprep.subr.bf16.mxu0 %v5257_v3 }
 0x2cb   :  { %3409 = vmatpush3.bf16.msra.mxu1 %v4449_v32  ;;  %3429 = vmatpush3.bf16.msra.mxu0 %v4451_v33 }
 0x2cc   :  { %3410 = vmatprep.subr.bf16.mxu1 %v5257_v3  ;;  %3430 = vmatprep.subr.bf16.mxu0 %v5257_v3 }
 0x2cf   :  { %3411 = vmatpush3.bf16.msra.mxu1 %v4457_v34  ;;  %3431 = vmatpush3.bf16.msra.mxu0 %v4459_v35 }
 0x2d0   :  { %3412 = vmatprep.subr.bf16.mxu1 %v5257_v3  ;;  %3432 = vmatprep.subr.bf16.mxu0 %v5257_v3 }
 0x2d3   :  { %3413 = vmatpush3.bf16.msra.mxu1 %v4465_v36  ;;  %3433 = vmatpush3.bf16.msra.mxu0 %v4467_v37 }
 0x2d4   :  { %3414 = vmatprep.subr.bf16.mxu1 %v5257_v3  ;;  %3434 = vmatprep.subr.bf16.mxu0 %v5257_v3 }
 0x2d7   :  { %3415 = vmatpush3.bf16.msra.mxu1 %v4473_v38  ;;  %3435 = vmatpush3.bf16.msra.mxu0 %v4475_v39 }
 0x2d8   :  { %3416 = vmatprep.subr.bf16.mxu1 %v5257_v3  ;;  %3436 = vmatprep.subr.bf16.mxu0 %v5257_v3 }
 0x2db   :  { %3417 = vmatpush3.bf16.msra.mxu1 %v4481_v40  ;;  %3437 = vmatpush3.bf16.msra.mxu0 %v4483_v41 }
 0x2dc   :  { %3442 = vmatprep.subr.bf16.mxu1 %v5257_v3  ;;  %3462 = vmatprep.subr.bf16.mxu0 %v5257_v3 }
 0x2de   :  { %3419 = vmatmul.mubr.bf16.vlgmr.msra.gmra.mxu1 %v1274_v9  ;;  %3439 = vmatmul.mubr.bf16.vlgmr.msra.gmra.mxu0 %v1274_v9 }
 0x2df   :  { %3443 = vmatpush3.bf16.msra.mxu1 %v4351_v10  ;;  %3463 = vmatpush3.bf16.msra.mxu0 %v4353_v11 }
 0x2e0   :  { %3444 = vmatprep.subr.bf16.mxu1 %v5257_v3  ;;  %3464 = vmatprep.subr.bf16.mxu0 %v5257_v3 }
 0x2e1   :  { %3458 = vmatprep.mubr.msk.bf16.mxu1 %vm4244_vm12, %v5257_v3  ;;  %3478 = vmatprep.mubr.msk.bf16.mxu0 %vm4244_vm12, %v5257_v3 }
 0x2e3   :  { %3445 = vmatpush3.bf16.msra.mxu1 %v4359_v12  ;;  %3465 = vmatpush3.bf16.msra.mxu0 %v4361_v13 }
 0x2e4   :  { %3446 = vmatprep.subr.bf16.mxu1 %v5257_v3  ;;  %3466 = vmatprep.subr.bf16.mxu0 %v5257_v3 }
 0x2e7   :  { %3447 = vmatpush3.bf16.msra.mxu1 %v4367_v14  ;;  %3467 = vmatpush3.bf16.msra.mxu0 %v4369_v15 }
 0x2e8   :  { %3448 = vmatprep.subr.bf16.mxu1 %v5257_v3  ;;  %3468 = vmatprep.subr.bf16.mxu0 %v5257_v3 }
 0x2eb   :  { %3449 = vmatpush3.bf16.msra.mxu1 %v4379_v16  ;;  %3469 = vmatpush3.bf16.msra.mxu0 %v4381_v17 }
 0x2ec   :  { %3450 = vmatprep.subr.bf16.mxu1 %v5257_v3  ;;  %3470 = vmatprep.subr.bf16.mxu0 %v5257_v3 }
 0x2ef   :  { %3451 = vmatpush3.bf16.msra.mxu1 %v4387_v18  ;;  %3471 = vmatpush3.bf16.msra.mxu0 %v4389_v19 }
 0x2f0   :  { %3452 = vmatprep.subr.bf16.mxu1 %v5257_v3  ;;  %3472 = vmatprep.subr.bf16.mxu0 %v5257_v3 }
 0x2f3   :  { %3453 = vmatpush3.bf16.msra.mxu1 %v4395_v20  ;;  %3473 = vmatpush3.bf16.msra.mxu0 %v4397_v21 }
 0x2f4   :  { %3454 = vmatprep.subr.bf16.mxu1 %v5257_v3  ;;  %3474 = vmatprep.subr.bf16.mxu0 %v5257_v3 }
 0x2f7   :  { %3455 = vmatpush3.bf16.msra.mxu1 %v4403_v22  ;;  %3475 = vmatpush3.bf16.msra.mxu0 %v4405_v23 }
 0x2f8   :  { %3456 = vmatprep.subr.bf16.mxu1 %v5257_v3  ;;  %3476 = vmatprep.subr.bf16.mxu0 %v5257_v3 }
 0x2fb   :  { %3457 = vmatpush3.bf16.msra.mxu1 %v4411_v24  ;;  %3477 = vmatpush3.bf16.msra.mxu0 %v4413_v25 }
 0x2fc   :  { %3482 = vmatprep.subr.bf16.mxu1 %v5257_v3  ;;  %3502 = vmatprep.subr.bf16.mxu0 %v5257_v3 }
 0x37e   :  { %v1310_v50 = vpop.f32.mrf.mxu1  ;;  %v1352_v52 = vpop.f32.mrf.mxu0 }
 0x37f   :  { %v1358_v0 = vadd.f32 %v1352_v52, %v4559_v56  ;;  %v1316_v47 = vadd.f32 %v1310_v50, %v4556_v55 }
 0x380   :  { %v3380_v8 = vpop.f32.mrf.mxu1  ;;  %v3400_v63 = vpop.f32.mrf.mxu0 }
 0x381   :  { %v1447_v53 = vmul.f32 0.5, %v1358_v0  ;;  %v1443_v7 = vmul.f32 0.5, %v1316_v47 }
 0x382   :  { %v1313_v43 = vpop.f32.mrf.mxu1  ;;  %v1355_v62 = vpop.f32.mrf.mxu0 }
 0x383   :  { %4046 = vtanh.f32 %v1447_v53 }
 0x384   :  { %v3381_v42 = vpop.f32.mrf.mxu1  ;;  %v3401_v48 = vpop.f32.mrf.mxu0  ;;  %4048 = vtanh.f32 %v1443_v7 }
 0x390   :  { %v4047_v61 = vpop.eup %4046 }
 0x391   :  { %v4049_v54 = vpop.eup %4048  ;;  %v1449_v55 = vmul.f32 0.5, %v4047_v61 }
 0x392   :  { %v1445_v50 = vmul.f32 0.5, %v4049_v54 }
 0x393   :  { %v1450_v52 = vadd.f32 0.5, %v1449_v55 }
 0x394   :  { %v1446_v8 = vadd.f32 0.5, %v1445_v50 }
 0x39e   :  { %v1394_v6 = vpop.f32.mrf.mxu1  ;;  %v1436_v60 = vpop.f32.mrf.mxu0 }
 0x39f   :  { %v1400_v51 = vadd.f32 %v1394_v6, %v4599_v4  ;;  %v1442_v57 = vadd.f32 %v1436_v60, %v4601_v5  ;;  %v1456_v4 = vmul.f32 %v1450_v52, %v4623_v2  ;;  %v5258_v6 = vld [vmem:[#allocation23_spill] sm:$0xff] }
 0x3a0   :  { %v3420_v44 = vpop.f32.mrf.mxu1  ;;  %v3440_v58 = vpop.f32.mrf.mxu0 }
 0x3a1   :  { %4050 = vtanh.f32 %v1400_v51  ;;  %v1452_v9 = vmul.f32 0.5, %v1442_v57 }
 0x3a2   :  { %v1397_v59 = vpop.f32.mrf.mxu1  ;;  %v1439_v49 = vpop.f32.mrf.mxu0 }
 0x3a3   :  { %4052 = vtanh.f32 %v1452_v9  ;;  %v5259_v49 = vld [vmem:[#allocation24_spill] sm:$0xff] }
 0x3a4   :  { %v3421_v1 = vpop.f32.mrf.mxu1  ;;  %v3441_v56 = vpop.f32.mrf.mxu0 }
 0x3ae   :  { %v4051_v63 = vpop.eup %4050 }
 0x3af   :  { %v1457_v43 = vmul.f32 %v4051_v63, %v1446_v8 }
 0x3b0   :  { %v4053_v42 = vpop.eup %4052 }
 0x3b1   :  { %v4703_v62 = vadd.f32 %v1457_v43, %v1456_v4  ;;  %v1454_v5 = vmul.f32 0.5, %v4053_v42 }
 0x3b3   :  { %4054 = vtanh.f32 %v4703_v62  ;;  %v1455_v48 = vadd.f32 0.5, %v1454_v5 }
 0x3c0   :  { %v4055_v0 = vpop.eup %4054 }
 0x3c1   :  { %v1460_v47 = vmul.f32 %v4055_v0, %v1455_v48 }
 0x3c3   :  { %v1461_v53 = vpack.c.bf16 %v1460_v47, %v1460_v47 }
 0x3c5   :  { %3459 = vmatmul.mubr.bf16.vlgmr.msra.gmra.mxu1 %v1461_v53  ;;  %3479 = vmatmul.mubr.bf16.vlgmr.msra.gmra.mxu0 %v1461_v53 }
 0x3c6   :  { %3483 = vmatpush3.bf16.msra.mxu1 %v4419_v26  ;;  %3503 = vmatpush3.bf16.msra.mxu0 %v4421_v27 }
 0x3c7   :  { %3484 = vmatprep.subr.bf16.mxu1 %v5257_v3  ;;  %3504 = vmatprep.subr.bf16.mxu0 %v5257_v3 }
 0x3c8   :  { %3498 = vmatprep.mubr.msk.bf16.mxu1 %vm4244_vm12, %v5257_v3  ;;  %3518 = vmatprep.mubr.msk.bf16.mxu0 %vm4244_vm12, %v5257_v3 }
 0x3ca   :  { %3485 = vmatpush3.bf16.msra.mxu1 %v4429_v28  ;;  %3505 = vmatpush3.bf16.msra.mxu0 %v4431_v29 }
 0x3cb   :  { %3486 = vmatprep.subr.bf16.mxu1 %v5257_v3  ;;  %3506 = vmatprep.subr.bf16.mxu0 %v5257_v3 }
 0x3ce   :  { %3487 = vmatpush3.bf16.msra.mxu1 %v4441_v30  ;;  %3507 = vmatpush3.bf16.msra.mxu0 %v4443_v31 }
 0x3cf   :  { %3488 = vmatprep.subr.bf16.mxu1 %v5257_v3  ;;  %3508 = vmatprep.subr.bf16.mxu0 %v5257_v3 }
 0x3d2   :  { %3489 = vmatpush3.bf16.msra.mxu1 %v4449_v32  ;;  %3509 = vmatpush3.bf16.msra.mxu0 %v4451_v33 }
 0x3d3   :  { %3490 = vmatprep.subr.bf16.mxu1 %v5257_v3  ;;  %3510 = vmatprep.subr.bf16.mxu0 %v5257_v3 }
 0x3d6   :  { %3491 = vmatpush3.bf16.msra.mxu1 %v4457_v34  ;;  %3511 = vmatpush3.bf16.msra.mxu0 %v4459_v35 }
 0x3d7   :  { %3492 = vmatprep.subr.bf16.mxu1 %v5257_v3  ;;  %3512 = vmatprep.subr.bf16.mxu0 %v5257_v3 }
 0x3da   :  { %3493 = vmatpush3.bf16.msra.mxu1 %v4465_v36  ;;  %3513 = vmatpush3.bf16.msra.mxu0 %v4467_v37 }
 0x3db   :  { %3494 = vmatprep.subr.bf16.mxu1 %v5257_v3  ;;  %3514 = vmatprep.subr.bf16.mxu0 %v5257_v3 }
 0x3de   :  { %3495 = vmatpush3.bf16.msra.mxu1 %v4473_v38  ;;  %3515 = vmatpush3.bf16.msra.mxu0 %v4475_v39 }
 0x3df   :  { %3496 = vmatprep.subr.bf16.mxu1 %v5257_v3  ;;  %3516 = vmatprep.subr.bf16.mxu0 %v5257_v3 }
 0x3e2   :  { %3497 = vmatpush3.bf16.msra.mxu1 %v4481_v40  ;;  %3517 = vmatpush3.bf16.msra.mxu0 %v4483_v41 }
 0x3e3   :  { %3522 = vmatprep.subr.bf16.mxu1 %v5257_v3  ;;  %3542 = vmatprep.subr.bf16.mxu0 %v5257_v3 }
 0x3e5   :  { %3499 = vmatmul.mubr.bf16.vlgmr.msra.gmra.mxu1 %v1461_v53  ;;  %3519 = vmatmul.mubr.bf16.vlgmr.msra.gmra.mxu0 %v1461_v53 }
 0x3e6   :  { %3523 = vmatpush3.bf16.msra.mxu1 %v4351_v10  ;;  %3543 = vmatpush3.bf16.msra.mxu0 %v4353_v11 }
 0x3e7   :  { %3524 = vmatprep.subr.bf16.mxu1 %v5257_v3  ;;  %3544 = vmatprep.subr.bf16.mxu0 %v5257_v3 }
 0x3e8   :  { %3538 = vmatprep.mubr.msk.bf16.mxu1 %vm4244_vm12, %v5257_v3  ;;  %3558 = vmatprep.mubr.msk.bf16.mxu0 %vm4244_vm12, %v5257_v3 }
 0x3ea   :  { %3525 = vmatpush3.bf16.msra.mxu1 %v4359_v12  ;;  %3545 = vmatpush3.bf16.msra.mxu0 %v4361_v13 }
 0x3eb   :  { %3526 = vmatprep.subr.bf16.mxu1 %v5257_v3  ;;  %3546 = vmatprep.subr.bf16.mxu0 %v5257_v3 }
 0x3ee   :  { %3527 = vmatpush3.bf16.msra.mxu1 %v4367_v14  ;;  %3547 = vmatpush3.bf16.msra.mxu0 %v4369_v15 }
 0x3ef   :  { %3528 = vmatprep.subr.bf16.mxu1 %v5257_v3  ;;  %3548 = vmatprep.subr.bf16.mxu0 %v5257_v3 }
 0x3f2   :  { %3529 = vmatpush3.bf16.msra.mxu1 %v4379_v16  ;;  %3549 = vmatpush3.bf16.msra.mxu0 %v4381_v17 }
 0x3f3   :  { %3530 = vmatprep.subr.bf16.mxu1 %v5257_v3  ;;  %3550 = vmatprep.subr.bf16.mxu0 %v5257_v3 }
 0x3f6   :  { %3531 = vmatpush3.bf16.msra.mxu1 %v4387_v18  ;;  %3551 = vmatpush3.bf16.msra.mxu0 %v4389_v19 }
 0x3f7   :  { %3532 = vmatprep.subr.bf16.mxu1 %v5257_v3  ;;  %3552 = vmatprep.subr.bf16.mxu0 %v5257_v3 }
 0x3fa   :  { %3533 = vmatpush3.bf16.msra.mxu1 %v4395_v20  ;;  %3553 = vmatpush3.bf16.msra.mxu0 %v4397_v21 }
 0x3fb   :  { %3534 = vmatprep.subr.bf16.mxu1 %v5257_v3  ;;  %3554 = vmatprep.subr.bf16.mxu0 %v5257_v3 }
 0x3fe   :  { %3535 = vmatpush3.bf16.msra.mxu1 %v4403_v22  ;;  %3555 = vmatpush3.bf16.msra.mxu0 %v4405_v23 }
 0x3ff   :  { %3536 = vmatprep.subr.bf16.mxu1 %v5257_v3  ;;  %3556 = vmatprep.subr.bf16.mxu0 %v5257_v3 }
 0x402   :  { %3537 = vmatpush3.bf16.msra.mxu1 %v4411_v24  ;;  %3557 = vmatpush3.bf16.msra.mxu0 %v4413_v25 }
 0x403   :  { %3562 = vmatprep.subr.bf16.mxu1 %v5257_v3  ;;  %3582 = vmatprep.subr.bf16.mxu0 %v5257_v3 }
 0x485   :  { %v1497_v10 = vpop.f32.mrf.mxu1  ;;  %v1539_v11 = vpop.f32.mrf.mxu0 }
 0x486   :  { %v1545_v18 = vadd.f32 %v1539_v11, %v4543_v46  ;;  %v1503_v19 = vadd.f32 %v1497_v10, %v4540_v45  ;;  %v5260_v10 = vld [vmem:[#allocation14_spill] sm:$0xff] }
 0x487   :  { %v3460_v12 = vpop.f32.mrf.mxu1  ;;  %v3480_v13 = vpop.f32.mrf.mxu0 }
 0x488   :  { %v1634_v20 = vmul.f32 0.5, %v1545_v18  ;;  %v1630_v21 = vmul.f32 0.5, %v1503_v19  ;;  %v5261_v12 = vld [vmem:[#allocation13_spill] sm:$0xff] }
 0x489   :  { %v1500_v14 = vpop.f32.mrf.mxu1  ;;  %v1542_v15 = vpop.f32.mrf.mxu0 }
 0x48a   :  { %4056 = vtanh.f32 %v1634_v20 }
 0x48b   :  { %v3461_v16 = vpop.f32.mrf.mxu1  ;;  %v3481_v17 = vpop.f32.mrf.mxu0  ;;  %4058 = vtanh.f32 %v1630_v21 }
 0x48c   :  { %v5262_v16 = vld [vmem:[#allocation25_spill] sm:$0xff] }
 0x497   :  { %v4057_v61 = vpop.eup %4056 }
 0x498   :  { %v4059_v56 = vpop.eup %4058  ;;  %v1636_v45 = vmul.f32 0.5, %v4057_v61 }
 0x499   :  { %v1632_v55 = vmul.f32 0.5, %v4059_v56 }
 0x49a   :  { %v1637_v9 = vadd.f32 0.5, %v1636_v45 }
 0x49b   :  { %v1633_v50 = vadd.f32 0.5, %v1632_v55 }
 0x49c   :  { %v1643_v8 = vmul.f32 %v1637_v9, %v4703_v62 }
 0x4a5   :  { %v1581_v2 = vpop.f32.mrf.mxu1  ;;  %v1623_v7 = vpop.f32.mrf.mxu0 }
 0x4a6   :  { %v1587_v60 = vadd.f32 %v1581_v2, %v5258_v6  ;;  %v1629_v57 = vadd.f32 %v1623_v7, %v5259_v49  ;;  %v5263_v2 = vld [vmem:[#allocation26_spill] sm:$0xff] }
 0x4a7   :  { %v3500_v51 = vpop.f32.mrf.mxu1  ;;  %v3520_v44 = vpop.f32.mrf.mxu0 }
 0x4a8   :  { %4060 = vtanh.f32 %v1587_v60  ;;  %v1639_v54 = vmul.f32 0.5, %v1629_v57 }
 0x4a9   :  { %v1584_v58 = vpop.f32.mrf.mxu1  ;;  %v1626_v59 = vpop.f32.mrf.mxu0 }
 0x4aa   :  { %4062 = vtanh.f32 %v1639_v54 }
 0x4ab   :  { %v3501_v1 = vpop.f32.mrf.mxu1  ;;  %v3521_v46 = vpop.f32.mrf.mxu0 }
 0x4b5   :  { %v4061_v52 = vpop.eup %4060 }
 0x4b6   :  { %v1644_v63 = vmul.f32 %v4061_v52, %v1633_v50 }
 0x4b7   :  { %v4063_v43 = vpop.eup %4062 }
 0x4b8   :  { %v4783_v4 = vadd.f32 %v1644_v63, %v1643_v8  ;;  %v1641_v42 = vmul.f32 0.5, %v4063_v43  ;;  %v4890_v63 = vld [vmem:[#allocation6 + $0xe8] ss:$16 sps:$4 sm:$0xff]   ;;  %v4893_v43 = vld [vmem:[#allocation6 + $0xec] ss:$16 sps:$4 sm:$0xff]  }
 0x4ba   :  { %4064 = vtanh.f32 %v4783_v4  ;;  %v1642_v5 = vadd.f32 0.5, %v1641_v42  ;;  %v4905_v42 = vld [vmem:[#allocation6 + $0xcc] ss:$16 sps:$4 sm:$0xff]  }
 0x4c7   :  { %v4065_v48 = vpop.eup %4064 }
 0x4c8   :  { %v1647_v0 = vmul.f32 %v4065_v48, %v1642_v5  ;;  %v4910_v5 = vld [vmem:[#allocation6 + $0xa8] ss:$16 sps:$4 sm:$0xff]   ;;  %v4913_v48 = vld [vmem:[#allocation6 + $0xac] ss:$16 sps:$4 sm:$0xff]  }
 0x4ca   :  { %v1648_v47 = vpack.c.bf16 %v1647_v0, %v1647_v0  ;;  %v4918_v0 = vld [vmem:[#allocation6 + $0x88] ss:$16 sps:$4 sm:$0xff]  }
 0x4cc   :  { %3539 = vmatmul.mubr.bf16.vlgmr.msra.gmra.mxu1 %v1648_v47  ;;  %3559 = vmatmul.mubr.bf16.vlgmr.msra.gmra.mxu0 %v1648_v47 }
 0x4cd   :  { %3563 = vmatpush3.bf16.msra.mxu1 %v4419_v26  ;;  %3583 = vmatpush3.bf16.msra.mxu0 %v4421_v27  ;;  %v4822_v26 = vld [vmem:[#allocation6 + $0xe0] ss:$16 sps:$4 sm:$0xff]   ;;  %v4825_v27 = vld [vmem:[#allocation6 + $0xe4] ss:$16 sps:$4 sm:$0xff]  }
 0x4ce   :  { %3564 = vmatprep.subr.bf16.mxu1 %v5257_v3  ;;  %3584 = vmatprep.subr.bf16.mxu0 %v5257_v3 }
 0x4cf   :  { %3578 = vmatprep.mubr.msk.bf16.mxu1 %vm4244_vm12, %v5257_v3  ;;  %3598 = vmatprep.mubr.msk.bf16.mxu0 %vm4244_vm12, %v5257_v3 }
 0x4d1   :  { %3565 = vmatpush3.bf16.msra.mxu1 %v4429_v28  ;;  %3585 = vmatpush3.bf16.msra.mxu0 %v4431_v29  ;;  %v4834_v28 = vld [vmem:[#allocation6 + $0xc0] ss:$16 sps:$4 sm:$0xff]   ;;  %v4837_v29 = vld [vmem:[#allocation6 + $0xc4] ss:$16 sps:$4 sm:$0xff]  }
 0x4d2   :  { %3566 = vmatprep.subr.bf16.mxu1 %v5257_v3  ;;  %3586 = vmatprep.subr.bf16.mxu0 %v5257_v3 }
 0x4d5   :  { %3567 = vmatpush3.bf16.msra.mxu1 %v4441_v30  ;;  %3587 = vmatpush3.bf16.msra.mxu0 %v4443_v31  ;;  %v4842_v30 = vld [vmem:[#allocation6 + $0xa0] ss:$16 sps:$4 sm:$0xff]   ;;  %v4845_v31 = vld [vmem:[#allocation6 + $0xa4] ss:$16 sps:$4 sm:$0xff]  }
 0x4d6   :  { %3568 = vmatprep.subr.bf16.mxu1 %v5257_v3  ;;  %3588 = vmatprep.subr.bf16.mxu0 %v5257_v3 }
 0x4d9   :  { %3569 = vmatpush3.bf16.msra.mxu1 %v4449_v32  ;;  %3589 = vmatpush3.bf16.msra.mxu0 %v4451_v33  ;;  %v4850_v32 = vld [vmem:[#allocation6 + $0x80] ss:$16 sps:$4 sm:$0xff]   ;;  %v4853_v33 = vld [vmem:[#allocation6 + $0x84] ss:$16 sps:$4 sm:$0xff]  }
 0x4da   :  { %3570 = vmatprep.subr.bf16.mxu1 %v5257_v3  ;;  %3590 = vmatprep.subr.bf16.mxu0 %v5257_v3 }
 0x4dd   :  { %3571 = vmatpush3.bf16.msra.mxu1 %v4457_v34  ;;  %3591 = vmatpush3.bf16.msra.mxu0 %v4459_v35  ;;  %v4858_v34 = vld [vmem:[#allocation6 + $0x60] ss:$16 sps:$4 sm:$0xff]   ;;  %v4861_v35 = vld [vmem:[#allocation6 + $0x64] ss:$16 sps:$4 sm:$0xff]  }
 0x4de   :  { %3572 = vmatprep.subr.bf16.mxu1 %v5257_v3  ;;  %3592 = vmatprep.subr.bf16.mxu0 %v5257_v3 }
 0x4e1   :  { %3573 = vmatpush3.bf16.msra.mxu1 %v4465_v36  ;;  %3593 = vmatpush3.bf16.msra.mxu0 %v4467_v37  ;;  %v4866_v36 = vld [vmem:[#allocation6 + $0x40] ss:$16 sps:$4 sm:$0xff]   ;;  %v4869_v37 = vld [vmem:[#allocation6 + $0x44] ss:$16 sps:$4 sm:$0xff]  }
 0x4e2   :  { %3574 = vmatprep.subr.bf16.mxu1 %v5257_v3  ;;  %3594 = vmatprep.subr.bf16.mxu0 %v5257_v3 }
 0x4e5   :  { %3575 = vmatpush3.bf16.msra.mxu1 %v4473_v38  ;;  %3595 = vmatpush3.bf16.msra.mxu0 %v4475_v39 }
 0x4e6   :  { %3576 = vmatprep.subr.bf16.mxu1 %v5257_v3  ;;  %3596 = vmatprep.subr.bf16.mxu0 %v5257_v3 }
 0x4e9   :  { %3577 = vmatpush3.bf16.msra.mxu1 %v4481_v40  ;;  %3597 = vmatpush3.bf16.msra.mxu0 %v4483_v41 }
 0x4ea   :  { %3602 = vmatprep.subr.bf16.mxu1 %v5257_v3  ;;  %3622 = vmatprep.subr.bf16.mxu0 %v5257_v3 }
 0x4ec   :  { %3579 = vmatmul.mubr.bf16.vlgmr.msra.gmra.mxu1 %v1648_v47  ;;  %3599 = vmatmul.mubr.bf16.vlgmr.msra.gmra.mxu0 %v1648_v47  ;;  %v4921_v47 = vld [vmem:[#allocation6 + $0x8c] ss:$16 sps:$4 sm:$0xff]  }
 0x4ed   :  { %3603 = vmatpush3.bf16.msra.mxu1 %v4822_v26  ;;  %3623 = vmatpush3.bf16.msra.mxu0 %v4825_v27 }
 0x4ee   :  { %3604 = vmatprep.subr.bf16.mxu1 %v5257_v3  ;;  %3624 = vmatprep.subr.bf16.mxu0 %v5257_v3 }
 0x4ef   :  { %3618 = vmatprep.mubr.msk.bf16.mxu1 %vm4244_vm12, %v5257_v3  ;;  %3638 = vmatprep.mubr.msk.bf16.mxu0 %vm4244_vm12, %v5257_v3 }
 0x4f1   :  { %3605 = vmatpush3.bf16.msra.mxu1 %v4834_v28  ;;  %3625 = vmatpush3.bf16.msra.mxu0 %v4837_v29 }
 0x4f2   :  { %3606 = vmatprep.subr.bf16.mxu1 %v5257_v3  ;;  %3626 = vmatprep.subr.bf16.mxu0 %v5257_v3 }
 0x4f5   :  { %3607 = vmatpush3.bf16.msra.mxu1 %v4842_v30  ;;  %3627 = vmatpush3.bf16.msra.mxu0 %v4845_v31 }
 0x4f6   :  { %3608 = vmatprep.subr.bf16.mxu1 %v5257_v3  ;;  %3628 = vmatprep.subr.bf16.mxu0 %v5257_v3 }
 0x4f9   :  { %3609 = vmatpush3.bf16.msra.mxu1 %v4850_v32  ;;  %3629 = vmatpush3.bf16.msra.mxu0 %v4853_v33 }
 0x4fa   :  { %3610 = vmatprep.subr.bf16.mxu1 %v5257_v3  ;;  %3630 = vmatprep.subr.bf16.mxu0 %v5257_v3 }
 0x4fd   :  { %3611 = vmatpush3.bf16.msra.mxu1 %v4858_v34  ;;  %3631 = vmatpush3.bf16.msra.mxu0 %v4861_v35 }
 0x4fe   :  { %3612 = vmatprep.subr.bf16.mxu1 %v5257_v3  ;;  %3632 = vmatprep.subr.bf16.mxu0 %v5257_v3 }
 0x501   :  { %3613 = vmatpush3.bf16.msra.mxu1 %v4866_v36  ;;  %3633 = vmatpush3.bf16.msra.mxu0 %v4869_v37 }
 0x502   :  { %3614 = vmatprep.subr.bf16.mxu1 %v5257_v3  ;;  %3634 = vmatprep.subr.bf16.mxu0 %v5257_v3 }
 0x505   :  { %3615 = vmatpush3.bf16.msra.mxu1 %v4403_v22  ;;  %3635 = vmatpush3.bf16.msra.mxu0 %v4405_v23 }
 0x506   :  { %3616 = vmatprep.subr.bf16.mxu1 %v5257_v3  ;;  %3636 = vmatprep.subr.bf16.mxu0 %v5257_v3 }
 0x509   :  { %3617 = vmatpush3.bf16.msra.mxu1 %v4411_v24  ;;  %3637 = vmatpush3.bf16.msra.mxu0 %v4413_v25 }
 0x50a   :  { %3642 = vmatprep.subr.bf16.mxu1 %v5257_v3  ;;  %3662 = vmatprep.subr.bf16.mxu0 %v5257_v3 }
 0x58c   :  { %v1684_v38 = vpop.f32.mrf.mxu1  ;;  %v1726_v39 = vpop.f32.mrf.mxu0 }
 0x58d   :  { %v1732_v11 = vadd.f32 %v1726_v39, %v5260_v10  ;;  %v1690_v13 = vadd.f32 %v1684_v38, %v5261_v12  ;;  %v4926_v38 = vld [vmem:[#allocation6 + $0x68] ss:$16 sps:$4 sm:$0xff]   ;;  %v4929_v39 = vld [vmem:[#allocation6 + $0x6c] ss:$16 sps:$4 sm:$0xff]   ;;  %v4986_v10 = vld [vmem:[#allocation6 + $0x20] ss:$16 sps:$4 sm:$0xff]  }
 0x58e   :  { %v3540_v40 = vpop.f32.mrf.mxu1  ;;  %v3560_v41 = vpop.f32.mrf.mxu0  ;;  %v4994_v12 = vld [vmem:[#allocation6] ss:$16 sps:$4 sm:$0xff]  }
 0x58f   :  { %v1821_v14 = vmul.f32 0.5, %v1732_v11  ;;  %v1817_v24 = vmul.f32 0.5, %v1690_v13  ;;  %v4934_v40 = vld [vmem:[#allocation6 + $0x48] ss:$16 sps:$4 sm:$0xff]   ;;  %v4937_v41 = vld [vmem:[#allocation6 + $0x4c] ss:$16 sps:$4 sm:$0xff]  }
 0x590   :  { %v1687_v62 = vpop.f32.mrf.mxu1  ;;  %v1729_v22 = vpop.f32.mrf.mxu0  ;;  %v4989_v11 = vld [vmem:[#allocation6 + $0x24] ss:$16 sps:$4 sm:$0xff]  }
 0x591   :  { %4066 = vtanh.f32 %v1821_v14  ;;  %v4942_v62 = vld [vmem:[#allocation6 + $0x28] ss:$16 sps:$4 sm:$0xff]   ;;  %v4945_v22 = vld [vmem:[#allocation6 + $0x2c] ss:$16 sps:$4 sm:$0xff]   ;;  %v4997_v13 = vld [vmem:[#allocation6 + $0x4] ss:$16 sps:$4 sm:$0xff]  }
 0x592   :  { %v3541_v53 = vpop.f32.mrf.mxu1  ;;  %v3561_v23 = vpop.f32.mrf.mxu0  ;;  %4068 = vtanh.f32 %v1817_v24 }
 0x593   :  { %v4950_v53 = vld [vmem:[#allocation6 + $0x8] ss:$16 sps:$4 sm:$0xff]   ;;  %v4953_v23 = vld [vmem:[#allocation6 + $0xc] ss:$16 sps:$4 sm:$0xff]  }
 0x59e   :  { %v4067_v6 = vpop.eup %4066 }
 0x59f   :  { %v4069_v44 = vpop.eup %4068  ;;  %v1823_v58 = vmul.f32 0.5, %v4067_v6 }
 0x5a0   :  { %v1819_v49 = vmul.f32 0.5, %v4069_v44 }
 0x5a1   :  { %v1824_v57 = vadd.f32 0.5, %v1823_v58  ;;  %v5266_v58 = vld [vmem:[#allocation29_spill] sm:$0xff] }
 0x5a2   :  { %v1820_v61 = vadd.f32 0.5, %v1819_v49 }
 0x5a3   :  { %v1830_v46 = vmul.f32 %v1824_v57, %v4783_v4  ;;  %v4902_v4 = vld [vmem:[#allocation6 + $0xc8] ss:$16 sps:$4 sm:$0xff]  }
 0x5ac   :  { %v1768_v25 = vpop.f32.mrf.mxu1  ;;  %v1810_v15 = vpop.f32.mrf.mxu0 }
 0x5ad   :  { %v1774_v17 = vadd.f32 %v1768_v25, %v5262_v16  ;;  %v1816_v7 = vadd.f32 %v1810_v15, %v5263_v2  ;;  %v5265_v2 = vld [vmem:[#allocation17_spill] sm:$0xff] }
 0x5ae   :  { %v3580_v18 = vpop.f32.mrf.mxu1  ;;  %v3600_v19 = vpop.f32.mrf.mxu0 }
 0x5af   :  { %4070 = vtanh.f32 %v1774_v17  ;;  %v1826_v59 = vmul.f32 0.5, %v1816_v7 }
 0x5b0   :  { %v1771_v20 = vpop.f32.mrf.mxu1  ;;  %v1813_v21 = vpop.f32.mrf.mxu0 }
 0x5b1   :  { %4072 = vtanh.f32 %v1826_v59  ;;  %v5264_v20 = vld [vmem:[#allocation18_spill] sm:$0xff] }
 0x5b2   :  { %v3581_v60 = vpop.f32.mrf.mxu1  ;;  %v3601_v51 = vpop.f32.mrf.mxu0 }
 0x5bc   :  { %v4071_v1 = vpop.eup %4070 }
 0x5bd   :  { %v1831_v56 = vmul.f32 %v4071_v1, %v1820_v61 }
 0x5be   :  { %v4073_v54 = vpop.eup %4072 }
 0x5bf   :  { %v4887_v45 = vadd.f32 %v1831_v56, %v1830_v46  ;;  %v1828_v55 = vmul.f32 0.5, %v4073_v54  ;;  %v5267_v46 = vld [vmem:[#allocation30_spill] sm:$0xff] }
 0x5c1   :  { %4074 = vtanh.f32 %v4887_v45  ;;  %v1829_v9 = vadd.f32 0.5, %v1828_v55 }
 0x5ce   :  { %v4075_v50 = vpop.eup %4074 }
 0x5cf   :  { %v1834_v52 = vmul.f32 %v4075_v50, %v1829_v9 }
 0x5d1   :  { %v1835_v8 = vpack.c.bf16 %v1834_v52, %v1834_v52 }
 0x5d3   :  { %3619 = vmatmul.mubr.bf16.vlgmr.msra.gmra.mxu1 %v1835_v8  ;;  %3639 = vmatmul.mubr.bf16.vlgmr.msra.gmra.mxu0 %v1835_v8 }
 0x5d4   :  { %3643 = vmatpush3.bf16.msra.mxu1 %v4890_v63  ;;  %3663 = vmatpush3.bf16.msra.mxu0 %v4893_v43 }
 0x5d5   :  { %3644 = vmatprep.subr.bf16.mxu1 %v5257_v3  ;;  %3664 = vmatprep.subr.bf16.mxu0 %v5257_v3 }
 0x5d6   :  { %3658 = vmatprep.mubr.msk.bf16.mxu1 %vm4244_vm12, %v5257_v3  ;;  %3678 = vmatprep.mubr.msk.bf16.mxu0 %vm4244_vm12, %v5257_v3 }
 0x5d8   :  { %3645 = vmatpush3.bf16.msra.mxu1 %v4902_v4  ;;  %3665 = vmatpush3.bf16.msra.mxu0 %v4905_v42 }
 0x5d9   :  { %3646 = vmatprep.subr.bf16.mxu1 %v5257_v3  ;;  %3666 = vmatprep.subr.bf16.mxu0 %v5257_v3 }
 0x5dc   :  { %3647 = vmatpush3.bf16.msra.mxu1 %v4910_v5  ;;  %3667 = vmatpush3.bf16.msra.mxu0 %v4913_v48 }
 0x5dd   :  { %3648 = vmatprep.subr.bf16.mxu1 %v5257_v3  ;;  %3668 = vmatprep.subr.bf16.mxu0 %v5257_v3 }
 0x5e0   :  { %3649 = vmatpush3.bf16.msra.mxu1 %v4918_v0  ;;  %3669 = vmatpush3.bf16.msra.mxu0 %v4921_v47 }
 0x5e1   :  { %3650 = vmatprep.subr.bf16.mxu1 %v5257_v3  ;;  %3670 = vmatprep.subr.bf16.mxu0 %v5257_v3 }
 0x5e4   :  { %3651 = vmatpush3.bf16.msra.mxu1 %v4926_v38  ;;  %3671 = vmatpush3.bf16.msra.mxu0 %v4929_v39 }
 0x5e5   :  { %3652 = vmatprep.subr.bf16.mxu1 %v5257_v3  ;;  %3672 = vmatprep.subr.bf16.mxu0 %v5257_v3 }
 0x5e8   :  { %3653 = vmatpush3.bf16.msra.mxu1 %v4934_v40  ;;  %3673 = vmatpush3.bf16.msra.mxu0 %v4937_v41 }
 0x5e9   :  { %3654 = vmatprep.subr.bf16.mxu1 %v5257_v3  ;;  %3674 = vmatprep.subr.bf16.mxu0 %v5257_v3 }
 0x5ec   :  { %3655 = vmatpush3.bf16.msra.mxu1 %v4942_v62  ;;  %3675 = vmatpush3.bf16.msra.mxu0 %v4945_v22 }
 0x5ed   :  { %3656 = vmatprep.subr.bf16.mxu1 %v5257_v3  ;;  %3676 = vmatprep.subr.bf16.mxu0 %v5257_v3 }
 0x5f0   :  { %3657 = vmatpush3.bf16.msra.mxu1 %v4950_v53  ;;  %3677 = vmatpush3.bf16.msra.mxu0 %v4953_v23 }
 0x5f1   :  { %3682 = vmatprep.subr.bf16.mxu1 %v5257_v3  ;;  %3702 = vmatprep.subr.bf16.mxu0 %v5257_v3 }
 0x5f3   :  { %3659 = vmatmul.mubr.bf16.vlgmr.msra.gmra.mxu1 %v1835_v8  ;;  %3679 = vmatmul.mubr.bf16.vlgmr.msra.gmra.mxu0 %v1835_v8 }
 0x5f4   :  { %3683 = vmatpush3.bf16.msra.mxu1 %v4822_v26  ;;  %3703 = vmatpush3.bf16.msra.mxu0 %v4825_v27 }
 0x5f5   :  { %3684 = vmatprep.subr.bf16.mxu1 %v5257_v3  ;;  %3704 = vmatprep.subr.bf16.mxu0 %v5257_v3 }
 0x5f6   :  { %3698 = vmatprep.mubr.msk.bf16.mxu1 %vm4244_vm12, %v5257_v3  ;;  %3718 = vmatprep.mubr.msk.bf16.mxu0 %vm4244_vm12, %v5257_v3 }
 0x5f8   :  { %3685 = vmatpush3.bf16.msra.mxu1 %v4834_v28  ;;  %3705 = vmatpush3.bf16.msra.mxu0 %v4837_v29 }
 0x5f9   :  { %3686 = vmatprep.subr.bf16.mxu1 %v5257_v3  ;;  %3706 = vmatprep.subr.bf16.mxu0 %v5257_v3 }
 0x5fc   :  { %3687 = vmatpush3.bf16.msra.mxu1 %v4842_v30  ;;  %3707 = vmatpush3.bf16.msra.mxu0 %v4845_v31 }
 0x5fd   :  { %3688 = vmatprep.subr.bf16.mxu1 %v5257_v3  ;;  %3708 = vmatprep.subr.bf16.mxu0 %v5257_v3 }
 0x600   :  { %3689 = vmatpush3.bf16.msra.mxu1 %v4850_v32  ;;  %3709 = vmatpush3.bf16.msra.mxu0 %v4853_v33 }
 0x601   :  { %3690 = vmatprep.subr.bf16.mxu1 %v5257_v3  ;;  %3710 = vmatprep.subr.bf16.mxu0 %v5257_v3 }
 0x604   :  { %3691 = vmatpush3.bf16.msra.mxu1 %v4858_v34  ;;  %3711 = vmatpush3.bf16.msra.mxu0 %v4861_v35 }
 0x605   :  { %3692 = vmatprep.subr.bf16.mxu1 %v5257_v3  ;;  %3712 = vmatprep.subr.bf16.mxu0 %v5257_v3 }
 0x608   :  { %3693 = vmatpush3.bf16.msra.mxu1 %v4866_v36  ;;  %3713 = vmatpush3.bf16.msra.mxu0 %v4869_v37 }
 0x609   :  { %3694 = vmatprep.subr.bf16.mxu1 %v5257_v3  ;;  %3714 = vmatprep.subr.bf16.mxu0 %v5257_v3 }
 0x60c   :  { %3695 = vmatpush3.bf16.msra.mxu1 %v4986_v10  ;;  %3715 = vmatpush3.bf16.msra.mxu0 %v4989_v11 }
 0x60d   :  { %3696 = vmatprep.subr.bf16.mxu1 %v5257_v3  ;;  %3716 = vmatprep.subr.bf16.mxu0 %v5257_v3 }
 0x610   :  { %3697 = vmatpush3.bf16.msra.mxu1 %v4994_v12  ;;  %3717 = vmatpush3.bf16.msra.mxu0 %v4997_v13 }
 0x611   :  { %3722 = vmatprep.subr.bf16.mxu1 %v5257_v3  ;;  %3742 = vmatprep.subr.bf16.mxu0 %v5257_v3 }
 0x693   :  { %v1871_v14 = vpop.f32.mrf.mxu1  ;;  %v1913_v24 = vpop.f32.mrf.mxu0 }
 0x694   :  { %v1919_v21 = vadd.f32 %v1913_v24, %v5264_v20  ;;  %v1877_v7 = vadd.f32 %v1871_v14, %v5265_v2 }
 0x695   :  { %v3620_v25 = vpop.f32.mrf.mxu1  ;;  %v3640_v15 = vpop.f32.mrf.mxu0 }
 0x696   :  { %v2008_v6 = vmul.f32 0.5, %v1919_v21  ;;  %v2004_v60 = vmul.f32 0.5, %v1877_v7 }
 0x697   :  { %v1874_v16 = vpop.f32.mrf.mxu1  ;;  %v1916_v17 = vpop.f32.mrf.mxu0 }
 0x698   :  { %4076 = vtanh.f32 %v2008_v6 }
 0x699   :  { %v3621_v18 = vpop.f32.mrf.mxu1  ;;  %v3641_v19 = vpop.f32.mrf.mxu0  ;;  %4078 = vtanh.f32 %v2004_v60 }
 0x6a5   :  { %v4077_v54 = vpop.eup %4076 }
 0x6a6   :  { %v4079_v50 = vpop.eup %4078  ;;  %v2010_v52 = vmul.f32 0.5, %v4077_v54 }
 0x6a7   :  { %v2006_v14 = vmul.f32 0.5, %v4079_v50 }
 0x6a8   :  { %v2011_v24 = vadd.f32 0.5, %v2010_v52  ;;  %v5270_v52 = vld [vmem:[#allocation33_spill] sm:$0xff] }
 0x6a9   :  { %v2007_v25 = vadd.f32 0.5, %v2006_v14 }
 0x6aa   :  { %v2017_v16 = vmul.f32 %v2011_v24, %v4887_v45 }
 0x6b3   :  { %v1955_v51 = vpop.f32.mrf.mxu1  ;;  %v1997_v44 = vpop.f32.mrf.mxu0 }
 0x6b4   :  { %v1961_v59 = vadd.f32 %v1955_v51, %v5266_v58  ;;  %v2003_v56 = vadd.f32 %v1997_v44, %v5267_v46  ;;  %v5269_v46 = vld [vmem:[#allocation21_spill] sm:$0xff] }
 0x6b5   :  { %v3660_v49 = vpop.f32.mrf.mxu1  ;;  %v3680_v57 = vpop.f32.mrf.mxu0 }
 0x6b6   :  { %4080 = vtanh.f32 %v1961_v59  ;;  %v2013_v8 = vmul.f32 0.5, %v2003_v56 }
 0x6b7   :  { %v1958_v61 = vpop.f32.mrf.mxu1  ;;  %v2000_v1 = vpop.f32.mrf.mxu0 }
 0x6b8   :  { %4082 = vtanh.f32 %v2013_v8  ;;  %v5268_v61 = vld [vmem:[#allocation22_spill] sm:$0xff] }
 0x6b9   :  { %v3661_v55 = vpop.f32.mrf.mxu1  ;;  %v3681_v9 = vpop.f32.mrf.mxu0 }
 0x6c3   :  { %v4081_v15 = vpop.eup %4080 }
 0x6c4   :  { %v2018_v17 = vmul.f32 %v4081_v15, %v2007_v25 }
 0x6c5   :  { %v4083_v19 = vpop.eup %4082 }
 0x6c6   :  { %v5007_v18 = vadd.f32 %v2018_v17, %v2017_v16  ;;  %v2015_v20 = vmul.f32 0.5, %v4083_v19  ;;  %v5271_v16 = vld [vmem:[#allocation34_spill] sm:$0xff] }
 0x6c8   :  { %4084 = vtanh.f32 %v5007_v18  ;;  %v2016_v21 = vadd.f32 0.5, %v2015_v20 }
 0x6d5   :  { %v4085_v2 = vpop.eup %4084 }
 0x6d6   :  { %v2021_v7 = vmul.f32 %v4085_v2, %v2016_v21 }
 0x6d8   :  { %v2022_v6 = vpack.c.bf16 %v2021_v7, %v2021_v7 }
 0x6da   :  { %3699 = vmatmul.mubr.bf16.vlgmr.msra.gmra.mxu1 %v2022_v6  ;;  %3719 = vmatmul.mubr.bf16.vlgmr.msra.gmra.mxu0 %v2022_v6 }
 0x6db   :  { %3723 = vmatpush3.bf16.msra.mxu1 %v4890_v63  ;;  %3743 = vmatpush3.bf16.msra.mxu0 %v4893_v43 }
 0x6dc   :  { %3724 = vmatprep.subr.bf16.mxu1 %v5257_v3  ;;  %3744 = vmatprep.subr.bf16.mxu0 %v5257_v3 }
 0x6dd   :  { %3738 = vmatprep.mubr.msk.bf16.mxu1 %vm4244_vm12, %v5257_v3  ;;  %3758 = vmatprep.mubr.msk.bf16.mxu0 %vm4244_vm12, %v5257_v3 }
 0x6df   :  { %3725 = vmatpush3.bf16.msra.mxu1 %v4902_v4  ;;  %3745 = vmatpush3.bf16.msra.mxu0 %v4905_v42 }
 0x6e0   :  { %3726 = vmatprep.subr.bf16.mxu1 %v5257_v3  ;;  %3746 = vmatprep.subr.bf16.mxu0 %v5257_v3 }
 0x6e3   :  { %3727 = vmatpush3.bf16.msra.mxu1 %v4910_v5  ;;  %3747 = vmatpush3.bf16.msra.mxu0 %v4913_v48 }
 0x6e4   :  { %3728 = vmatprep.subr.bf16.mxu1 %v5257_v3  ;;  %3748 = vmatprep.subr.bf16.mxu0 %v5257_v3 }
 0x6e7   :  { %3729 = vmatpush3.bf16.msra.mxu1 %v4918_v0  ;;  %3749 = vmatpush3.bf16.msra.mxu0 %v4921_v47 }
 0x6e8   :  { %3730 = vmatprep.subr.bf16.mxu1 %v5257_v3  ;;  %3750 = vmatprep.subr.bf16.mxu0 %v5257_v3 }
 0x6eb   :  { %3731 = vmatpush3.bf16.msra.mxu1 %v4926_v38  ;;  %3751 = vmatpush3.bf16.msra.mxu0 %v4929_v39 }
 0x6ec   :  { %3732 = vmatprep.subr.bf16.mxu1 %v5257_v3  ;;  %3752 = vmatprep.subr.bf16.mxu0 %v5257_v3 }
 0x6ef   :  { %3733 = vmatpush3.bf16.msra.mxu1 %v4934_v40  ;;  %3753 = vmatpush3.bf16.msra.mxu0 %v4937_v41 }
 0x6f0   :  { %3734 = vmatprep.subr.bf16.mxu1 %v5257_v3  ;;  %3754 = vmatprep.subr.bf16.mxu0 %v5257_v3 }
 0x6f3   :  { %3735 = vmatpush3.bf16.msra.mxu1 %v4942_v62  ;;  %3755 = vmatpush3.bf16.msra.mxu0 %v4945_v22 }
 0x6f4   :  { %3736 = vmatprep.subr.bf16.mxu1 %v5257_v3  ;;  %3756 = vmatprep.subr.bf16.mxu0 %v5257_v3 }
 0x6f7   :  { %3737 = vmatpush3.bf16.msra.mxu1 %v4950_v53  ;;  %3757 = vmatpush3.bf16.msra.mxu0 %v4953_v23 }
 0x6f8   :  { %3762 = vmatprep.subr.bf16.mxu1 %v5257_v3  ;;  %3782 = vmatprep.subr.bf16.mxu0 %v5257_v3 }
 0x6fa   :  { %3739 = vmatmul.mubr.bf16.vlgmr.msra.gmra.mxu1 %v2022_v6  ;;  %3759 = vmatmul.mubr.bf16.vlgmr.msra.gmra.mxu0 %v2022_v6 }
 0x6fb   :  { %3763 = vmatpush3.bf16.msra.mxu1 %v4822_v26  ;;  %3783 = vmatpush3.bf16.msra.mxu0 %v4825_v27 }
 0x6fc   :  { %3764 = vmatprep.subr.bf16.mxu1 %v5257_v3  ;;  %3784 = vmatprep.subr.bf16.mxu0 %v5257_v3 }
 0x6fd   :  { %3778 = vmatprep.mubr.msk.bf16.mxu1 %vm4244_vm12, %v5257_v3  ;;  %3798 = vmatprep.mubr.msk.bf16.mxu0 %vm4244_vm12, %v5257_v3 }
 0x6ff   :  { %3765 = vmatpush3.bf16.msra.mxu1 %v4834_v28  ;;  %3785 = vmatpush3.bf16.msra.mxu0 %v4837_v29 }
 0x700   :  { %3766 = vmatprep.subr.bf16.mxu1 %v5257_v3  ;;  %3786 = vmatprep.subr.bf16.mxu0 %v5257_v3 }
 0x703   :  { %3767 = vmatpush3.bf16.msra.mxu1 %v4842_v30  ;;  %3787 = vmatpush3.bf16.msra.mxu0 %v4845_v31 }
 0x704   :  { %3768 = vmatprep.subr.bf16.mxu1 %v5257_v3  ;;  %3788 = vmatprep.subr.bf16.mxu0 %v5257_v3 }
 0x707   :  { %3769 = vmatpush3.bf16.msra.mxu1 %v4850_v32  ;;  %3789 = vmatpush3.bf16.msra.mxu0 %v4853_v33 }
 0x708   :  { %3770 = vmatprep.subr.bf16.mxu1 %v5257_v3  ;;  %3790 = vmatprep.subr.bf16.mxu0 %v5257_v3 }
 0x70b   :  { %3771 = vmatpush3.bf16.msra.mxu1 %v4858_v34  ;;  %3791 = vmatpush3.bf16.msra.mxu0 %v4861_v35 }
 0x70c   :  { %3772 = vmatprep.subr.bf16.mxu1 %v5257_v3  ;;  %3792 = vmatprep.subr.bf16.mxu0 %v5257_v3 }
 0x70f   :  { %3773 = vmatpush3.bf16.msra.mxu1 %v4866_v36  ;;  %3793 = vmatpush3.bf16.msra.mxu0 %v4869_v37 }
 0x710   :  { %3774 = vmatprep.subr.bf16.mxu1 %v5257_v3  ;;  %3794 = vmatprep.subr.bf16.mxu0 %v5257_v3 }
 0x713   :  { %3775 = vmatpush3.bf16.msra.mxu1 %v4986_v10  ;;  %3795 = vmatpush3.bf16.msra.mxu0 %v4989_v11 }
 0x714   :  { %3776 = vmatprep.subr.bf16.mxu1 %v5257_v3  ;;  %3796 = vmatprep.subr.bf16.mxu0 %v5257_v3 }
 0x717   :  { %3777 = vmatpush3.bf16.msra.mxu1 %v4994_v12  ;;  %3797 = vmatpush3.bf16.msra.mxu0 %v4997_v13 }
 0x718   :  { %3802 = vmatprep.subr.bf16.mxu1 %v5257_v3  ;;  %3822 = vmatprep.subr.bf16.mxu0 %v5257_v3 }
 0x79a   :  { %v2058_v45 = vpop.f32.mrf.mxu1  ;;  %v2100_v60 = vpop.f32.mrf.mxu0 }
 0x79b   :  { %v2106_v1 = vadd.f32 %v2100_v60, %v5268_v61  ;;  %v2064_v56 = vadd.f32 %v2058_v45, %v5269_v46 }
 0x79c   :  { %v3700_v51 = vpop.f32.mrf.mxu1  ;;  %v3720_v44 = vpop.f32.mrf.mxu0 }
 0x79d   :  { %v2195_v54 = vmul.f32 0.5, %v2106_v1  ;;  %v2191_v55 = vmul.f32 0.5, %v2064_v56 }
 0x79e   :  { %v2061_v58 = vpop.f32.mrf.mxu1  ;;  %v2103_v59 = vpop.f32.mrf.mxu0 }
 0x79f   :  { %4086 = vtanh.f32 %v2195_v54 }
 0x7a0   :  { %v3701_v49 = vpop.f32.mrf.mxu1  ;;  %v3721_v57 = vpop.f32.mrf.mxu0  ;;  %4088 = vtanh.f32 %v2191_v55 }
 0x7ac   :  { %v4087_v19 = vpop.eup %4086 }
 0x7ad   :  { %v4089_v2 = vpop.eup %4088  ;;  %v2197_v7 = vmul.f32 0.5, %v4087_v19 }
 0x7ae   :  { %v2193_v45 = vmul.f32 0.5, %v4089_v2 }
 0x7af   :  { %v2198_v60 = vadd.f32 0.5, %v2197_v7 }
 0x7b0   :  { %v2194_v51 = vadd.f32 0.5, %v2193_v45 }
 0x7b1   :  { %v2204_v58 = vmul.f32 %v2198_v60, %v5007_v18  ;;  %v5274_v18 = vld [vmem:[#allocation27_spill] sm:$0xff] }
 0x7ba   :  { %v2142_v9 = vpop.f32.mrf.mxu1  ;;  %v2184_v50 = vpop.f32.mrf.mxu0 }
 0x7bb   :  { %v2148_v8 = vadd.f32 %v2142_v9, %v5270_v52  ;;  %v2190_v17 = vadd.f32 %v2184_v50, %v5271_v16 }
 0x7bc   :  { %v3740_v14 = vpop.f32.mrf.mxu1  ;;  %v3760_v24 = vpop.f32.mrf.mxu0 }
 0x7bd   :  { %4090 = vtanh.f32 %v2148_v8  ;;  %v2200_v6 = vmul.f32 0.5, %v2190_v17  ;;  %v5275_v14 = vld [vmem:[#allocation28_spill] sm:$0xff] }
 0x7be   :  { %v2145_v25 = vpop.f32.mrf.mxu1  ;;  %v2187_v15 = vpop.f32.mrf.mxu0 }
 0x7bf   :  { %4092 = vtanh.f32 %v2200_v6 }
 0x7c0   :  { %v3741_v20 = vpop.f32.mrf.mxu1  ;;  %v3761_v21 = vpop.f32.mrf.mxu0 }
 0x7ca   :  { %v4091_v44 = vpop.eup %4090 }
 0x7cb   :  { %v2205_v59 = vmul.f32 %v4091_v44, %v2194_v51 }
 0x7cc   :  { %v4093_v57 = vpop.eup %4092 }
 0x7cd   :  { %v5087_v49 = vadd.f32 %v2205_v59, %v2204_v58  ;;  %v2202_v61 = vmul.f32 0.5, %v4093_v57 }
 0x7cf   :  { %4094 = vtanh.f32 %v5087_v49  ;;  %v2203_v1 = vadd.f32 0.5, %v2202_v61 }
 0x7dc   :  { %v4095_v46 = vpop.eup %4094 }
 0x7dd   :  { %v2208_v56 = vmul.f32 %v4095_v46, %v2203_v1 }
 0x7df   :  { %v2209_v54 = vpack.c.bf16 %v2208_v56, %v2208_v56  ;;  %v5277_v56 = vld [vmem:[#allocation19_spill] sm:$0xff] }
 0x7e1   :  { %3779 = vmatmul.mubr.bf16.vlgmr.msra.gmra.mxu1 %v2209_v54  ;;  %3799 = vmatmul.mubr.bf16.vlgmr.msra.gmra.mxu0 %v2209_v54 }
 0x7e2   :  { %3803 = vmatpush3.bf16.msra.mxu1 %v4890_v63  ;;  %3823 = vmatpush3.bf16.msra.mxu0 %v4893_v43 }
 0x7e3   :  { %3804 = vmatprep.subr.bf16.mxu1 %v5257_v3  ;;  %3824 = vmatprep.subr.bf16.mxu0 %v5257_v3 }
 0x7e4   :  { %3818 = vmatprep.mubr.msk.bf16.mxu1 %vm4244_vm12, %v5257_v3  ;;  %3838 = vmatprep.mubr.msk.bf16.mxu0 %vm4244_vm12, %v5257_v3 }
 0x7e6   :  { %3805 = vmatpush3.bf16.msra.mxu1 %v4902_v4  ;;  %3825 = vmatpush3.bf16.msra.mxu0 %v4905_v42 }
 0x7e7   :  { %3806 = vmatprep.subr.bf16.mxu1 %v5257_v3  ;;  %3826 = vmatprep.subr.bf16.mxu0 %v5257_v3 }
 0x7ea   :  { %3807 = vmatpush3.bf16.msra.mxu1 %v4910_v5  ;;  %3827 = vmatpush3.bf16.msra.mxu0 %v4913_v48 }
 0x7eb   :  { %3808 = vmatprep.subr.bf16.mxu1 %v5257_v3  ;;  %3828 = vmatprep.subr.bf16.mxu0 %v5257_v3 }
 0x7ee   :  { %3809 = vmatpush3.bf16.msra.mxu1 %v4918_v0  ;;  %3829 = vmatpush3.bf16.msra.mxu0 %v4921_v47 }
 0x7ef   :  { %3810 = vmatprep.subr.bf16.mxu1 %v5257_v3  ;;  %3830 = vmatprep.subr.bf16.mxu0 %v5257_v3 }
 0x7f2   :  { %3811 = vmatpush3.bf16.msra.mxu1 %v4926_v38  ;;  %3831 = vmatpush3.bf16.msra.mxu0 %v4929_v39 }
 0x7f3   :  { %3812 = vmatprep.subr.bf16.mxu1 %v5257_v3  ;;  %3832 = vmatprep.subr.bf16.mxu0 %v5257_v3 }
 0x7f6   :  { %3813 = vmatpush3.bf16.msra.mxu1 %v4934_v40  ;;  %3833 = vmatpush3.bf16.msra.mxu0 %v4937_v41 }
 0x7f7   :  { %3814 = vmatprep.subr.bf16.mxu1 %v5257_v3  ;;  %3834 = vmatprep.subr.bf16.mxu0 %v5257_v3 }
 0x7fa   :  { %3815 = vmatpush3.bf16.msra.mxu1 %v4942_v62  ;;  %3835 = vmatpush3.bf16.msra.mxu0 %v4945_v22 }
 0x7fb   :  { %3816 = vmatprep.subr.bf16.mxu1 %v5257_v3  ;;  %3836 = vmatprep.subr.bf16.mxu0 %v5257_v3 }
 0x7fe   :  { %3817 = vmatpush3.bf16.msra.mxu1 %v4950_v53  ;;  %3837 = vmatpush3.bf16.msra.mxu0 %v4953_v23 }
 0x7ff   :  { %3842 = vmatprep.subr.bf16.mxu1 %v5257_v3  ;;  %3862 = vmatprep.subr.bf16.mxu0 %v5257_v3 }
 0x801   :  { %3819 = vmatmul.mubr.bf16.vlgmr.msra.gmra.mxu1 %v2209_v54  ;;  %3839 = vmatmul.mubr.bf16.vlgmr.msra.gmra.mxu0 %v2209_v54 }
 0x802   :  { %3843 = vmatpush3.bf16.msra.mxu1 %v4822_v26  ;;  %3863 = vmatpush3.bf16.msra.mxu0 %v4825_v27 }
 0x803   :  { %3844 = vmatprep.subr.bf16.mxu1 %v5257_v3  ;;  %3864 = vmatprep.subr.bf16.mxu0 %v5257_v3 }
 0x804   :  { %3858 = vmatprep.mubr.msk.bf16.mxu1 %vm4244_vm12, %v5257_v3  ;;  %3878 = vmatprep.mubr.msk.bf16.mxu0 %vm4244_vm12, %v5257_v3 }
 0x806   :  { %3845 = vmatpush3.bf16.msra.mxu1 %v4834_v28  ;;  %3865 = vmatpush3.bf16.msra.mxu0 %v4837_v29 }
 0x807   :  { %3846 = vmatprep.subr.bf16.mxu1 %v5257_v3  ;;  %3866 = vmatprep.subr.bf16.mxu0 %v5257_v3 }
 0x80a   :  { %3847 = vmatpush3.bf16.msra.mxu1 %v4842_v30  ;;  %3867 = vmatpush3.bf16.msra.mxu0 %v4845_v31 }
 0x80b   :  { %3848 = vmatprep.subr.bf16.mxu1 %v5257_v3  ;;  %3868 = vmatprep.subr.bf16.mxu0 %v5257_v3 }
 0x80e   :  { %3849 = vmatpush3.bf16.msra.mxu1 %v4850_v32  ;;  %3869 = vmatpush3.bf16.msra.mxu0 %v4853_v33 }
 0x80f   :  { %3850 = vmatprep.subr.bf16.mxu1 %v5257_v3  ;;  %3870 = vmatprep.subr.bf16.mxu0 %v5257_v3 }
 0x812   :  { %3851 = vmatpush3.bf16.msra.mxu1 %v4858_v34  ;;  %3871 = vmatpush3.bf16.msra.mxu0 %v4861_v35  ;;  %v5272_v34 = vld [vmem:[#allocation16_spill] sm:$0xff] }
 0x813   :  { %3852 = vmatprep.subr.bf16.mxu1 %v5257_v3  ;;  %3872 = vmatprep.subr.bf16.mxu0 %v5257_v3 }
 0x816   :  { %3853 = vmatpush3.bf16.msra.mxu1 %v4866_v36  ;;  %3873 = vmatpush3.bf16.msra.mxu0 %v4869_v37  ;;  %v5273_v36 = vld [vmem:[#allocation15_spill] sm:$0xff] }
 0x817   :  { %3854 = vmatprep.subr.bf16.mxu1 %v5257_v3  ;;  %3874 = vmatprep.subr.bf16.mxu0 %v5257_v3 }
 0x81a   :  { %3855 = vmatpush3.bf16.msra.mxu1 %v4986_v10  ;;  %3875 = vmatpush3.bf16.msra.mxu0 %v4989_v11 }
 0x81b   :  { %3856 = vmatprep.subr.bf16.mxu1 %v5257_v3  ;;  %3876 = vmatprep.subr.bf16.mxu0 %v5257_v3 }
 0x81e   :  { %3857 = vmatpush3.bf16.msra.mxu1 %v4994_v12  ;;  %3877 = vmatpush3.bf16.msra.mxu0 %v4997_v13 }
 0x81f   :  { %3882 = vmatprep.subr.bf16.mxu1 %v5257_v3  ;;  %3902 = vmatprep.subr.bf16.mxu0 %v5257_v3 }
 0x8a1   :  { %v2245_v26 = vpop.f32.mrf.mxu1  ;;  %v2287_v27 = vpop.f32.mrf.mxu0 }
 0x8a2   :  { %v2293_v35 = vadd.f32 %v2287_v27, %v5272_v34  ;;  %v2251_v37 = vadd.f32 %v2245_v26, %v5273_v36 }
 0x8a3   :  { %v3780_v28 = vpop.f32.mrf.mxu1  ;;  %v3800_v29 = vpop.f32.mrf.mxu0 }
 0x8a4   :  { %v2382_v10 = vmul.f32 0.5, %v2293_v35  ;;  %v2378_v11 = vmul.f32 0.5, %v2251_v37  ;;  %v5278_v29 = vld [vmem:[#allocation31_spill] sm:$0xff]  ;;  %v5279_v35 = vld [vmem:[#allocation32_spill] sm:$0xff] }
 0x8a5   :  { %v2248_v30 = vpop.f32.mrf.mxu1  ;;  %v2290_v31 = vpop.f32.mrf.mxu0 }
 0x8a6   :  { %4096 = vtanh.f32 %v2382_v10 }
 0x8a7   :  { %v3781_v32 = vpop.f32.mrf.mxu1  ;;  %v3801_v33 = vpop.f32.mrf.mxu0  ;;  %4098 = vtanh.f32 %v2378_v11 }
 0x8b3   :  { %v4097_v25 = vpop.eup %4096 }
 0x8b4   :  { %v4099_v17 = vpop.eup %4098  ;;  %v2384_v19 = vmul.f32 0.5, %v4097_v25 }
 0x8b5   :  { %v2380_v21 = vmul.f32 0.5, %v4099_v17 }
 0x8b6   :  { %v2385_v2 = vadd.f32 0.5, %v2384_v19 }
 0x8b7   :  { %v2381_v7 = vadd.f32 0.5, %v2380_v21  ;;  %v2796_v21 = vld [vmem:[%s5231_s6] ss:$0 sm:$0xff] }
 0x8b8   :  { %v2391_v45 = vmul.f32 %v2385_v2, %v5087_v49  ;;  %v5276_v49 = vld [vmem:[#allocation20_spill] sm:$0xff] }
 0x8c1   :  { %v2329_v12 = vpop.f32.mrf.mxu1  ;;  %v2371_v13 = vpop.f32.mrf.mxu0 }
 0x8c2   :  { %v2335_v55 = vadd.f32 %v2329_v12, %v5274_v18  ;;  %v2377_v24 = vadd.f32 %v2371_v13, %v5275_v14 }
 0x8c3   :  { %v3820_v9 = vpop.f32.mrf.mxu1  ;;  %v3840_v50 = vpop.f32.mrf.mxu0 }
 0x8c4   :  { %4100 = vtanh.f32 %v2335_v55  ;;  %v2387_v20 = vmul.f32 0.5, %v2377_v24 }
 0x8c5   :  { %v2332_v52 = vpop.f32.mrf.mxu1  ;;  %v2374_v8 = vpop.f32.mrf.mxu0 }
 0x8c6   :  { %4102 = vtanh.f32 %v2387_v20 }
 0x8c7   :  { %v3821_v15 = vpop.f32.mrf.mxu1  ;;  %v3841_v16 = vpop.f32.mrf.mxu0 }
 0x8d1   :  { %v4101_v6 = vpop.eup %4100 }
 0x8d2   :  { %v2392_v60 = vmul.f32 %v4101_v6, %v2381_v7 }
 0x8d3   :  { %v4103_v44 = vpop.eup %4102 }
 0x8d4   :  { %v5167_v51 = vadd.f32 %v2392_v60, %v2391_v45  ;;  %v2389_v58 = vmul.f32 0.5, %v4103_v44 }
 0x8d6   :  { %4104 = vtanh.f32 %v5167_v51  ;;  %v2390_v59 = vadd.f32 0.5, %v2389_v58 }
 0x8e3   :  { %v4105_v57 = vpop.eup %4104 }
 0x8e4   :  { %v2395_v61 = vmul.f32 %v4105_v57, %v2390_v59 }
 0x8e6   :  { %v2396_v1 = vpack.c.bf16 %v2395_v61, %v2395_v61 }
 0x8e8   :  { %3859 = vmatmul.mubr.bf16.vlgmr.msra.gmra.mxu1 %v2396_v1  ;;  %3879 = vmatmul.mubr.bf16.vlgmr.msra.gmra.mxu0 %v2396_v1 }
 0x8e9   :  { %3883 = vmatpush3.bf16.msra.mxu1 %v4890_v63  ;;  %3903 = vmatpush3.bf16.msra.mxu0 %v4893_v43  ;;  %v4028_v63 = vld [vmem:[#allocation8 + $0x38] sm:$0xff]   ;;  %v4029_v43 = vld [vmem:[#allocation8 + $0x30] sm:$0xff]  }
 0x8ea   :  { %3884 = vmatprep.subr.bf16.mxu1 %v5257_v3  ;;  %3904 = vmatprep.subr.bf16.mxu0 %v5257_v3 }
 0x8eb   :  { %3898 = vmatprep.mubr.msk.bf16.mxu1 %vm4244_vm12, %v5257_v3  ;;  %3918 = vmatprep.mubr.msk.bf16.mxu0 %vm4244_vm12, %v5257_v3 }
 0x8ed   :  { %3885 = vmatpush3.bf16.msra.mxu1 %v4902_v4  ;;  %3905 = vmatpush3.bf16.msra.mxu0 %v4905_v42  ;;  %v4030_v4 = vld [vmem:[#allocation8 + $0x28] sm:$0xff]   ;;  %v4031_v42 = vld [vmem:[#allocation8 + $0x20] sm:$0xff]  }
 0x8ee   :  { %3886 = vmatprep.subr.bf16.mxu1 %v5257_v3  ;;  %3906 = vmatprep.subr.bf16.mxu0 %v5257_v3 }
 0x8f1   :  { %3887 = vmatpush3.bf16.msra.mxu1 %v4910_v5  ;;  %3907 = vmatpush3.bf16.msra.mxu0 %v4913_v48  ;;  %v4032_v5 = vld [vmem:[#allocation8 + $0x18] sm:$0xff]   ;;  %v4033_v48 = vld [vmem:[#allocation8 + $0x10] sm:$0xff]  }
 0x8f2   :  { %3888 = vmatprep.subr.bf16.mxu1 %v5257_v3  ;;  %3908 = vmatprep.subr.bf16.mxu0 %v5257_v3 }
 0x8f5   :  { %3889 = vmatpush3.bf16.msra.mxu1 %v4918_v0  ;;  %3909 = vmatpush3.bf16.msra.mxu0 %v4921_v47  ;;  %v4034_v0 = vld [vmem:[#allocation8 + $0x8] sm:$0xff]   ;;  %v4035_v47 = vld [vmem:[#allocation8] sm:$0xff]  }
 0x8f6   :  { %3890 = vmatprep.subr.bf16.mxu1 %v5257_v3  ;;  %3910 = vmatprep.subr.bf16.mxu0 %v5257_v3 }
 0x8f9   :  { %3891 = vmatpush3.bf16.msra.mxu1 %v4926_v38  ;;  %3911 = vmatpush3.bf16.msra.mxu0 %v4929_v39 }
 0x8fa   :  { %3892 = vmatprep.subr.bf16.mxu1 %v5257_v3  ;;  %3912 = vmatprep.subr.bf16.mxu0 %v5257_v3 }
 0x8fd   :  { %3893 = vmatpush3.bf16.msra.mxu1 %v4934_v40  ;;  %3913 = vmatpush3.bf16.msra.mxu0 %v4937_v41 }
 0x8fe   :  { %3894 = vmatprep.subr.bf16.mxu1 %v5257_v3  ;;  %3914 = vmatprep.subr.bf16.mxu0 %v5257_v3 }
 0x901   :  { %3895 = vmatpush3.bf16.msra.mxu1 %v4942_v62  ;;  %3915 = vmatpush3.bf16.msra.mxu0 %v4945_v22 }
 0x902   :  { %3896 = vmatprep.subr.bf16.mxu1 %v5257_v3  ;;  %3916 = vmatprep.subr.bf16.mxu0 %v5257_v3 }
 0x905   :  { %3897 = vmatpush3.bf16.msra.mxu1 %v4950_v53  ;;  %3917 = vmatpush3.bf16.msra.mxu0 %v4953_v23 }
 0x906   :  { %3922 = vmatprep.subr.bf16.mxu1 %v5257_v3 }
 0x908   :  { %3899 = vmatmul.mubr.bf16.vlgmr.msra.gmra.mxu1 %v2396_v1  ;;  %3919 = vmatmul.mubr.bf16.vlgmr.msra.gmra.mxu0 %v2396_v1 }
 0x909   :  { %3938 = vmatprep.mubr.msk.bf16.mxu1 %vm4244_vm12, %v5257_v3  ;;  %3923 = vmatpush3.bf16.msra.mxu1 %v4028_v63 }
 0x90a   :  { %3924 = vmatprep.subr.bf16.mxu1 %v5257_v3 }
 0x90d   :  { %3925 = vmatpush3.bf16.msra.mxu1 %v4029_v43 }
 0x90e   :  { %3926 = vmatprep.subr.bf16.mxu1 %v5257_v3 }
 0x911   :  { %3927 = vmatpush3.bf16.msra.mxu1 %v4030_v4 }
 0x912   :  { %3928 = vmatprep.subr.bf16.mxu1 %v5257_v3 }
 0x915   :  { %3929 = vmatpush3.bf16.msra.mxu1 %v4031_v42 }
 0x916   :  { %3930 = vmatprep.subr.bf16.mxu1 %v5257_v3 }
 0x919   :  { %3931 = vmatpush3.bf16.msra.mxu1 %v4032_v5 }
 0x91a   :  { %3932 = vmatprep.subr.bf16.mxu1 %v5257_v3 }
 0x91d   :  { %3933 = vmatpush3.bf16.msra.mxu1 %v4033_v48 }
 0x91e   :  { %3934 = vmatprep.subr.bf16.mxu1 %v5257_v3 }
 0x921   :  { %3935 = vmatpush3.bf16.msra.mxu1 %v4034_v0 }
 0x922   :  { %3936 = vmatprep.subr.bf16.mxu1 %v5257_v3 }
 0x925   :  { %3937 = vmatpush3.bf16.msra.mxu1 %v4035_v47 }
 0x9a8   :  { %v2432_v38 = vpop.f32.mrf.mxu1  ;;  %v2474_v39 = vpop.f32.mrf.mxu0 }
 0x9a9   :  { %v2480_v46 = vadd.f32 %v2474_v39, %v5276_v49  ;;  %v2438_v54 = vadd.f32 %v2432_v38, %v5277_v56 }
 0x9aa   :  { %v3860_v40 = vpop.f32.mrf.mxu1  ;;  %v3880_v41 = vpop.f32.mrf.mxu0 }
 0x9ab   :  { %v2569_v26 = vmul.f32 0.5, %v2480_v46  ;;  %v2565_v27 = vmul.f32 0.5, %v2438_v54 }
 0x9ac   :  { %v2435_v62 = vpop.f32.mrf.mxu1  ;;  %v2477_v22 = vpop.f32.mrf.mxu0 }
 0x9ad   :  { %4106 = vtanh.f32 %v2569_v26 }
 0x9ae   :  { %v3861_v53 = vpop.f32.mrf.mxu1  ;;  %v3881_v23 = vpop.f32.mrf.mxu0  ;;  %4108 = vtanh.f32 %v2565_v27 }
 0x9ba   :  { %v4107_v37 = vpop.eup %4106 }
 0x9bb   :  { %v4109_v12 = vpop.eup %4108  ;;  %v2571_v13 = vmul.f32 0.5, %v4107_v37 }
 0x9bc   :  { %v2567_v55 = vmul.f32 0.5, %v4109_v12 }
 0x9bd   :  { %v2572_v9 = vadd.f32 0.5, %v2571_v13 }
 0x9be   :  { %v2568_v50 = vadd.f32 0.5, %v2567_v55 }
 0x9bf   :  { %v2578_v8 = vmul.f32 %v2572_v9, %v5167_v51 }
 0x9c8   :  { %v2516_v28 = vpop.f32.mrf.mxu1  ;;  %v2558_v3 = vpop.f32.mrf.mxu0 }
 0x9c9   :  { %v2522_v30 = vadd.f32 %v2516_v28, %v5278_v29  ;;  %v2564_v36 = vadd.f32 %v2558_v3, %v5279_v35 }
 0x9ca   :  { %v3900_v31 = vpop.f32.mrf.mxu1  ;;  %v3920_v32 = vpop.f32.mrf.mxu0 }
 0x9cb   :  { %4110 = vtanh.f32 %v2522_v30  ;;  %v2574_v18 = vmul.f32 0.5, %v2564_v36 }
 0x9cc   :  { %v2519_v33 = vpop.f32.mrf.mxu1  ;;  %v2561_v34 = vpop.f32.mrf.mxu0 }
 0x9cd   :  { %4112 = vtanh.f32 %v2574_v18 }
 0x9ce   :  { %v3901_v10 = vpop.f32.mrf.mxu1  ;;  %v3921_v11 = vpop.f32.mrf.mxu0 }
 0x9d8   :  { %v4111_v52 = vpop.eup %4110 }
 0x9d9   :  { %v2579_v14 = vmul.f32 %v4111_v52, %v2568_v50 }
 0x9da   :  { %v4113_v25 = vpop.eup %4112 }
 0x9db   :  { %v2580_v24 = vadd.f32 %v2579_v14, %v2578_v8  ;;  %v2576_v15 = vmul.f32 0.5, %v4113_v25 }
 0x9dd   :  { %4114 = vtanh.f32 %v2580_v24  ;;  %v2577_v16 = vadd.f32 0.5, %v2576_v15 }
 0x9ea   :  { %v4115_v17 = vpop.eup %4114 }
 0x9eb   :  { %v2582_v19 = vmul.f32 %v4115_v17, %v2577_v16 }
 0x9ed   :  { %v2583_v20 = vpack.c.bf16 %v2582_v19, %v2582_v19 }
 0x9ef   :  { %3939 = vmatmul.mubr.bf16.vlgmr.msra.gmra.mxu1 %v2583_v20 }
 0xaaf   :  { %v2689_v2 = vpop.f32.mrf.mxu1 }
 0xab0   :  { %v2690_v7 = vadd.f32 %v2796_v21, %v2689_v2 }
 0xab1   :  { %v3940_v6 = vpop.f32.mrf.mxu1 }
 0xab2   :  { %2695 = vst [vmem:[#allocation9] sm:$0xff] %v2690_v7 }
 0xab3   :  { %v2692_v45 = vpop.f32.mrf.mxu1 }
 0xab4   :  { %4219 = shalt.err (!%p4216_p5)
}
 0xab5   :  { %2705 = dma.vmem_to_hbm [thread:$0]  %s2703_s8, 128, %s5232_s7, [#allocation5]   ;;  %v3941_v60 = vpop.f32.mrf.mxu1 }
 0xab6   :  { %4232 = dma.done.wait [#allocation5], 128  }
 0xab7   :  { %4233 = vsyncadd [#allocation5], 4294967168 }
 0xab8   :  { %2709 = vsyncpa [#allocation4], 1 }
 0xab9   :  { %2710 = vsyncpa [#allocation7], 1 }
 0xaba   :  { %2711 = vsyncpa [#allocation5], 1 }

</bundles_post_ra>
